<compile_context>
chip_gen: v7x
topology: tpu7x:2x2x1
jax: 0.10.0
libtpu: 0.0.40
codegen_flags: <defaults>
</compile_context>

<pallas_src>
import jax
import jax.numpy as jnp
import numpy as np
from jax.experimental import pallas as pl
from jax.experimental.pallas import tpu as pltpu

LORDER = 20                    # FSMN left order (causal memory), as in PyTorch
MATMUL_DTYPE = jnp.bfloat16    # MXU-native on all TPU generations; f32 accum
TB_CAP = 256                   # rows (b*T samples) per grid step (upper bound)
SUB_CAP = 128                  # per-row accumulator sub-chunk (<= ~16 f32 vregs)


def _round_up(a, m):
    return ((a + m - 1) // m) * m


# ----------------------------------------------------------------------------
# Pallas kernel
# ----------------------------------------------------------------------------
def _complex_fsmn_kernel(x_ref, wlin_ref, blin_ref, wproj_ref, wconv_ref, o_ref):
    H, TB, C2 = x_ref.shape            # x block: (H, TB, 2D), lanes [re | im]
    D = C2 // 2
    L, C4 = wconv_ref.shape            # (LORDER, 4D)
    M = H * TB

    # --- fused linear + ReLU + block-diag projection (MXU, bf16 / f32 acc) ---
    # x2 row (h*TB + r) = [xr(h,r) | xi(h,r)]
    x2 = x_ref[...].reshape(M, C2)
    f1 = jnp.dot(x2.astype(MATMUL_DTYPE), wlin_ref[...],
                 preferred_element_type=jnp.float32) + blin_ref[...]
    f1 = jnp.maximum(f1, 0.0)
    # p2 column groups (each D wide): [re(xr) | im(xr) | re(xi) | im(xi)]
    p2 = jnp.dot(f1.astype(MATMUL_DTYPE), wproj_ref[...],
                 preferred_element_type=jnp.float32)          # (M, 4D) f32

    # --- causal depthwise FSMN conv along H + residual combine (f32, VPU) ----
    wc = wconv_ref[...]                                       # (L, 4D) f32
    wc_self = 1.0 + wc[L - 1:L, :]                            # folds z = p1 + conv

    SUB = min(TB, SUB_CAP)             # wrapper guarantees TB % SUB == 0
    n_sub = TB // SUB

    # Static unroll over H rows; fine for the h values this layer sees
    # (compile-time cost grows ~linearly in H * LORDER).
    for t in range(H):                             # output FSMN-time row (h)
        j0 = max(0, L - 1 - t)                     # skip taps that only hit pad
        for cb in range(n_sub):
            r0 = cb * SUB
            base = t * TB + r0
            p_t = p2[base:base + SUB, :]                       # (SUB, 4D)
            acc = p_t * wc_self                                # self tap + residual
            for j in range(j0, L - 1):                         # valid history taps
                s = t - (L - 1) + j                            # source row (< t)
                ps = p2[s * TB + r0: s * TB + r0 + SUB, :]     # contiguous slice
                acc = acc + wc[j:j + 1, :] * ps

            xrow = x_ref[t, r0:r0 + SUB, :]                    # (SUB, 2D)
            xr = xrow[:, :D]
            xi = xrow[:, D:]
            # fsmn_re(xr)=xr+acc[...,0:D]   fsmn_im(xr)=xr+acc[...,D:2D]
            # fsmn_re(xi)=xi+acc[...,2D:3D] fsmn_im(xi)=xi+acc[...,3D:4D]
            real = xr - xi + acc[:, 0:D] - acc[:, 3 * D:4 * D]
            imag = xr + xi + acc[:, D:2 * D] + acc[:, 2 * D:3 * D]
            o_ref[t, r0:r0 + SUB, :] = jnp.concatenate(
                [real, imag], axis=-1).astype(o_ref.dtype)


# ----------------------------------------------------------------------------
# Weight fusion (tiny, plain JAX): concatenated / block-diagonal weights
# ----------------------------------------------------------------------------
def _fuse_params(params):
    wl_re, wl_im = params["wlin_re"], params["wlin_im"]      # (D, Hid)
    bl_re, bl_im = params["blin_re"], params["blin_im"]      # (1, Hid)
    wp_re, wp_im = params["wproj_re"], params["wproj_im"]    # (Hid, D)
    wc_re, wc_im = params["wconv_re"], params["wconv_im"]    # (L, D)

    D, Hid = wl_re.shape
    assert wp_re.shape == (Hid, D), "residual requires project out dim == nIn"

    wl_cat = jnp.concatenate([wl_re, wl_im], axis=1)         # (D, 2Hid)
    zl = jnp.zeros_like(wl_cat)
    wlin_bd = jnp.concatenate(
        [jnp.concatenate([wl_cat, zl], axis=1),
         jnp.concatenate([zl, wl_cat], axis=1)], axis=0)     # (2D, 4Hid)
    blin_bd = jnp.concatenate([bl_re, bl_im, bl_re, bl_im], axis=1)  # (1, 4Hid)

    def block_diag4(a, b, c, d):
        mats = (a, b, c, d)
        zh = jnp.zeros((Hid, D), a.dtype)
        rows = [jnp.concatenate([m if j == k else zh for j in range(4)], axis=1)
                for k, m in enumerate(mats)]
        return jnp.concatenate(rows, axis=0)                 # (4Hid, 4D)

    wproj_bd = block_diag4(wp_re, wp_im, wp_re, wp_im)
    wconv_bd = jnp.concatenate([wc_re, wc_im, wc_re, wc_im], axis=1)  # (L, 4D)

    return (wlin_bd.astype(MATMUL_DTYPE), blin_bd.astype(jnp.float32),
            wproj_bd.astype(MATMUL_DTYPE), wconv_bd.astype(jnp.float32))


# ----------------------------------------------------------------------------
# pallas_call runner
# ----------------------------------------------------------------------------
def _choose_tb(B):
    """Pick the rows-per-block: multiple of 8, >=2 blocks when possible (v7x
    megacore), and a multiple of SUB_CAP when > SUB_CAP (in-kernel chunking)."""
    tb = min(TB_CAP, _round_up(B, 8))
    if B > 8:
        tb = min(tb, _round_up(-(-B // 2), 8))   # ceil(B/2), rounded to 8
    if tb > SUB_CAP:
        tb = (tb // SUB_CAP) * SUB_CAP
    return tb


def _run_complex_fsmn(xt, fused):
    """xt: (H, B, 2*D) f32 with lanes [0:D]=real, [D:2D]=imag."""
    H, B, C2 = xt.shape
    wlin_bd, blin_bd, wproj_bd, wconv_bd = fused

    TB = _choose_tb(B)
    n_blocks = pl.cdiv(B, TB)
    Bp = n_blocks * TB
    if Bp != B:
        xt = jnp.pad(xt, ((0, 0), (0, Bp - B), (0, 0)))

    row_spec = pl.BlockSpec((H, TB, C2), lambda i: (0, i, 0))

    def full(a):
        nd = a.ndim
        return pl.BlockSpec(a.shape, lambda i, nd=nd: (0,) * nd)

    out = pl.pallas_call(
        _complex_fsmn_kernel,
        grid=(n_blocks,),
        in_specs=[row_spec, full(wlin_bd), full(blin_bd),
                  full(wproj_bd), full(wconv_bd)],
        out_specs=row_spec,
        out_shape=jax.ShapeDtypeStruct((H, Bp, C2), jnp.float32),
        compiler_params=pltpu.CompilerParams(
            dimension_semantics=("parallel",),       # shards blocks across TCs
            vmem_limit_bytes=32 * 1024 * 1024),
    )(xt, wlin_bd, blin_bd, wproj_bd, wconv_bd)

    return out[:, :B] if Bp != B else out


# ----------------------------------------------------------------------------
# Wrapper reproducing ComplexUniDeepFsmn_L1.forward
# ----------------------------------------------------------------------------
@jax.jit
def complex_unideep_fsmn_l1(x, params):
    """x: (b, c, h, T, 2) float32 -> (b, c, h, T, 2) float32."""
    b, c, h, T, d = x.shape
    assert d == 2
    # (b,c,h,T,2) -> (h, b, T, 2, c) -> (h, b*T, 2c).  In a full model this
    # lane-dense layout should be kept across adjacent FSMN layers so these
    # HBM transposes amortize over the stack.
    xt = jnp.transpose(x, (2, 0, 3, 4, 1)).reshape(h, b * T, 2 * c)
    out = _run_complex_fsmn(xt, _fuse_params(params))        # (h, b*T, 2c)
    out = out.reshape(h, b, T, 2, c)
    return jnp.transpose(out, (1, 4, 0, 2, 3))               # -> (b, c, h, T, 2)


# ----------------------------------------------------------------------------
# Deterministic parameter construction (synthetic weights, PyTorch shapes)
# ----------------------------------------------------------------------------
def make_params(nIn, nHidden, key):
    ks = jax.random.split(key, 8)
    scale = 0.1

    def lin_w(k):   # torch Linear weight (nHidden, nIn) -> stored transposed
        return (scale * jax.random.normal(k, (nHidden, nIn))).T.astype(jnp.float32)

    def proj_w(k):  # torch Linear weight (nHidden, nHidden), no bias
        return (scale * jax.random.normal(k, (nHidden, nHidden))).T.astype(jnp.float32)

    def conv_w(k):  # torch Conv2d weight (nHidden, 1, LORDER, 1) -> (LORDER, nHidden)
        w = scale * jax.random.normal(k, (nHidden, 1, LORDER, 1))
        return jnp.transpose(w[:, 0, :, 0], (1, 0)).astype(jnp.float32)

    return {
        "wlin_re": lin_w(ks[0]),
        "blin_re": (scale * jax.random.normal(ks[1], (1, nHidden))).astype(jnp.float32),
        "wproj_re": proj_w(ks[2]),
        "wconv_re": conv_w(ks[3]),
        "wlin_im": lin_w(ks[4]),
        "blin_im": (scale * jax.random.normal(ks[5], (1, nHidden))).astype(jnp.float32),
        "wproj_im": proj_w(ks[6]),
        "wconv_im": conv_w(ks[7]),
    }


# ----------------------------------------------------------------------------
# Pure-JAX reference (same math as the PyTorch module, all f32)
# ----------------------------------------------------------------------------
def _fsmn_ref(u, wlin, blin, wproj, wconv):
    f1 = jax.nn.relu(u @ wlin + blin)
    p1 = f1 @ wproj
    L, H = wconv.shape[0], u.shape[1]
    p1_pad = jnp.pad(p1, ((0, 0), (L - 1, 0), (0, 0)))
    conv = sum(wconv[j][None, None, :] * p1_pad[:, j:j + H, :] for j in range(L))
    return u + p1 + conv


def reference(x, p):
    b, c, h, T, d = x.shape
    xt = jnp.transpose(x, (0, 3, 2, 1, 4)).reshape(b * T, h, c, 2)
    xr, xi = xt[..., 0], xt[..., 1]
    fr = lambda u: _fsmn_ref(u, p["wlin_re"], p["blin_re"], p["wproj_re"], p["wconv_re"])
    fi = lambda u: _fsmn_ref(u, p["wlin_im"], p["blin_im"], p["wproj_im"], p["wconv_im"])
    real = fr(xr) - fi(xi)
    imag = fr(xi) + fi(xr)
    out = jnp.stack([real, imag], axis=-1).reshape(b, T, h, c, 2)
    return jnp.transpose(out, (0, 3, 2, 1, 4))


# ----------------------------------------------------------------------------
if __name__ == "__main__":
    # nIn must equal nHidden for the FSMN residual add; d = 2 (real/imag).
    b, c, h, T, d = 2, 32, 16, 4, 2     # c == nIn == nHidden
    nIn = nHidden = c

    key = jax.random.PRNGKey(0)
    kx, kp = jax.random.split(key)
    x = jax.random.normal(kx, (b, c, h, T, d), dtype=jnp.float32)
    params = make_params(nIn, nHidden, kp)

    out = jax.block_until_ready(complex_unideep_fsmn_l1(x, params))
    ref = jax.block_until_ready(reference(x, params))

    assert out.shape == (b, c, h, T, d)
    # bf16 matmul operands (f32 accumulation) vs. the pure-f32 reference.
    np.testing.assert_allclose(np.asarray(out), np.asarray(ref),
                               atol=5e-2, rtol=5e-2)
    print("KERNEL_OK")
</pallas_src>

<mosaic_0001>
module attributes {stable_mosaic.version = 11 : i64} {
  func.func @_complex_fsmn_kernel(%arg0: i32, %arg1: memref<16x8x64xf32, #tpu.memory_space<vmem>>, %arg2: memref<64x128xbf16, #tpu.memory_space<vmem>>, %arg3: memref<1x128xf32, #tpu.memory_space<vmem>>, %arg4: memref<128x128xbf16, #tpu.memory_space<vmem>>, %arg5: memref<20x128xf32, #tpu.memory_space<vmem>>, %arg6: memref<16x8x64xf32, #tpu.memory_space<vmem>>) attributes {dimension_semantics = [#tpu.dimension_semantics<parallel>], iteration_bounds = array<i64: 1>, scalar_prefetch = 0 : i64, scratch_operands = 0 : i64, tpu.core_type = #tpu.core_type<tc>, window_params = [{transform_indices = @transform_0, window_bounds = array<i64: 16, 8, 64>}, {pipeline_mode = #tpu.pipeline_mode<synchronous>, transform_indices = @transform_1, window_bounds = array<i64: 64, 128>}, {pipeline_mode = #tpu.pipeline_mode<synchronous>, transform_indices = @transform_2, window_bounds = array<i64: 1, 128>}, {pipeline_mode = #tpu.pipeline_mode<synchronous>, transform_indices = @transform_3, window_bounds = array<i64: 128, 128>}, {pipeline_mode = #tpu.pipeline_mode<synchronous>, transform_indices = @transform_4, window_bounds = array<i64: 20, 128>}, {transform_indices = @transform_5, window_bounds = array<i64: 16, 8, 64>}]} {
    %c0 = arith.constant 0 : index
    %c0_0 = arith.constant 0 : index
    %c0_1 = arith.constant 0 : index
    %0 = vector.load %arg1[%c0, %c0_0, %c0_1] : memref<16x8x64xf32, #tpu.memory_space<vmem>>, vector<16x8x64xf32>
    %1 = vector.shape_cast %0 : vector<16x8x64xf32> to vector<128x64xf32>
    %2 = arith.truncf %1 : vector<128x64xf32> to vector<128x64xbf16>
    %c0_2 = arith.constant 0 : index
    %c0_3 = arith.constant 0 : index
    %3 = vector.load %arg2[%c0_2, %c0_3] : memref<64x128xbf16, #tpu.memory_space<vmem>>, vector<64x128xbf16>
    %cst = arith.constant dense<0.000000e+00> : vector<128x128xf32>
    %4 = tpu.matmul %2, %3, %cst {dimension_numbers = #tpu.dot_dimension_numbers<[1], [0], [0], [1], [0, 0, 1, 1], [], []>} : vector<128x64xbf16>, vector<64x128xbf16>, vector<128x128xf32> -> vector<128x128xf32>
    %c0_4 = arith.constant 0 : index
    %c0_5 = arith.constant 0 : index
    %5 = vector.load %arg3[%c0_4, %c0_5] : memref<1x128xf32, #tpu.memory_space<vmem>>, vector<1x128xf32>
    %6 = vector.broadcast %5 : vector<1x128xf32> to vector<128x128xf32>
    %7 = arith.addf %4, %6 : vector<128x128xf32>
    %cst_6 = arith.constant 0.000000e+00 : f32
    %8 = vector.broadcast %cst_6 : f32 to vector<128x128xf32>
    %9 = arith.maximumf %7, %8 : vector<128x128xf32>
    %10 = arith.truncf %9 : vector<128x128xf32> to vector<128x128xbf16>
    %c0_7 = arith.constant 0 : index
    %c0_8 = arith.constant 0 : index
    %11 = vector.load %arg4[%c0_7, %c0_8] : memref<128x128xbf16, #tpu.memory_space<vmem>>, vector<128x128xbf16>
    %cst_9 = arith.constant dense<0.000000e+00> : vector<128x128xf32>
    %12 = tpu.matmul %10, %11, %cst_9 {dimension_numbers = #tpu.dot_dimension_numbers<[1], [0], [0], [1], [0, 0, 1, 1], [], []>} : vector<128x128xbf16>, vector<128x128xbf16>, vector<128x128xf32> -> vector<128x128xf32>
    %c0_10 = arith.constant 0 : index
    %c0_11 = arith.constant 0 : index
    %13 = vector.load %arg5[%c0_10, %c0_11] : memref<20x128xf32, #tpu.memory_space<vmem>>, vector<20x128xf32>
    %14 = vector.extract_strided_slice %13 {offsets = [19, 0], sizes = [1, 128], strides = [1, 1]} : vector<20x128xf32> to vector<1x128xf32>
    %cst_12 = arith.constant 1.000000e+00 : f32
    %15 = vector.broadcast %cst_12 : f32 to vector<1x128xf32>
    %16 = arith.addf %15, %14 : vector<1x128xf32>
    %17 = vector.extract_strided_slice %12 {offsets = [0, 0], sizes = [8, 128], strides = [1, 1]} : vector<128x128xf32> to vector<8x128xf32>
    %18 = vector.broadcast %16 : vector<1x128xf32> to vector<8x128xf32>
    %19 = arith.mulf %17, %18 : vector<8x128xf32>
    %c0_13 = arith.constant 0 : index
    %c0_14 = arith.constant 0 : index
    %c0_15 = arith.constant 0 : index
    %20 = vector.load %arg1[%c0_13, %c0_14, %c0_15] : memref<16x8x64xf32, #tpu.memory_space<vmem>>, vector<1x8x64xf32>
    %21 = vector.shape_cast %20 : vector<1x8x64xf32> to vector<8x64xf32>
    %22 = vector.extract_strided_slice %21 {offsets = [0, 0], sizes = [8, 32], strides = [1, 1]} : vector<8x64xf32> to vector<8x32xf32>
    %23 = vector.extract_strided_slice %21 {offsets = [0, 32], sizes = [8, 32], strides = [1, 1]} : vector<8x64xf32> to vector<8x32xf32>
    %24 = arith.subf %22, %23 : vector<8x32xf32>
    %25 = vector.extract_strided_slice %19 {offsets = [0, 0], sizes = [8, 32], strides = [1, 1]} : vector<8x128xf32> to vector<8x32xf32>
    %26 = arith.addf %24, %25 : vector<8x32xf32>
    %27 = vector.extract_strided_slice %19 {offsets = [0, 96], sizes = [8, 32], strides = [1, 1]} : vector<8x128xf32> to vector<8x32xf32>
    %28 = arith.subf %26, %27 : vector<8x32xf32>
    %29 = arith.addf %22, %23 : vector<8x32xf32>
    %30 = vector.extract_strided_slice %19 {offsets = [0, 32], sizes = [8, 32], strides = [1, 1]} : vector<8x128xf32> to vector<8x32xf32>
    %31 = arith.addf %29, %30 : vector<8x32xf32>
    %32 = vector.extract_strided_slice %19 {offsets = [0, 64], sizes = [8, 32], strides = [1, 1]} : vector<8x128xf32> to vector<8x32xf32>
    %33 = arith.addf %31, %32 : vector<8x32xf32>
    %34 = tpu.concatenate %28, %33 in 1 : vector<8x32xf32>, vector<8x32xf32> -> vector<8x64xf32>
    %c0_16 = arith.constant 0 : index
    %c0_17 = arith.constant 0 : index
    %c0_18 = arith.constant 0 : index
    %35 = vector.load %arg6[%c0_16, %c0_17, %c0_18] : memref<16x8x64xf32, #tpu.memory_space<vmem>>, vector<1x8x64xf32>
    %36 = vector.shape_cast %35 : vector<1x8x64xf32> to vector<8x64xf32>
    %37 = vector.shape_cast %34 : vector<8x64xf32> to vector<1x8x64xf32>
    tpu.vector_store %arg6[%c0_16, %c0_17, %c0_18], %37 {strides = array<i32>} : memref<16x8x64xf32, #tpu.memory_space<vmem>>, vector<1x8x64xf32>,
    %38 = vector.extract_strided_slice %12 {offsets = [8, 0], sizes = [8, 128], strides = [1, 1]} : vector<128x128xf32> to vector<8x128xf32>
    %39 = vector.broadcast %16 : vector<1x128xf32> to vector<8x128xf32>
    %40 = arith.mulf %38, %39 : vector<8x128xf32>
    %41 = vector.extract_strided_slice %12 {offsets = [0, 0], sizes = [8, 128], strides = [1, 1]} : vector<128x128xf32> to vector<8x128xf32>
    %42 = vector.extract_strided_slice %13 {offsets = [18, 0], sizes = [1, 128], strides = [1, 1]} : vector<20x128xf32> to vector<1x128xf32>
    %43 = vector.broadcast %42 : vector<1x128xf32> to vector<8x128xf32>
    %44 = arith.mulf %43, %41 : vector<8x128xf32>
    %45 = arith.addf %40, %44 : vector<8x128xf32>
    %c1 = arith.constant 1 : index
    %c0_19 = arith.constant 0 : index
    %c0_20 = arith.constant 0 : index
    %46 = vector.load %arg1[%c1, %c0_19, %c0_20] : memref<16x8x64xf32, #tpu.memory_space<vmem>>, vector<1x8x64xf32>
    %47 = vector.shape_cast %46 : vector<1x8x64xf32> to vector<8x64xf32>
    %48 = vector.extract_strided_slice %47 {offsets = [0, 0], sizes = [8, 32], strides = [1, 1]} : vector<8x64xf32> to vector<8x32xf32>
    %49 = vector.extract_strided_slice %47 {offsets = [0, 32], sizes = [8, 32], strides = [1, 1]} : vector<8x64xf32> to vector<8x32xf32>
    %50 = arith.subf %48, %49 : vector<8x32xf32>
    %51 = vector.extract_strided_slice %45 {offsets = [0, 0], sizes = [8, 32], strides = [1, 1]} : vector<8x128xf32> to vector<8x32xf32>
    %52 = arith.addf %50, %51 : vector<8x32xf32>
    %53 = vector.extract_strided_slice %45 {offsets = [0, 96], sizes = [8, 32], strides = [1, 1]} : vector<8x128xf32> to vector<8x32xf32>
    %54 = arith.subf %52, %53 : vector<8x32xf32>
    %55 = arith.addf %48, %49 : vector<8x32xf32>
    %56 = vector.extract_strided_slice %45 {offsets = [0, 32], sizes = [8, 32], strides = [1, 1]} : vector<8x128xf32> to vector<8x32xf32>
    %57 = arith.addf %55, %56 : vector<8x32xf32>
    %58 = vector.extract_strided_slice %45 {offsets = [0, 64], sizes = [8, 32], strides = [1, 1]} : vector<8x128xf32> to vector<8x32xf32>
    %59 = arith.addf %57, %58 : vector<8x32xf32>
    %60 = tpu.concatenate %54, %59 in 1 : vector<8x32xf32>, vector<8x32xf32> -> vector<8x64xf32>
    %c1_21 = arith.constant 1 : index
    %c0_22 = arith.constant 0 : index
    %c0_23 = arith.constant 0 : index
    %61 = vector.load %arg6[%c1_21, %c0_22, %c0_23] : memref<16x8x64xf32, #tpu.memory_space<vmem>>, vector<1x8x64xf32>
    %62 = vector.shape_cast %61 : vector<1x8x64xf32> to vector<8x64xf32>
    %63 = vector.shape_cast %60 : vector<8x64xf32> to vector<1x8x64xf32>
    tpu.vector_store %arg6[%c1_21, %c0_22, %c0_23], %63 {strides = array<i32>} : memref<16x8x64xf32, #tpu.memory_space<vmem>>, vector<1x8x64xf32>,
    %64 = vector.extract_strided_slice %12 {offsets = [16, 0], sizes = [8, 128], strides = [1, 1]} : vector<128x128xf32> to vector<8x128xf32>
    %65 = vector.broadcast %16 : vector<1x128xf32> to vector<8x128xf32>
    %66 = arith.mulf %64, %65 : vector<8x128xf32>
    %67 = vector.extract_strided_slice %12 {offsets = [0, 0], sizes = [8, 128], strides = [1, 1]} : vector<128x128xf32> to vector<8x128xf32>
    %68 = vector.extract_strided_slice %13 {offsets = [17, 0], sizes = [1, 128], strides = [1, 1]} : vector<20x128xf32> to vector<1x128xf32>
    %69 = vector.broadcast %68 : vector<1x128xf32> to vector<8x128xf32>
    %70 = arith.mulf %69, %67 : vector<8x128xf32>
    %71 = arith.addf %66, %70 : vector<8x128xf32>
    %72 = vector.extract_strided_slice %12 {offsets = [8, 0], sizes = [8, 128], strides = [1, 1]} : vector<128x128xf32> to vector<8x128xf32>
    %73 = vector.extract_strided_slice %13 {offsets = [18, 0], sizes = [1, 128], strides = [1, 1]} : vector<20x128xf32> to vector<1x128xf32>
    %74 = vector.broadcast %73 : vector<1x128xf32> to vector<8x128xf32>
    %75 = arith.mulf %74, %72 : vector<8x128xf32>
    %76 = arith.addf %71, %75 : vector<8x128xf32>
    %c2 = arith.constant 2 : index
    %c0_24 = arith.constant 0 : index
    %c0_25 = arith.constant 0 : index
    %77 = vector.load %arg1[%c2, %c0_24, %c0_25] : memref<16x8x64xf32, #tpu.memory_space<vmem>>, vector<1x8x64xf32>
    %78 = vector.shape_cast %77 : vector<1x8x64xf32> to vector<8x64xf32>
    %79 = vector.extract_strided_slice %78 {offsets = [0, 0], sizes = [8, 32], strides = [1, 1]} : vector<8x64xf32> to vector<8x32xf32>
    %80 = vector.extract_strided_slice %78 {offsets = [0, 32], sizes = [8, 32], strides = [1, 1]} : vector<8x64xf32> to vector<8x32xf32>
    %81 = arith.subf %79, %80 : vector<8x32xf32>
    %82 = vector.extract_strided_slice %76 {offsets = [0, 0], sizes = [8, 32], strides = [1, 1]} : vector<8x128xf32> to vector<8x32xf32>
    %83 = arith.addf %81, %82 : vector<8x32xf32>
    %84 = vector.extract_strided_slice %76 {offsets = [0, 96], sizes = [8, 32], strides = [1, 1]} : vector<8x128xf32> to vector<8x32xf32>
    %85 = arith.subf %83, %84 : vector<8x32xf32>
    %86 = arith.addf %79, %80 : vector<8x32xf32>
    %87 = vector.extract_strided_slice %76 {offsets = [0, 32], sizes = [8, 32], strides = [1, 1]} : vector<8x128xf32> to vector<8x32xf32>
    %88 = arith.addf %86, %87 : vector<8x32xf32>
    %89 = vector.extract_strided_slice %76 {offsets = [0, 64], sizes = [8, 32], strides = [1, 1]} : vector<8x128xf32> to vector<8x32xf32>
    %90 = arith.addf %88, %89 : vector<8x32xf32>
    %91 = tpu.concatenate %85, %90 in 1 : vector<8x32xf32>, vector<8x32xf32> -> vector<8x64xf32>
    %c2_26 = arith.constant 2 : index
    %c0_27 = arith.constant 0 : index
    %c0_28 = arith.constant 0 : index
    %92 = vector.load %arg6[%c2_26, %c0_27, %c0_28] : memref<16x8x64xf32, #tpu.memory_space<vmem>>, vector<1x8x64xf32>
    %93 = vector.shape_cast %92 : vector<1x8x64xf32> to vector<8x64xf32>
    %94 = vector.shape_cast %91 : vector<8x64xf32> to vector<1x8x64xf32>
    tpu.vector_store %arg6[%c2_26, %c0_27, %c0_28], %94 {strides = array<i32>} : memref<16x8x64xf32, #tpu.memory_space<vmem>>, vector<1x8x64xf32>,
    %95 = vector.extract_strided_slice %12 {offsets = [24, 0], sizes = [8, 128], strides = [1, 1]} : vector<128x128xf32> to vector<8x128xf32>
    %96 = vector.broadcast %16 : vector<1x128xf32> to vector<8x128xf32>
    %97 = arith.mulf %95, %96 : vector<8x128xf32>
    %98 = vector.extract_strided_slice %12 {offsets = [0, 0], sizes = [8, 128], strides = [1, 1]} : vector<128x128xf32> to vector<8x128xf32>
    %99 = vector.extract_strided_slice %13 {offsets = [16, 0], sizes = [1, 128], strides = [1, 1]} : vector<20x128xf32> to vector<1x128xf32>
    %100 = vector.broadcast %99 : vector<1x128xf32> to vector<8x128xf32>
    %101 = arith.mulf %100, %98 : vector<8x128xf32>
    %102 = arith.addf %97, %101 : vector<8x128xf32>
    %103 = vector.extract_strided_slice %12 {offsets = [8, 0], sizes = [8, 128], strides = [1, 1]} : vector<128x128xf32> to vector<8x128xf32>
    %104 = vector.extract_strided_slice %13 {offsets = [17, 0], sizes = [1, 128], strides = [1, 1]} : vector<20x128xf32> to vector<1x128xf32>
    %105 = vector.broadcast %104 : vector<1x128xf32> to vector<8x128xf32>
    %106 = arith.mulf %105, %103 : vector<8x128xf32>
    %107 = arith.addf %102, %106 : vector<8x128xf32>
    %108 = vector.extract_strided_slice %12 {offsets = [16, 0], sizes = [8, 128], strides = [1, 1]} : vector<128x128xf32> to vector<8x128xf32>
    %109 = vector.extract_strided_slice %13 {offsets = [18, 0], sizes = [1, 128], strides = [1, 1]} : vector<20x128xf32> to vector<1x128xf32>
    %110 = vector.broadcast %109 : vector<1x128xf32> to vector<8x128xf32>
    %111 = arith.mulf %110, %108 : vector<8x128xf32>
    %112 = arith.addf %107, %111 : vector<8x128xf32>
    %c3 = arith.constant 3 : index
    %c0_29 = arith.constant 0 : index
    %c0_30 = arith.constant 0 : index
    %113 = vector.load %arg1[%c3, %c0_29, %c0_30] : memref<16x8x64xf32, #tpu.memory_space<vmem>>, vector<1x8x64xf32>
    %114 = vector.shape_cast %113 : vector<1x8x64xf32> to vector<8x64xf32>
    %115 = vector.extract_strided_slice %114 {offsets = [0, 0], sizes = [8, 32], strides = [1, 1]} : vector<8x64xf32> to vector<8x32xf32>
    %116 = vector.extract_strided_slice %114 {offsets = [0, 32], sizes = [8, 32], strides = [1, 1]} : vector<8x64xf32> to vector<8x32xf32>
    %117 = arith.subf %115, %116 : vector<8x32xf32>
    %118 = vector.extract_strided_slice %112 {offsets = [0, 0], sizes = [8, 32], strides = [1, 1]} : vector<8x128xf32> to vector<8x32xf32>
    %119 = arith.addf %117, %118 : vector<8x32xf32>
    %120 = vector.extract_strided_slice %112 {offsets = [0, 96], sizes = [8, 32], strides = [1, 1]} : vector<8x128xf32> to vector<8x32xf32>
    %121 = arith.subf %119, %120 : vector<8x32xf32>
    %122 = arith.addf %115, %116 : vector<8x32xf32>
    %123 = vector.extract_strided_slice %112 {offsets = [0, 32], sizes = [8, 32], strides = [1, 1]} : vector<8x128xf32> to vector<8x32xf32>
    %124 = arith.addf %122, %123 : vector<8x32xf32>
    %125 = vector.extract_strided_slice %112 {offsets = [0, 64], sizes = [8, 32], strides = [1, 1]} : vector<8x128xf32> to vector<8x32xf32>
    %126 = arith.addf %124, %125 : vector<8x32xf32>
    %127 = tpu.concatenate %121, %126 in 1 : vector<8x32xf32>, vector<8x32xf32> -> vector<8x64xf32>
    %c3_31 = arith.constant 3 : index
    %c0_32 = arith.constant 0 : index
    %c0_33 = arith.constant 0 : index
    %128 = vector.load %arg6[%c3_31, %c0_32, %c0_33] : memref<16x8x64xf32, #tpu.memory_space<vmem>>, vector<1x8x64xf32>
    %129 = vector.shape_cast %128 : vector<1x8x64xf32> to vector<8x64xf32>
    %130 = vector.shape_cast %127 : vector<8x64xf32> to vector<1x8x64xf32>
    tpu.vector_store %arg6[%c3_31, %c0_32, %c0_33], %130 {strides = array<i32>} : memref<16x8x64xf32, #tpu.memory_space<vmem>>, vector<1x8x64xf32>,
    %131 = vector.extract_strided_slice %12 {offsets = [32, 0], sizes = [8, 128], strides = [1, 1]} : vector<128x128xf32> to vector<8x128xf32>
    %132 = vector.broadcast %16 : vector<1x128xf32> to vector<8x128xf32>
    %133 = arith.mulf %131, %132 : vector<8x128xf32>
    %134 = vector.extract_strided_slice %12 {offsets = [0, 0], sizes = [8, 128], strides = [1, 1]} : vector<128x128xf32> to vector<8x128xf32>
    %135 = vector.extract_strided_slice %13 {offsets = [15, 0], sizes = [1, 128], strides = [1, 1]} : vector<20x128xf32> to vector<1x128xf32>
    %136 = vector.broadcast %135 : vector<1x128xf32> to vector<8x128xf32>
    %137 = arith.mulf %136, %134 : vector<8x128xf32>
    %138 = arith.addf %133, %137 : vector<8x128xf32>
    %139 = vector.extract_strided_slice %12 {offsets = [8, 0], sizes = [8, 128], strides = [1, 1]} : vector<128x128xf32> to vector<8x128xf32>
    %140 = vector.extract_strided_slice %13 {offsets = [16, 0], sizes = [1, 128], strides = [1, 1]} : vector<20x128xf32> to vector<1x128xf32>
    %141 = vector.broadcast %140 : vector<1x128xf32> to vector<8x128xf32>
    %142 = arith.mulf %141, %139 : vector<8x128xf32>
    %143 = arith.addf %138, %142 : vector<8x128xf32>
    %144 = vector.extract_strided_slice %12 {offsets = [16, 0], sizes = [8, 128], strides = [1, 1]} : vector<128x128xf32> to vector<8x128xf32>
    %145 = vector.extract_strided_slice %13 {offsets = [17, 0], sizes = [1, 128], strides = [1, 1]} : vector<20x128xf32> to vector<1x128xf32>
    %146 = vector.broadcast %145 : vector<1x128xf32> to vector<8x128xf32>
    %147 = arith.mulf %146, %144 : vector<8x128xf32>
    %148 = arith.addf %143, %147 : vector<8x128xf32>
    %149 = vector.extract_strided_slice %12 {offsets = [24, 0], sizes = [8, 128], strides = [1, 1]} : vector<128x128xf32> to vector<8x128xf32>
    %150 = vector.extract_strided_slice %13 {offsets = [18, 0], sizes = [1, 128], strides = [1, 1]} : vector<20x128xf32> to vector<1x128xf32>
    %151 = vector.broadcast %150 : vector<1x128xf32> to vector<8x128xf32>
    %152 = arith.mulf %151, %149 : vector<8x128xf32>
    %153 = arith.addf %148, %152 : vector<8x128xf32>
    %c4 = arith.constant 4 : index
    %c0_34 = arith.constant 0 : index
    %c0_35 = arith.constant 0 : index
    %154 = vector.load %arg1[%c4, %c0_34, %c0_35] : memref<16x8x64xf32, #tpu.memory_space<vmem>>, vector<1x8x64xf32>
    %155 = vector.shape_cast %154 : vector<1x8x64xf32> to vector<8x64xf32>
    %156 = vector.extract_strided_slice %155 {offsets = [0, 0], sizes = [8, 32], strides = [1, 1]} : vector<8x64xf32> to vector<8x32xf32>
    %157 = vector.extract_strided_slice %155 {offsets = [0, 32], sizes = [8, 32], strides = [1, 1]} : vector<8x64xf32> to vector<8x32xf32>
    %158 = arith.subf %156, %157 : vector<8x32xf32>
    %159 = vector.extract_strided_slice %153 {offsets = [0, 0], sizes = [8, 32], strides = [1, 1]} : vector<8x128xf32> to vector<8x32xf32>
    %160 = arith.addf %158, %159 : vector<8x32xf32>
    %161 = vector.extract_strided_slice %153 {offsets = [0, 96], sizes = [8, 32], strides = [1, 1]} : vector<8x128xf32> to vector<8x32xf32>
    %162 = arith.subf %160, %161 : vector<8x32xf32>
    %163 = arith.addf %156, %157 : vector<8x32xf32>
    %164 = vector.extract_strided_slice %153 {offsets = [0, 32], sizes = [8, 32], strides = [1, 1]} : vector<8x128xf32> to vector<8x32xf32>
    %165 = arith.addf %163, %164 : vector<8x32xf32>
    %166 = vector.extract_strided_slice %153 {offsets = [0, 64], sizes = [8, 32], strides = [1, 1]} : vector<8x128xf32> to vector<8x32xf32>
    %167 = arith.addf %165, %166 : vector<8x32xf32>
    %168 = tpu.concatenate %162, %167 in 1 : vector<8x32xf32>, vector<8x32xf32> -> vector<8x64xf32>
    %c4_36 = arith.constant 4 : index
    %c0_37 = arith.constant 0 : index
    %c0_38 = arith.constant 0 : index
    %169 = vector.load %arg6[%c4_36, %c0_37, %c0_38] : memref<16x8x64xf32, #tpu.memory_space<vmem>>, vector<1x8x64xf32>
    %170 = vector.shape_cast %169 : vector<1x8x64xf32> to vector<8x64xf32>
    %171 = vector.shape_cast %168 : vector<8x64xf32> to vector<1x8x64xf32>
    tpu.vector_store %arg6[%c4_36, %c0_37, %c0_38], %171 {strides = array<i32>} : memref<16x8x64xf32, #tpu.memory_space<vmem>>, vector<1x8x64xf32>,
    %172 = vector.extract_strided_slice %12 {offsets = [40, 0], sizes = [8, 128], strides = [1, 1]} : vector<128x128xf32> to vector<8x128xf32>
    %173 = vector.broadcast %16 : vector<1x128xf32> to vector<8x128xf32>
    %174 = arith.mulf %172, %173 : vector<8x128xf32>
    %175 = vector.extract_strided_slice %12 {offsets = [0, 0], sizes = [8, 128], strides = [1, 1]} : vector<128x128xf32> to vector<8x128xf32>
    %176 = vector.extract_strided_slice %13 {offsets = [14, 0], sizes = [1, 128], strides = [1, 1]} : vector<20x128xf32> to vector<1x128xf32>
    %177 = vector.broadcast %176 : vector<1x128xf32> to vector<8x128xf32>
    %178 = arith.mulf %177, %175 : vector<8x128xf32>
    %179 = arith.addf %174, %178 : vector<8x128xf32>
    %180 = vector.extract_strided_slice %12 {offsets = [8, 0], sizes = [8, 128], strides = [1, 1]} : vector<128x128xf32> to vector<8x128xf32>
    %181 = vector.extract_strided_slice %13 {offsets = [15, 0], sizes = [1, 128], strides = [1, 1]} : vector<20x128xf32> to vector<1x128xf32>
    %182 = vector.broadcast %181 : vector<1x128xf32> to vector<8x128xf32>
    %183 = arith.mulf %182, %180 : vector<8x128xf32>
    %184 = arith.addf %179, %183 : vector<8x128xf32>
    %185 = vector.extract_strided_slice %12 {offsets = [16, 0], sizes = [8, 128], strides = [1, 1]} : vector<128x128xf32> to vector<8x128xf32>
    %186 = vector.extract_strided_slice %13 {offsets = [16, 0], sizes = [1, 128], strides = [1, 1]} : vector<20x128xf32> to vector<1x128xf32>
    %187 = vector.broadcast %186 : vector<1x128xf32> to vector<8x128xf32>
    %188 = arith.mulf %187, %185 : vector<8x128xf32>
    %189 = arith.addf %184, %188 : vector<8x128xf32>
    %190 = vector.extract_strided_slice %12 {offsets = [24, 0], sizes = [8, 128], strides = [1, 1]} : vector<128x128xf32> to vector<8x128xf32>
    %191 = vector.extract_strided_slice %13 {offsets = [17, 0], sizes = [1, 128], strides = [1, 1]} : vector<20x128xf32> to vector<1x128xf32>
    %192 = vector.broadcast %191 : vector<1x128xf32> to vector<8x128xf32>
    %193 = arith.mulf %192, %190 : vector<8x128xf32>
    %194 = arith.addf %189, %193 : vector<8x128xf32>
    %195 = vector.extract_strided_slice %12 {offsets = [32, 0], sizes = [8, 128], strides = [1, 1]} : vector<128x128xf32> to vector<8x128xf32>
    %196 = vector.extract_strided_slice %13 {offsets = [18, 0], sizes = [1, 128], strides = [1, 1]} : vector<20x128xf32> to vector<1x128xf32>
    %197 = vector.broadcast %196 : vector<1x128xf32> to vector<8x128xf32>
    %198 = arith.mulf %197, %195 : vector<8x128xf32>
    %199 = arith.addf %194, %198 : vector<8x128xf32>
    %c5 = arith.constant 5 : index
    %c0_39 = arith.constant 0 : index
    %c0_40 = arith.constant 0 : index
    %200 = vector.load %arg1[%c5, %c0_39, %c0_40] : memref<16x8x64xf32, #tpu.memory_space<vmem>>, vector<1x8x64xf32>
    %201 = vector.shape_cast %200 : vector<1x8x64xf32> to vector<8x64xf32>
    %202 = vector.extract_strided_slice %201 {offsets = [0, 0], sizes = [8, 32], strides = [1, 1]} : vector<8x64xf32> to vector<8x32xf32>
    %203 = vector.extract_strided_slice %201 {offsets = [0, 32], sizes = [8, 32], strides = [1, 1]} : vector<8x64xf32> to vector<8x32xf32>
    %204 = arith.subf %202, %203 : vector<8x32xf32>
    %205 = vector.extract_strided_slice %199 {offsets = [0, 0], sizes = [8, 32], strides = [1, 1]} : vector<8x128xf32> to vector<8x32xf32>
    %206 = arith.addf %204, %205 : vector<8x32xf32>
    %207 = vector.extract_strided_slice %199 {offsets = [0, 96], sizes = [8, 32], strides = [1, 1]} : vector<8x128xf32> to vector<8x32xf32>
    %208 = arith.subf %206, %207 : vector<8x32xf32>
    %209 = arith.addf %202, %203 : vector<8x32xf32>
    %210 = vector.extract_strided_slice %199 {offsets = [0, 32], sizes = [8, 32], strides = [1, 1]} : vector<8x128xf32> to vector<8x32xf32>
    %211 = arith.addf %209, %210 : vector<8x32xf32>
    %212 = vector.extract_strided_slice %199 {offsets = [0, 64], sizes = [8, 32], strides = [1, 1]} : vector<8x128xf32> to vector<8x32xf32>
    %213 = arith.addf %211, %212 : vector<8x32xf32>
    %214 = tpu.concatenate %208, %213 in 1 : vector<8x32xf32>, vector<8x32xf32> -> vector<8x64xf32>
    %c5_41 = arith.constant 5 : index
    %c0_42 = arith.constant 0 : index
    %c0_43 = arith.constant 0 : index
    %215 = vector.load %arg6[%c5_41, %c0_42, %c0_43] : memref<16x8x64xf32, #tpu.memory_space<vmem>>, vector<1x8x64xf32>
    %216 = vector.shape_cast %215 : vector<1x8x64xf32> to vector<8x64xf32>
    %217 = vector.shape_cast %214 : vector<8x64xf32> to vector<1x8x64xf32>
    tpu.vector_store %arg6[%c5_41, %c0_42, %c0_43], %217 {strides = array<i32>} : memref<16x8x64xf32, #tpu.memory_space<vmem>>, vector<1x8x64xf32>,
    %218 = vector.extract_strided_slice %12 {offsets = [48, 0], sizes = [8, 128], strides = [1, 1]} : vector<128x128xf32> to vector<8x128xf32>
    %219 = vector.broadcast %16 : vector<1x128xf32> to vector<8x128xf32>
    %220 = arith.mulf %218, %219 : vector<8x128xf32>
    %221 = vector.extract_strided_slice %12 {offsets = [0, 0], sizes = [8, 128], strides = [1, 1]} : vector<128x128xf32> to vector<8x128xf32>
    %222 = vector.extract_strided_slice %13 {offsets = [13, 0], sizes = [1, 128], strides = [1, 1]} : vector<20x128xf32> to vector<1x128xf32>
    %223 = vector.broadcast %222 : vector<1x128xf32> to vector<8x128xf32>
    %224 = arith.mulf %223, %221 : vector<8x128xf32>
    %225 = arith.addf %220, %224 : vector<8x128xf32>
    %226 = vector.extract_strided_slice %12 {offsets = [8, 0], sizes = [8, 128], strides = [1, 1]} : vector<128x128xf32> to vector<8x128xf32>
    %227 = vector.extract_strided_slice %13 {offsets = [14, 0], sizes = [1, 128], strides = [1, 1]} : vector<20x128xf32> to vector<1x128xf32>
    %228 = vector.broadcast %227 : vector<1x128xf32> to vector<8x128xf32>
    %229 = arith.mulf %228, %226 : vector<8x128xf32>
    %230 = arith.addf %225, %229 : vector<8x128xf32>
    %231 = vector.extract_strided_slice %12 {offsets = [16, 0], sizes = [8, 128], strides = [1, 1]} : vector<128x128xf32> to vector<8x128xf32>
    %232 = vector.extract_strided_slice %13 {offsets = [15, 0], sizes = [1, 128], strides = [1, 1]} : vector<20x128xf32> to vector<1x128xf32>
    %233 = vector.broadcast %232 : vector<1x128xf32> to vector<8x128xf32>
    %234 = arith.mulf %233, %231 : vector<8x128xf32>
    %235 = arith.addf %230, %234 : vector<8x128xf32>
    %236 = vector.extract_strided_slice %12 {offsets = [24, 0], sizes = [8, 128], strides = [1, 1]} : vector<128x128xf32> to vector<8x128xf32>
    %237 = vector.extract_strided_slice %13 {offsets = [16, 0], sizes = [1, 128], strides = [1, 1]} : vector<20x128xf32> to vector<1x128xf32>
    %238 = vector.broadcast %237 : vector<1x128xf32> to vector<8x128xf32>
    %239 = arith.mulf %238, %236 : vector<8x128xf32>
    %240 = arith.addf %235, %239 : vector<8x128xf32>
    %241 = vector.extract_strided_slice %12 {offsets = [32, 0], sizes = [8, 128], strides = [1, 1]} : vector<128x128xf32> to vector<8x128xf32>
    %242 = vector.extract_strided_slice %13 {offsets = [17, 0], sizes = [1, 128], strides = [1, 1]} : vector<20x128xf32> to vector<1x128xf32>
    %243 = vector.broadcast %242 : vector<1x128xf32> to vector<8x128xf32>
    %244 = arith.mulf %243, %241 : vector<8x128xf32>
    %245 = arith.addf %240, %244 : vector<8x128xf32>
    %246 = vector.extract_strided_slice %12 {offsets = [40, 0], sizes = [8, 128], strides = [1, 1]} : vector<128x128xf32> to vector<8x128xf32>
    %247 = vector.extract_strided_slice %13 {offsets = [18, 0], sizes = [1, 128], strides = [1, 1]} : vector<20x128xf32> to vector<1x128xf32>
    %248 = vector.broadcast %247 : vector<1x128xf32> to vector<8x128xf32>
    %249 = arith.mulf %248, %246 : vector<8x128xf32>
    %250 = arith.addf %245, %249 : vector<8x128xf32>
    %c6 = arith.constant 6 : index
    %c0_44 = arith.constant 0 : index
    %c0_45 = arith.constant 0 : index
    %251 = vector.load %arg1[%c6, %c0_44, %c0_45] : memref<16x8x64xf32, #tpu.memory_space<vmem>>, vector<1x8x64xf32>
    %252 = vector.shape_cast %251 : vector<1x8x64xf32> to vector<8x64xf32>
    %253 = vector.extract_strided_slice %252 {offsets = [0, 0], sizes = [8, 32], strides = [1, 1]} : vector<8x64xf32> to vector<8x32xf32>
    %254 = vector.extract_strided_slice %252 {offsets = [0, 32], sizes = [8, 32], strides = [1, 1]} : vector<8x64xf32> to vector<8x32xf32>
    %255 = arith.subf %253, %254 : vector<8x32xf32>
    %256 = vector.extract_strided_slice %250 {offsets = [0, 0], sizes = [8, 32], strides = [1, 1]} : vector<8x128xf32> to vector<8x32xf32>
    %257 = arith.addf %255, %256 : vector<8x32xf32>
    %258 = vector.extract_strided_slice %250 {offsets = [0, 96], sizes = [8, 32], strides = [1, 1]} : vector<8x128xf32> to vector<8x32xf32>
    %259 = arith.subf %257, %258 : vector<8x32xf32>
    %260 = arith.addf %253, %254 : vector<8x32xf32>
    %261 = vector.extract_strided_slice %250 {offsets = [0, 32], sizes = [8, 32], strides = [1, 1]} : vector<8x128xf32> to vector<8x32xf32>
    %262 = arith.addf %260, %261 : vector<8x32xf32>
    %263 = vector.extract_strided_slice %250 {offsets = [0, 64], sizes = [8, 32], strides = [1, 1]} : vector<8x128xf32> to vector<8x32xf32>
    %264 = arith.addf %262, %263 : vector<8x32xf32>
    %265 = tpu.concatenate %259, %264 in 1 : vector<8x32xf32>, vector<8x32xf32> -> vector<8x64xf32>
    %c6_46 = arith.constant 6 : index
    %c0_47 = arith.constant 0 : index
    %c0_48 = arith.constant 0 : index
    %266 = vector.load %arg6[%c6_46, %c0_47, %c0_48] : memref<16x8x64xf32, #tpu.memory_space<vmem>>, vector<1x8x64xf32>
    %267 = vector.shape_cast %266 : vector<1x8x64xf32> to vector<8x64xf32>
    %268 = vector.shape_cast %265 : vector<8x64xf32> to vector<1x8x64xf32>
    tpu.vector_store %arg6[%c6_46, %c0_47, %c0_48], %268 {strides = array<i32>} : memref<16x8x64xf32, #tpu.memory_space<vmem>>, vector<1x8x64xf32>,
    %269 = vector.extract_strided_slice %12 {offsets = [56, 0], sizes = [8, 128], strides = [1, 1]} : vector<128x128xf32> to vector<8x128xf32>
    %270 = vector.broadcast %16 : vector<1x128xf32> to vector<8x128xf32>
    %271 = arith.mulf %269, %270 : vector<8x128xf32>
    %272 = vector.extract_strided_slice %12 {offsets = [0, 0], sizes = [8, 128], strides = [1, 1]} : vector<128x128xf32> to vector<8x128xf32>
    %273 = vector.extract_strided_slice %13 {offsets = [12, 0], sizes = [1, 128], strides = [1, 1]} : vector<20x128xf32> to vector<1x128xf32>
    %274 = vector.broadcast %273 : vector<1x128xf32> to vector<8x128xf32>
    %275 = arith.mulf %274, %272 : vector<8x128xf32>
    %276 = arith.addf %271, %275 : vector<8x128xf32>
    %277 = vector.extract_strided_slice %12 {offsets = [8, 0], sizes = [8, 128], strides = [1, 1]} : vector<128x128xf32> to vector<8x128xf32>
    %278 = vector.extract_strided_slice %13 {offsets = [13, 0], sizes = [1, 128], strides = [1, 1]} : vector<20x128xf32> to vector<1x128xf32>
    %279 = vector.broadcast %278 : vector<1x128xf32> to vector<8x128xf32>
    %280 = arith.mulf %279, %277 : vector<8x128xf32>
    %281 = arith.addf %276, %280 : vector<8x128xf32>
    %282 = vector.extract_strided_slice %12 {offsets = [16, 0], sizes = [8, 128], strides = [1, 1]} : vector<128x128xf32> to vector<8x128xf32>
    %283 = vector.extract_strided_slice %13 {offsets = [14, 0], sizes = [1, 128], strides = [1, 1]} : vector<20x128xf32> to vector<1x128xf32>
    %284 = vector.broadcast %283 : vector<1x128xf32> to vector<8x128xf32>
    %285 = arith.mulf %284, %282 : vector<8x128xf32>
    %286 = arith.addf %281, %285 : vector<8x128xf32>
    %287 = vector.extract_strided_slice %12 {offsets = [24, 0], sizes = [8, 128], strides = [1, 1]} : vector<128x128xf32> to vector<8x128xf32>
    %288 = vector.extract_strided_slice %13 {offsets = [15, 0], sizes = [1, 128], strides = [1, 1]} : vector<20x128xf32> to vector<1x128xf32>
    %289 = vector.broadcast %288 : vector<1x128xf32> to vector<8x128xf32>
    %290 = arith.mulf %289, %287 : vector<8x128xf32>
    %291 = arith.addf %286, %290 : vector<8x128xf32>
    %292 = vector.extract_strided_slice %12 {offsets = [32, 0], sizes = [8, 128], strides = [1, 1]} : vector<128x128xf32> to vector<8x128xf32>
    %293 = vector.extract_strided_slice %13 {offsets = [16, 0], sizes = [1, 128], strides = [1, 1]} : vector<20x128xf32> to vector<1x128xf32>
    %294 = vector.broadcast %293 : vector<1x128xf32> to vector<8x128xf32>
    %295 = arith.mulf %294, %292 : vector<8x128xf32>
    %296 = arith.addf %291, %295 : vector<8x128xf32>
    %297 = vector.extract_strided_slice %12 {offsets = [40, 0], sizes = [8, 128], strides = [1, 1]} : vector<128x128xf32> to vector<8x128xf32>
    %298 = vector.extract_strided_slice %13 {offsets = [17, 0], sizes = [1, 128], strides = [1, 1]} : vector<20x128xf32> to vector<1x128xf32>
    %299 = vector.broadcast %298 : vector<1x128xf32> to vector<8x128xf32>
    %300 = arith.mulf %299, %297 : vector<8x128xf32>
    %301 = arith.addf %296, %300 : vector<8x128xf32>
    %302 = vector.extract_strided_slice %12 {offsets = [48, 0], sizes = [8, 128], strides = [1, 1]} : vector<128x128xf32> to vector<8x128xf32>
    %303 = vector.extract_strided_slice %13 {offsets = [18, 0], sizes = [1, 128], strides = [1, 1]} : vector<20x128xf32> to vector<1x128xf32>
    %304 = vector.broadcast %303 : vector<1x128xf32> to vector<8x128xf32>
    %305 = arith.mulf %304, %302 : vector<8x128xf32>
    %306 = arith.addf %301, %305 : vector<8x128xf32>
    %c7 = arith.constant 7 : index
    %c0_49 = arith.constant 0 : index
    %c0_50 = arith.constant 0 : index
    %307 = vector.load %arg1[%c7, %c0_49, %c0_50] : memref<16x8x64xf32, #tpu.memory_space<vmem>>, vector<1x8x64xf32>
    %308 = vector.shape_cast %307 : vector<1x8x64xf32> to vector<8x64xf32>
    %309 = vector.extract_strided_slice %308 {offsets = [0, 0], sizes = [8, 32], strides = [1, 1]} : vector<8x64xf32> to vector<8x32xf32>
    %310 = vector.extract_strided_slice %308 {offsets = [0, 32], sizes = [8, 32], strides = [1, 1]} : vector<8x64xf32> to vector<8x32xf32>
    %311 = arith.subf %309, %310 : vector<8x32xf32>
    %312 = vector.extract_strided_slice %306 {offsets = [0, 0], sizes = [8, 32], strides = [1, 1]} : vector<8x128xf32> to vector<8x32xf32>
    %313 = arith.addf %311, %312 : vector<8x32xf32>
    %314 = vector.extract_strided_slice %306 {offsets = [0, 96], sizes = [8, 32], strides = [1, 1]} : vector<8x128xf32> to vector<8x32xf32>
    %315 = arith.subf %313, %314 : vector<8x32xf32>
    %316 = arith.addf %309, %310 : vector<8x32xf32>
    %317 = vector.extract_strided_slice %306 {offsets = [0, 32], sizes = [8, 32], strides = [1, 1]} : vector<8x128xf32> to vector<8x32xf32>
    %318 = arith.addf %316, %317 : vector<8x32xf32>
    %319 = vector.extract_strided_slice %306 {offsets = [0, 64], sizes = [8, 32], strides = [1, 1]} : vector<8x128xf32> to vector<8x32xf32>
    %320 = arith.addf %318, %319 : vector<8x32xf32>
    %321 = tpu.concatenate %315, %320 in 1 : vector<8x32xf32>, vector<8x32xf32> -> vector<8x64xf32>
    %c7_51 = arith.constant 7 : index
    %c0_52 = arith.constant 0 : index
    %c0_53 = arith.constant 0 : index
    %322 = vector.load %arg6[%c7_51, %c0_52, %c0_53] : memref<16x8x64xf32, #tpu.memory_space<vmem>>, vector<1x8x64xf32>
    %323 = vector.shape_cast %322 : vector<1x8x64xf32> to vector<8x64xf32>
    %324 = vector.shape_cast %321 : vector<8x64xf32> to vector<1x8x64xf32>
    tpu.vector_store %arg6[%c7_51, %c0_52, %c0_53], %324 {strides = array<i32>} : memref<16x8x64xf32, #tpu.memory_space<vmem>>, vector<1x8x64xf32>,
    %325 = vector.extract_strided_slice %12 {offsets = [64, 0], sizes = [8, 128], strides = [1, 1]} : vector<128x128xf32> to vector<8x128xf32>
    %326 = vector.broadcast %16 : vector<1x128xf32> to vector<8x128xf32>
    %327 = arith.mulf %325, %326 : vector<8x128xf32>
    %328 = vector.extract_strided_slice %12 {offsets = [0, 0], sizes = [8, 128], strides = [1, 1]} : vector<128x128xf32> to vector<8x128xf32>
    %329 = vector.extract_strided_slice %13 {offsets = [11, 0], sizes = [1, 128], strides = [1, 1]} : vector<20x128xf32> to vector<1x128xf32>
    %330 = vector.broadcast %329 : vector<1x128xf32> to vector<8x128xf32>
    %331 = arith.mulf %330, %328 : vector<8x128xf32>
    %332 = arith.addf %327, %331 : vector<8x128xf32>
    %333 = vector.extract_strided_slice %12 {offsets = [8, 0], sizes = [8, 128], strides = [1, 1]} : vector<128x128xf32> to vector<8x128xf32>
    %334 = vector.extract_strided_slice %13 {offsets = [12, 0], sizes = [1, 128], strides = [1, 1]} : vector<20x128xf32> to vector<1x128xf32>
    %335 = vector.broadcast %334 : vector<1x128xf32> to vector<8x128xf32>
    %336 = arith.mulf %335, %333 : vector<8x128xf32>
    %337 = arith.addf %332, %336 : vector<8x128xf32>
    %338 = vector.extract_strided_slice %12 {offsets = [16, 0], sizes = [8, 128], strides = [1, 1]} : vector<128x128xf32> to vector<8x128xf32>
    %339 = vector.extract_strided_slice %13 {offsets = [13, 0], sizes = [1, 128], strides = [1, 1]} : vector<20x128xf32> to vector<1x128xf32>
    %340 = vector.broadcast %339 : vector<1x128xf32> to vector<8x128xf32>
    %341 = arith.mulf %340, %338 : vector<8x128xf32>
    %342 = arith.addf %337, %341 : vector<8x128xf32>
    %343 = vector.extract_strided_slice %12 {offsets = [24, 0], sizes = [8, 128], strides = [1, 1]} : vector<128x128xf32> to vector<8x128xf32>
    %344 = vector.extract_strided_slice %13 {offsets = [14, 0], sizes = [1, 128], strides = [1, 1]} : vector<20x128xf32> to vector<1x128xf32>
    %345 = vector.broadcast %344 : vector<1x128xf32> to vector<8x128xf32>
    %346 = arith.mulf %345, %343 : vector<8x128xf32>
    %347 = arith.addf %342, %346 : vector<8x128xf32>
    %348 = vector.extract_strided_slice %12 {offsets = [32, 0], sizes = [8, 128], strides = [1, 1]} : vector<128x128xf32> to vector<8x128xf32>
    %349 = vector.extract_strided_slice %13 {offsets = [15, 0], sizes = [1, 128], strides = [1, 1]} : vector<20x128xf32> to vector<1x128xf32>
    %350 = vector.broadcast %349 : vector<1x128xf32> to vector<8x128xf32>
    %351 = arith.mulf %350, %348 : vector<8x128xf32>
    %352 = arith.addf %347, %351 : vector<8x128xf32>
    %353 = vector.extract_strided_slice %12 {offsets = [40, 0], sizes = [8, 128], strides = [1, 1]} : vector<128x128xf32> to vector<8x128xf32>
    %354 = vector.extract_strided_slice %13 {offsets = [16, 0], sizes = [1, 128], strides = [1, 1]} : vector<20x128xf32> to vector<1x128xf32>
    %355 = vector.broadcast %354 : vector<1x128xf32> to vector<8x128xf32>
    %356 = arith.mulf %355, %353 : vector<8x128xf32>
    %357 = arith.addf %352, %356 : vector<8x128xf32>
    %358 = vector.extract_strided_slice %12 {offsets = [48, 0], sizes = [8, 128], strides = [1, 1]} : vector<128x128xf32> to vector<8x128xf32>
    %359 = vector.extract_strided_slice %13 {offsets = [17, 0], sizes = [1, 128], strides = [1, 1]} : vector<20x128xf32> to vector<1x128xf32>
    %360 = vector.broadcast %359 : vector<1x128xf32> to vector<8x128xf32>
    %361 = arith.mulf %360, %358 : vector<8x128xf32>
    %362 = arith.addf %357, %361 : vector<8x128xf32>
    %363 = vector.extract_strided_slice %12 {offsets = [56, 0], sizes = [8, 128], strides = [1, 1]} : vector<128x128xf32> to vector<8x128xf32>
    %364 = vector.extract_strided_slice %13 {offsets = [18, 0], sizes = [1, 128], strides = [1, 1]} : vector<20x128xf32> to vector<1x128xf32>
    %365 = vector.broadcast %364 : vector<1x128xf32> to vector<8x128xf32>
    %366 = arith.mulf %365, %363 : vector<8x128xf32>
    %367 = arith.addf %362, %366 : vector<8x128xf32>
    %c8 = arith.constant 8 : index
    %c0_54 = arith.constant 0 : index
    %c0_55 = arith.constant 0 : index
    %368 = vector.load %arg1[%c8, %c0_54, %c0_55] : memref<16x8x64xf32, #tpu.memory_space<vmem>>, vector<1x8x64xf32>
    %369 = vector.shape_cast %368 : vector<1x8x64xf32> to vector<8x64xf32>
    %370 = vector.extract_strided_slice %369 {offsets = [0, 0], sizes = [8, 32], strides = [1, 1]} : vector<8x64xf32> to vector<8x32xf32>
    %371 = vector.extract_strided_slice %369 {offsets = [0, 32], sizes = [8, 32], strides = [1, 1]} : vector<8x64xf32> to vector<8x32xf32>
    %372 = arith.subf %370, %371 : vector<8x32xf32>
    %373 = vector.extract_strided_slice %367 {offsets = [0, 0], sizes = [8, 32], strides = [1, 1]} : vector<8x128xf32> to vector<8x32xf32>
    %374 = arith.addf %372, %373 : vector<8x32xf32>
    %375 = vector.extract_strided_slice %367 {offsets = [0, 96], sizes = [8, 32], strides = [1, 1]} : vector<8x128xf32> to vector<8x32xf32>
    %376 = arith.subf %374, %375 : vector<8x32xf32>
    %377 = arith.addf %370, %371 : vector<8x32xf32>
    %378 = vector.extract_strided_slice %367 {offsets = [0, 32], sizes = [8, 32], strides = [1, 1]} : vector<8x128xf32> to vector<8x32xf32>
    %379 = arith.addf %377, %378 : vector<8x32xf32>
    %380 = vector.extract_strided_slice %367 {offsets = [0, 64], sizes = [8, 32], strides = [1, 1]} : vector<8x128xf32> to vector<8x32xf32>
    %381 = arith.addf %379, %380 : vector<8x32xf32>
    %382 = tpu.concatenate %376, %381 in 1 : vector<8x32xf32>, vector<8x32xf32> -> vector<8x64xf32>
    %c8_56 = arith.constant 8 : index
    %c0_57 = arith.constant 0 : index
    %c0_58 = arith.constant 0 : index
    %383 = vector.load %arg6[%c8_56, %c0_57, %c0_58] : memref<16x8x64xf32, #tpu.memory_space<vmem>>, vector<1x8x64xf32>
    %384 = vector.shape_cast %383 : vector<1x8x64xf32> to vector<8x64xf32>
    %385 = vector.shape_cast %382 : vector<8x64xf32> to vector<1x8x64xf32>
    tpu.vector_store %arg6[%c8_56, %c0_57, %c0_58], %385 {strides = array<i32>} : memref<16x8x64xf32, #tpu.memory_space<vmem>>, vector<1x8x64xf32>,
    %386 = vector.extract_strided_slice %12 {offsets = [72, 0], sizes = [8, 128], strides = [1, 1]} : vector<128x128xf32> to vector<8x128xf32>
    %387 = vector.broadcast %16 : vector<1x128xf32> to vector<8x128xf32>
    %388 = arith.mulf %386, %387 : vector<8x128xf32>
    %389 = vector.extract_strided_slice %12 {offsets = [0, 0], sizes = [8, 128], strides = [1, 1]} : vector<128x128xf32> to vector<8x128xf32>
    %390 = vector.extract_strided_slice %13 {offsets = [10, 0], sizes = [1, 128], strides = [1, 1]} : vector<20x128xf32> to vector<1x128xf32>
    %391 = vector.broadcast %390 : vector<1x128xf32> to vector<8x128xf32>
    %392 = arith.mulf %391, %389 : vector<8x128xf32>
    %393 = arith.addf %388, %392 : vector<8x128xf32>
    %394 = vector.extract_strided_slice %12 {offsets = [8, 0], sizes = [8, 128], strides = [1, 1]} : vector<128x128xf32> to vector<8x128xf32>
    %395 = vector.extract_strided_slice %13 {offsets = [11, 0], sizes = [1, 128], strides = [1, 1]} : vector<20x128xf32> to vector<1x128xf32>
    %396 = vector.broadcast %395 : vector<1x128xf32> to vector<8x128xf32>
    %397 = arith.mulf %396, %394 : vector<8x128xf32>
    %398 = arith.addf %393, %397 : vector<8x128xf32>
    %399 = vector.extract_strided_slice %12 {offsets = [16, 0], sizes = [8, 128], strides = [1, 1]} : vector<128x128xf32> to vector<8x128xf32>
    %400 = vector.extract_strided_slice %13 {offsets = [12, 0], sizes = [1, 128], strides = [1, 1]} : vector<20x128xf32> to vector<1x128xf32>
    %401 = vector.broadcast %400 : vector<1x128xf32> to vector<8x128xf32>
    %402 = arith.mulf %401, %399 : vector<8x128xf32>
    %403 = arith.addf %398, %402 : vector<8x128xf32>
    %404 = vector.extract_strided_slice %12 {offsets = [24, 0], sizes = [8, 128], strides = [1, 1]} : vector<128x128xf32> to vector<8x128xf32>
    %405 = vector.extract_strided_slice %13 {offsets = [13, 0], sizes = [1, 128], strides = [1, 1]} : vector<20x128xf32> to vector<1x128xf32>
    %406 = vector.broadcast %405 : vector<1x128xf32> to vector<8x128xf32>
    %407 = arith.mulf %406, %404 : vector<8x128xf32>
    %408 = arith.addf %403, %407 : vector<8x128xf32>
    %409 = vector.extract_strided_slice %12 {offsets = [32, 0], sizes = [8, 128], strides = [1, 1]} : vector<128x128xf32> to vector<8x128xf32>
    %410 = vector.extract_strided_slice %13 {offsets = [14, 0], sizes = [1, 128], strides = [1, 1]} : vector<20x128xf32> to vector<1x128xf32>
    %411 = vector.broadcast %410 : vector<1x128xf32> to vector<8x128xf32>
    %412 = arith.mulf %411, %409 : vector<8x128xf32>
    %413 = arith.addf %408, %412 : vector<8x128xf32>
    %414 = vector.extract_strided_slice %12 {offsets = [40, 0], sizes = [8, 128], strides = [1, 1]} : vector<128x128xf32> to vector<8x128xf32>
    %415 = vector.extract_strided_slice %13 {offsets = [15, 0], sizes = [1, 128], strides = [1, 1]} : vector<20x128xf32> to vector<1x128xf32>
    %416 = vector.broadcast %415 : vector<1x128xf32> to vector<8x128xf32>
    %417 = arith.mulf %416, %414 : vector<8x128xf32>
    %418 = arith.addf %413, %417 : vector<8x128xf32>
    %419 = vector.extract_strided_slice %12 {offsets = [48, 0], sizes = [8, 128], strides = [1, 1]} : vector<128x128xf32> to vector<8x128xf32>
    %420 = vector.extract_strided_slice %13 {offsets = [16, 0], sizes = [1, 128], strides = [1, 1]} : vector<20x128xf32> to vector<1x128xf32>
    %421 = vector.broadcast %420 : vector<1x128xf32> to vector<8x128xf32>
    %422 = arith.mulf %421, %419 : vector<8x128xf32>
    %423 = arith.addf %418, %422 : vector<8x128xf32>
    %424 = vector.extract_strided_slice %12 {offsets = [56, 0], sizes = [8, 128], strides = [1, 1]} : vector<128x128xf32> to vector<8x128xf32>
    %425 = vector.extract_strided_slice %13 {offsets = [17, 0], sizes = [1, 128], strides = [1, 1]} : vector<20x128xf32> to vector<1x128xf32>
    %426 = vector.broadcast %425 : vector<1x128xf32> to vector<8x128xf32>
    %427 = arith.mulf %426, %424 : vector<8x128xf32>
    %428 = arith.addf %423, %427 : vector<8x128xf32>
    %429 = vector.extract_strided_slice %12 {offsets = [64, 0], sizes = [8, 128], strides = [1, 1]} : vector<128x128xf32> to vector<8x128xf32>
    %430 = vector.extract_strided_slice %13 {offsets = [18, 0], sizes = [1, 128], strides = [1, 1]} : vector<20x128xf32> to vector<1x128xf32>
    %431 = vector.broadcast %430 : vector<1x128xf32> to vector<8x128xf32>
    %432 = arith.mulf %431, %429 : vector<8x128xf32>
    %433 = arith.addf %428, %432 : vector<8x128xf32>
    %c9 = arith.constant 9 : index
    %c0_59 = arith.constant 0 : index
    %c0_60 = arith.constant 0 : index
    %434 = vector.load %arg1[%c9, %c0_59, %c0_60] : memref<16x8x64xf32, #tpu.memory_space<vmem>>, vector<1x8x64xf32>
    %435 = vector.shape_cast %434 : vector<1x8x64xf32> to vector<8x64xf32>
    %436 = vector.extract_strided_slice %435 {offsets = [0, 0], sizes = [8, 32], strides = [1, 1]} : vector<8x64xf32> to vector<8x32xf32>
    %437 = vector.extract_strided_slice %435 {offsets = [0, 32], sizes = [8, 32], strides = [1, 1]} : vector<8x64xf32> to vector<8x32xf32>
    %438 = arith.subf %436, %437 : vector<8x32xf32>
    %439 = vector.extract_strided_slice %433 {offsets = [0, 0], sizes = [8, 32], strides = [1, 1]} : vector<8x128xf32> to vector<8x32xf32>
    %440 = arith.addf %438, %439 : vector<8x32xf32>
    %441 = vector.extract_strided_slice %433 {offsets = [0, 96], sizes = [8, 32], strides = [1, 1]} : vector<8x128xf32> to vector<8x32xf32>
    %442 = arith.subf %440, %441 : vector<8x32xf32>
    %443 = arith.addf %436, %437 : vector<8x32xf32>
    %444 = vector.extract_strided_slice %433 {offsets = [0, 32], sizes = [8, 32], strides = [1, 1]} : vector<8x128xf32> to vector<8x32xf32>
    %445 = arith.addf %443, %444 : vector<8x32xf32>
    %446 = vector.extract_strided_slice %433 {offsets = [0, 64], sizes = [8, 32], strides = [1, 1]} : vector<8x128xf32> to vector<8x32xf32>
    %447 = arith.addf %445, %446 : vector<8x32xf32>
    %448 = tpu.concatenate %442, %447 in 1 : vector<8x32xf32>, vector<8x32xf32> -> vector<8x64xf32>
    %c9_61 = arith.constant 9 : index
    %c0_62 = arith.constant 0 : index
    %c0_63 = arith.constant 0 : index
    %449 = vector.load %arg6[%c9_61, %c0_62, %c0_63] : memref<16x8x64xf32, #tpu.memory_space<vmem>>, vector<1x8x64xf32>
    %450 = vector.shape_cast %449 : vector<1x8x64xf32> to vector<8x64xf32>
    %451 = vector.shape_cast %448 : vector<8x64xf32> to vector<1x8x64xf32>
    tpu.vector_store %arg6[%c9_61, %c0_62, %c0_63], %451 {strides = array<i32>} : memref<16x8x64xf32, #tpu.memory_space<vmem>>, vector<1x8x64xf32>,
    %452 = vector.extract_strided_slice %12 {offsets = [80, 0], sizes = [8, 128], strides = [1, 1]} : vector<128x128xf32> to vector<8x128xf32>
    %453 = vector.broadcast %16 : vector<1x128xf32> to vector<8x128xf32>
    %454 = arith.mulf %452, %453 : vector<8x128xf32>
    %455 = vector.extract_strided_slice %12 {offsets = [0, 0], sizes = [8, 128], strides = [1, 1]} : vector<128x128xf32> to vector<8x128xf32>
    %456 = vector.extract_strided_slice %13 {offsets = [9, 0], sizes = [1, 128], strides = [1, 1]} : vector<20x128xf32> to vector<1x128xf32>
    %457 = vector.broadcast %456 : vector<1x128xf32> to vector<8x128xf32>
    %458 = arith.mulf %457, %455 : vector<8x128xf32>
    %459 = arith.addf %454, %458 : vector<8x128xf32>
    %460 = vector.extract_strided_slice %12 {offsets = [8, 0], sizes = [8, 128], strides = [1, 1]} : vector<128x128xf32> to vector<8x128xf32>
    %461 = vector.extract_strided_slice %13 {offsets = [10, 0], sizes = [1, 128], strides = [1, 1]} : vector<20x128xf32> to vector<1x128xf32>
    %462 = vector.broadcast %461 : vector<1x128xf32> to vector<8x128xf32>
    %463 = arith.mulf %462, %460 : vector<8x128xf32>
    %464 = arith.addf %459, %463 : vector<8x128xf32>
    %465 = vector.extract_strided_slice %12 {offsets = [16, 0], sizes = [8, 128], strides = [1, 1]} : vector<128x128xf32> to vector<8x128xf32>
    %466 = vector.extract_strided_slice %13 {offsets = [11, 0], sizes = [1, 128], strides = [1, 1]} : vector<20x128xf32> to vector<1x128xf32>
    %467 = vector.broadcast %466 : vector<1x128xf32> to vector<8x128xf32>
    %468 = arith.mulf %467, %465 : vector<8x128xf32>
    %469 = arith.addf %464, %468 : vector<8x128xf32>
    %470 = vector.extract_strided_slice %12 {offsets = [24, 0], sizes = [8, 128], strides = [1, 1]} : vector<128x128xf32> to vector<8x128xf32>
    %471 = vector.extract_strided_slice %13 {offsets = [12, 0], sizes = [1, 128], strides = [1, 1]} : vector<20x128xf32> to vector<1x128xf32>
    %472 = vector.broadcast %471 : vector<1x128xf32> to vector<8x128xf32>
    %473 = arith.mulf %472, %470 : vector<8x128xf32>
    %474 = arith.addf %469, %473 : vector<8x128xf32>
    %475 = vector.extract_strided_slice %12 {offsets = [32, 0], sizes = [8, 128], strides = [1, 1]} : vector<128x128xf32> to vector<8x128xf32>
    %476 = vector.extract_strided_slice %13 {offsets = [13, 0], sizes = [1, 128], strides = [1, 1]} : vector<20x128xf32> to vector<1x128xf32>
    %477 = vector.broadcast %476 : vector<1x128xf32> to vector<8x128xf32>
    %478 = arith.mulf %477, %475 : vector<8x128xf32>
    %479 = arith.addf %474, %478 : vector<8x128xf32>
    %480 = vector.extract_strided_slice %12 {offsets = [40, 0], sizes = [8, 128], strides = [1, 1]} : vector<128x128xf32> to vector<8x128xf32>
    %481 = vector.extract_strided_slice %13 {offsets = [14, 0], sizes = [1, 128], strides = [1, 1]} : vector<20x128xf32> to vector<1x128xf32>
    %482 = vector.broadcast %481 : vector<1x128xf32> to vector<8x128xf32>
    %483 = arith.mulf %482, %480 : vector<8x128xf32>
    %484 = arith.addf %479, %483 : vector<8x128xf32>
    %485 = vector.extract_strided_slice %12 {offsets = [48, 0], sizes = [8, 128], strides = [1, 1]} : vector<128x128xf32> to vector<8x128xf32>
    %486 = vector.extract_strided_slice %13 {offsets = [15, 0], sizes = [1, 128], strides = [1, 1]} : vector<20x128xf32> to vector<1x128xf32>
    %487 = vector.broadcast %486 : vector<1x128xf32> to vector<8x128xf32>
    %488 = arith.mulf %487, %485 : vector<8x128xf32>
    %489 = arith.addf %484, %488 : vector<8x128xf32>
    %490 = vector.extract_strided_slice %12 {offsets = [56, 0], sizes = [8, 128], strides = [1, 1]} : vector<128x128xf32> to vector<8x128xf32>
    %491 = vector.extract_strided_slice %13 {offsets = [16, 0], sizes = [1, 128], strides = [1, 1]} : vector<20x128xf32> to vector<1x128xf32>
    %492 = vector.broadcast %491 : vector<1x128xf32> to vector<8x128xf32>
    %493 = arith.mulf %492, %490 : vector<8x128xf32>
    %494 = arith.addf %489, %493 : vector<8x128xf32>
    %495 = vector.extract_strided_slice %12 {offsets = [64, 0], sizes = [8, 128], strides = [1, 1]} : vector<128x128xf32> to vector<8x128xf32>
    %496 = vector.extract_strided_slice %13 {offsets = [17, 0], sizes = [1, 128], strides = [1, 1]} : vector<20x128xf32> to vector<1x128xf32>
    %497 = vector.broadcast %496 : vector<1x128xf32> to vector<8x128xf32>
    %498 = arith.mulf %497, %495 : vector<8x128xf32>
    %499 = arith.addf %494, %498 : vector<8x128xf32>
    %500 = vector.extract_strided_slice %12 {offsets = [72, 0], sizes = [8, 128], strides = [1, 1]} : vector<128x128xf32> to vector<8x128xf32>
    %501 = vector.extract_strided_slice %13 {offsets = [18, 0], sizes = [1, 128], strides = [1, 1]} : vector<20x128xf32> to vector<1x128xf32>
    %502 = vector.broadcast %501 : vector<1x128xf32> to vector<8x128xf32>
    %503 = arith.mulf %502, %500 : vector<8x128xf32>
    %504 = arith.addf %499, %503 : vector<8x128xf32>
    %c10 = arith.constant 10 : index
    %c0_64 = arith.constant 0 : index
    %c0_65 = arith.constant 0 : index
    %505 = vector.load %arg1[%c10, %c0_64, %c0_65] : memref<16x8x64xf32, #tpu.memory_space<vmem>>, vector<1x8x64xf32>
    %506 = vector.shape_cast %505 : vector<1x8x64xf32> to vector<8x64xf32>
    %507 = vector.extract_strided_slice %506 {offsets = [0, 0], sizes = [8, 32], strides = [1, 1]} : vector<8x64xf32> to vector<8x32xf32>
    %508 = vector.extract_strided_slice %506 {offsets = [0, 32], sizes = [8, 32], strides = [1, 1]} : vector<8x64xf32> to vector<8x32xf32>
    %509 = arith.subf %507, %508 : vector<8x32xf32>
    %510 = vector.extract_strided_slice %504 {offsets = [0, 0], sizes = [8, 32], strides = [1, 1]} : vector<8x128xf32> to vector<8x32xf32>
    %511 = arith.addf %509, %510 : vector<8x32xf32>
    %512 = vector.extract_strided_slice %504 {offsets = [0, 96], sizes = [8, 32], strides = [1, 1]} : vector<8x128xf32> to vector<8x32xf32>
    %513 = arith.subf %511, %512 : vector<8x32xf32>
    %514 = arith.addf %507, %508 : vector<8x32xf32>
    %515 = vector.extract_strided_slice %504 {offsets = [0, 32], sizes = [8, 32], strides = [1, 1]} : vector<8x128xf32> to vector<8x32xf32>
    %516 = arith.addf %514, %515 : vector<8x32xf32>
    %517 = vector.extract_strided_slice %504 {offsets = [0, 64], sizes = [8, 32], strides = [1, 1]} : vector<8x128xf32> to vector<8x32xf32>
    %518 = arith.addf %516, %517 : vector<8x32xf32>
    %519 = tpu.concatenate %513, %518 in 1 : vector<8x32xf32>, vector<8x32xf32> -> vector<8x64xf32>
    %c10_66 = arith.constant 10 : index
    %c0_67 = arith.constant 0 : index
    %c0_68 = arith.constant 0 : index
    %520 = vector.load %arg6[%c10_66, %c0_67, %c0_68] : memref<16x8x64xf32, #tpu.memory_space<vmem>>, vector<1x8x64xf32>
    %521 = vector.shape_cast %520 : vector<1x8x64xf32> to vector<8x64xf32>
    %522 = vector.shape_cast %519 : vector<8x64xf32> to vector<1x8x64xf32>
    tpu.vector_store %arg6[%c10_66, %c0_67, %c0_68], %522 {strides = array<i32>} : memref<16x8x64xf32, #tpu.memory_space<vmem>>, vector<1x8x64xf32>,
    %523 = vector.extract_strided_slice %12 {offsets = [88, 0], sizes = [8, 128], strides = [1, 1]} : vector<128x128xf32> to vector<8x128xf32>
    %524 = vector.broadcast %16 : vector<1x128xf32> to vector<8x128xf32>
    %525 = arith.mulf %523, %524 : vector<8x128xf32>
    %526 = vector.extract_strided_slice %12 {offsets = [0, 0], sizes = [8, 128], strides = [1, 1]} : vector<128x128xf32> to vector<8x128xf32>
    %527 = vector.extract_strided_slice %13 {offsets = [8, 0], sizes = [1, 128], strides = [1, 1]} : vector<20x128xf32> to vector<1x128xf32>
    %528 = vector.broadcast %527 : vector<1x128xf32> to vector<8x128xf32>
    %529 = arith.mulf %528, %526 : vector<8x128xf32>
    %530 = arith.addf %525, %529 : vector<8x128xf32>
    %531 = vector.extract_strided_slice %12 {offsets = [8, 0], sizes = [8, 128], strides = [1, 1]} : vector<128x128xf32> to vector<8x128xf32>
    %532 = vector.extract_strided_slice %13 {offsets = [9, 0], sizes = [1, 128], strides = [1, 1]} : vector<20x128xf32> to vector<1x128xf32>
    %533 = vector.broadcast %532 : vector<1x128xf32> to vector<8x128xf32>
    %534 = arith.mulf %533, %531 : vector<8x128xf32>
    %535 = arith.addf %530, %534 : vector<8x128xf32>
    %536 = vector.extract_strided_slice %12 {offsets = [16, 0], sizes = [8, 128], strides = [1, 1]} : vector<128x128xf32> to vector<8x128xf32>
    %537 = vector.extract_strided_slice %13 {offsets = [10, 0], sizes = [1, 128], strides = [1, 1]} : vector<20x128xf32> to vector<1x128xf32>
    %538 = vector.broadcast %537 : vector<1x128xf32> to vector<8x128xf32>
    %539 = arith.mulf %538, %536 : vector<8x128xf32>
    %540 = arith.addf %535, %539 : vector<8x128xf32>
    %541 = vector.extract_strided_slice %12 {offsets = [24, 0], sizes = [8, 128], strides = [1, 1]} : vector<128x128xf32> to vector<8x128xf32>
    %542 = vector.extract_strided_slice %13 {offsets = [11, 0], sizes = [1, 128], strides = [1, 1]} : vector<20x128xf32> to vector<1x128xf32>
    %543 = vector.broadcast %542 : vector<1x128xf32> to vector<8x128xf32>
    %544 = arith.mulf %543, %541 : vector<8x128xf32>
    %545 = arith.addf %540, %544 : vector<8x128xf32>
    %546 = vector.extract_strided_slice %12 {offsets = [32, 0], sizes = [8, 128], strides = [1, 1]} : vector<128x128xf32> to vector<8x128xf32>
    %547 = vector.extract_strided_slice %13 {offsets = [12, 0], sizes = [1, 128], strides = [1, 1]} : vector<20x128xf32> to vector<1x128xf32>
    %548 = vector.broadcast %547 : vector<1x128xf32> to vector<8x128xf32>
    %549 = arith.mulf %548, %546 : vector<8x128xf32>
    %550 = arith.addf %545, %549 : vector<8x128xf32>
    %551 = vector.extract_strided_slice %12 {offsets = [40, 0], sizes = [8, 128], strides = [1, 1]} : vector<128x128xf32> to vector<8x128xf32>
    %552 = vector.extract_strided_slice %13 {offsets = [13, 0], sizes = [1, 128], strides = [1, 1]} : vector<20x128xf32> to vector<1x128xf32>
    %553 = vector.broadcast %552 : vector<1x128xf32> to vector<8x128xf32>
    %554 = arith.mulf %553, %551 : vector<8x128xf32>
    %555 = arith.addf %550, %554 : vector<8x128xf32>
    %556 = vector.extract_strided_slice %12 {offsets = [48, 0], sizes = [8, 128], strides = [1, 1]} : vector<128x128xf32> to vector<8x128xf32>
    %557 = vector.extract_strided_slice %13 {offsets = [14, 0], sizes = [1, 128], strides = [1, 1]} : vector<20x128xf32> to vector<1x128xf32>
    %558 = vector.broadcast %557 : vector<1x128xf32> to vector<8x128xf32>
    %559 = arith.mulf %558, %556 : vector<8x128xf32>
    %560 = arith.addf %555, %559 : vector<8x128xf32>
    %561 = vector.extract_strided_slice %12 {offsets = [56, 0], sizes = [8, 128], strides = [1, 1]} : vector<128x128xf32> to vector<8x128xf32>
    %562 = vector.extract_strided_slice %13 {offsets = [15, 0], sizes = [1, 128], strides = [1, 1]} : vector<20x128xf32> to vector<1x128xf32>
    %563 = vector.broadcast %562 : vector<1x128xf32> to vector<8x128xf32>
    %564 = arith.mulf %563, %561 : vector<8x128xf32>
    %565 = arith.addf %560, %564 : vector<8x128xf32>
    %566 = vector.extract_strided_slice %12 {offsets = [64, 0], sizes = [8, 128], strides = [1, 1]} : vector<128x128xf32> to vector<8x128xf32>
    %567 = vector.extract_strided_slice %13 {offsets = [16, 0], sizes = [1, 128], strides = [1, 1]} : vector<20x128xf32> to vector<1x128xf32>
    %568 = vector.broadcast %567 : vector<1x128xf32> to vector<8x128xf32>
    %569 = arith.mulf %568, %566 : vector<8x128xf32>
    %570 = arith.addf %565, %569 : vector<8x128xf32>
    %571 = vector.extract_strided_slice %12 {offsets = [72, 0], sizes = [8, 128], strides = [1, 1]} : vector<128x128xf32> to vector<8x128xf32>
    %572 = vector.extract_strided_slice %13 {offsets = [17, 0], sizes = [1, 128], strides = [1, 1]} : vector<20x128xf32> to vector<1x128xf32>
    %573 = vector.broadcast %572 : vector<1x128xf32> to vector<8x128xf32>
    %574 = arith.mulf %573, %571 : vector<8x128xf32>
    %575 = arith.addf %570, %574 : vector<8x128xf32>
    %576 = vector.extract_strided_slice %12 {offsets = [80, 0], sizes = [8, 128], strides = [1, 1]} : vector<128x128xf32> to vector<8x128xf32>
    %577 = vector.extract_strided_slice %13 {offsets = [18, 0], sizes = [1, 128], strides = [1, 1]} : vector<20x128xf32> to vector<1x128xf32>
    %578 = vector.broadcast %577 : vector<1x128xf32> to vector<8x128xf32>
    %579 = arith.mulf %578, %576 : vector<8x128xf32>
    %580 = arith.addf %575, %579 : vector<8x128xf32>
    %c11 = arith.constant 11 : index
    %c0_69 = arith.constant 0 : index
    %c0_70 = arith.constant 0 : index
    %581 = vector.load %arg1[%c11, %c0_69, %c0_70] : memref<16x8x64xf32, #tpu.memory_space<vmem>>, vector<1x8x64xf32>
    %582 = vector.shape_cast %581 : vector<1x8x64xf32> to vector<8x64xf32>
    %583 = vector.extract_strided_slice %582 {offsets = [0, 0], sizes = [8, 32], strides = [1, 1]} : vector<8x64xf32> to vector<8x32xf32>
    %584 = vector.extract_strided_slice %582 {offsets = [0, 32], sizes = [8, 32], strides = [1, 1]} : vector<8x64xf32> to vector<8x32xf32>
    %585 = arith.subf %583, %584 : vector<8x32xf32>
    %586 = vector.extract_strided_slice %580 {offsets = [0, 0], sizes = [8, 32], strides = [1, 1]} : vector<8x128xf32> to vector<8x32xf32>
    %587 = arith.addf %585, %586 : vector<8x32xf32>
    %588 = vector.extract_strided_slice %580 {offsets = [0, 96], sizes = [8, 32], strides = [1, 1]} : vector<8x128xf32> to vector<8x32xf32>
    %589 = arith.subf %587, %588 : vector<8x32xf32>
    %590 = arith.addf %583, %584 : vector<8x32xf32>
    %591 = vector.extract_strided_slice %580 {offsets = [0, 32], sizes = [8, 32], strides = [1, 1]} : vector<8x128xf32> to vector<8x32xf32>
    %592 = arith.addf %590, %591 : vector<8x32xf32>
    %593 = vector.extract_strided_slice %580 {offsets = [0, 64], sizes = [8, 32], strides = [1, 1]} : vector<8x128xf32> to vector<8x32xf32>
    %594 = arith.addf %592, %593 : vector<8x32xf32>
    %595 = tpu.concatenate %589, %594 in 1 : vector<8x32xf32>, vector<8x32xf32> -> vector<8x64xf32>
    %c11_71 = arith.constant 11 : index
    %c0_72 = arith.constant 0 : index
    %c0_73 = arith.constant 0 : index
    %596 = vector.load %arg6[%c11_71, %c0_72, %c0_73] : memref<16x8x64xf32, #tpu.memory_space<vmem>>, vector<1x8x64xf32>
    %597 = vector.shape_cast %596 : vector<1x8x64xf32> to vector<8x64xf32>
    %598 = vector.shape_cast %595 : vector<8x64xf32> to vector<1x8x64xf32>
    tpu.vector_store %arg6[%c11_71, %c0_72, %c0_73], %598 {strides = array<i32>} : memref<16x8x64xf32, #tpu.memory_space<vmem>>, vector<1x8x64xf32>,
    %599 = vector.extract_strided_slice %12 {offsets = [96, 0], sizes = [8, 128], strides = [1, 1]} : vector<128x128xf32> to vector<8x128xf32>
    %600 = vector.broadcast %16 : vector<1x128xf32> to vector<8x128xf32>
    %601 = arith.mulf %599, %600 : vector<8x128xf32>
    %602 = vector.extract_strided_slice %12 {offsets = [0, 0], sizes = [8, 128], strides = [1, 1]} : vector<128x128xf32> to vector<8x128xf32>
    %603 = vector.extract_strided_slice %13 {offsets = [7, 0], sizes = [1, 128], strides = [1, 1]} : vector<20x128xf32> to vector<1x128xf32>
    %604 = vector.broadcast %603 : vector<1x128xf32> to vector<8x128xf32>
    %605 = arith.mulf %604, %602 : vector<8x128xf32>
    %606 = arith.addf %601, %605 : vector<8x128xf32>
    %607 = vector.extract_strided_slice %12 {offsets = [8, 0], sizes = [8, 128], strides = [1, 1]} : vector<128x128xf32> to vector<8x128xf32>
    %608 = vector.extract_strided_slice %13 {offsets = [8, 0], sizes = [1, 128], strides = [1, 1]} : vector<20x128xf32> to vector<1x128xf32>
    %609 = vector.broadcast %608 : vector<1x128xf32> to vector<8x128xf32>
    %610 = arith.mulf %609, %607 : vector<8x128xf32>
    %611 = arith.addf %606, %610 : vector<8x128xf32>
    %612 = vector.extract_strided_slice %12 {offsets = [16, 0], sizes = [8, 128], strides = [1, 1]} : vector<128x128xf32> to vector<8x128xf32>
    %613 = vector.extract_strided_slice %13 {offsets = [9, 0], sizes = [1, 128], strides = [1, 1]} : vector<20x128xf32> to vector<1x128xf32>
    %614 = vector.broadcast %613 : vector<1x128xf32> to vector<8x128xf32>
    %615 = arith.mulf %614, %612 : vector<8x128xf32>
    %616 = arith.addf %611, %615 : vector<8x128xf32>
    %617 = vector.extract_strided_slice %12 {offsets = [24, 0], sizes = [8, 128], strides = [1, 1]} : vector<128x128xf32> to vector<8x128xf32>
    %618 = vector.extract_strided_slice %13 {offsets = [10, 0], sizes = [1, 128], strides = [1, 1]} : vector<20x128xf32> to vector<1x128xf32>
    %619 = vector.broadcast %618 : vector<1x128xf32> to vector<8x128xf32>
    %620 = arith.mulf %619, %617 : vector<8x128xf32>
    %621 = arith.addf %616, %620 : vector<8x128xf32>
    %622 = vector.extract_strided_slice %12 {offsets = [32, 0], sizes = [8, 128], strides = [1, 1]} : vector<128x128xf32> to vector<8x128xf32>
    %623 = vector.extract_strided_slice %13 {offsets = [11, 0], sizes = [1, 128], strides = [1, 1]} : vector<20x128xf32> to vector<1x128xf32>
    %624 = vector.broadcast %623 : vector<1x128xf32> to vector<8x128xf32>
    %625 = arith.mulf %624, %622 : vector<8x128xf32>
    %626 = arith.addf %621, %625 : vector<8x128xf32>
    %627 = vector.extract_strided_slice %12 {offsets = [40, 0], sizes = [8, 128], strides = [1, 1]} : vector<128x128xf32> to vector<8x128xf32>
    %628 = vector.extract_strided_slice %13 {offsets = [12, 0], sizes = [1, 128], strides = [1, 1]} : vector<20x128xf32> to vector<1x128xf32>
    %629 = vector.broadcast %628 : vector<1x128xf32> to vector<8x128xf32>
    %630 = arith.mulf %629, %627 : vector<8x128xf32>
    %631 = arith.addf %626, %630 : vector<8x128xf32>
    %632 = vector.extract_strided_slice %12 {offsets = [48, 0], sizes = [8, 128], strides = [1, 1]} : vector<128x128xf32> to vector<8x128xf32>
    %633 = vector.extract_strided_slice %13 {offsets = [13, 0], sizes = [1, 128], strides = [1, 1]} : vector<20x128xf32> to vector<1x128xf32>
    %634 = vector.broadcast %633 : vector<1x128xf32> to vector<8x128xf32>
    %635 = arith.mulf %634, %632 : vector<8x128xf32>
    %636 = arith.addf %631, %635 : vector<8x128xf32>
    %637 = vector.extract_strided_slice %12 {offsets = [56, 0], sizes = [8, 128], strides = [1, 1]} : vector<128x128xf32> to vector<8x128xf32>
    %638 = vector.extract_strided_slice %13 {offsets = [14, 0], sizes = [1, 128], strides = [1, 1]} : vector<20x128xf32> to vector<1x128xf32>
    %639 = vector.broadcast %638 : vector<1x128xf32> to vector<8x128xf32>
    %640 = arith.mulf %639, %637 : vector<8x128xf32>
    %641 = arith.addf %636, %640 : vector<8x128xf32>
    %642 = vector.extract_strided_slice %12 {offsets = [64, 0], sizes = [8, 128], strides = [1, 1]} : vector<128x128xf32> to vector<8x128xf32>
    %643 = vector.extract_strided_slice %13 {offsets = [15, 0], sizes = [1, 128], strides = [1, 1]} : vector<20x128xf32> to vector<1x128xf32>
    %644 = vector.broadcast %643 : vector<1x128xf32> to vector<8x128xf32>
    %645 = arith.mulf %644, %642 : vector<8x128xf32>
    %646 = arith.addf %641, %645 : vector<8x128xf32>
    %647 = vector.extract_strided_slice %12 {offsets = [72, 0], sizes = [8, 128], strides = [1, 1]} : vector<128x128xf32> to vector<8x128xf32>
    %648 = vector.extract_strided_slice %13 {offsets = [16, 0], sizes = [1, 128], strides = [1, 1]} : vector<20x128xf32> to vector<1x128xf32>
    %649 = vector.broadcast %648 : vector<1x128xf32> to vector<8x128xf32>
    %650 = arith.mulf %649, %647 : vector<8x128xf32>
    %651 = arith.addf %646, %650 : vector<8x128xf32>
    %652 = vector.extract_strided_slice %12 {offsets = [80, 0], sizes = [8, 128], strides = [1, 1]} : vector<128x128xf32> to vector<8x128xf32>
    %653 = vector.extract_strided_slice %13 {offsets = [17, 0], sizes = [1, 128], strides = [1, 1]} : vector<20x128xf32> to vector<1x128xf32>
    %654 = vector.broadcast %653 : vector<1x128xf32> to vector<8x128xf32>
    %655 = arith.mulf %654, %652 : vector<8x128xf32>
    %656 = arith.addf %651, %655 : vector<8x128xf32>
    %657 = vector.extract_strided_slice %12 {offsets = [88, 0], sizes = [8, 128], strides = [1, 1]} : vector<128x128xf32> to vector<8x128xf32>
    %658 = vector.extract_strided_slice %13 {offsets = [18, 0], sizes = [1, 128], strides = [1, 1]} : vector<20x128xf32> to vector<1x128xf32>
    %659 = vector.broadcast %658 : vector<1x128xf32> to vector<8x128xf32>
    %660 = arith.mulf %659, %657 : vector<8x128xf32>
    %661 = arith.addf %656, %660 : vector<8x128xf32>
    %c12 = arith.constant 12 : index
    %c0_74 = arith.constant 0 : index
    %c0_75 = arith.constant 0 : index
    %662 = vector.load %arg1[%c12, %c0_74, %c0_75] : memref<16x8x64xf32, #tpu.memory_space<vmem>>, vector<1x8x64xf32>
    %663 = vector.shape_cast %662 : vector<1x8x64xf32> to vector<8x64xf32>
    %664 = vector.extract_strided_slice %663 {offsets = [0, 0], sizes = [8, 32], strides = [1, 1]} : vector<8x64xf32> to vector<8x32xf32>
    %665 = vector.extract_strided_slice %663 {offsets = [0, 32], sizes = [8, 32], strides = [1, 1]} : vector<8x64xf32> to vector<8x32xf32>
    %666 = arith.subf %664, %665 : vector<8x32xf32>
    %667 = vector.extract_strided_slice %661 {offsets = [0, 0], sizes = [8, 32], strides = [1, 1]} : vector<8x128xf32> to vector<8x32xf32>
    %668 = arith.addf %666, %667 : vector<8x32xf32>
    %669 = vector.extract_strided_slice %661 {offsets = [0, 96], sizes = [8, 32], strides = [1, 1]} : vector<8x128xf32> to vector<8x32xf32>
    %670 = arith.subf %668, %669 : vector<8x32xf32>
    %671 = arith.addf %664, %665 : vector<8x32xf32>
    %672 = vector.extract_strided_slice %661 {offsets = [0, 32], sizes = [8, 32], strides = [1, 1]} : vector<8x128xf32> to vector<8x32xf32>
    %673 = arith.addf %671, %672 : vector<8x32xf32>
    %674 = vector.extract_strided_slice %661 {offsets = [0, 64], sizes = [8, 32], strides = [1, 1]} : vector<8x128xf32> to vector<8x32xf32>
    %675 = arith.addf %673, %674 : vector<8x32xf32>
    %676 = tpu.concatenate %670, %675 in 1 : vector<8x32xf32>, vector<8x32xf32> -> vector<8x64xf32>
    %c12_76 = arith.constant 12 : index
    %c0_77 = arith.constant 0 : index
    %c0_78 = arith.constant 0 : index
    %677 = vector.load %arg6[%c12_76, %c0_77, %c0_78] : memref<16x8x64xf32, #tpu.memory_space<vmem>>, vector<1x8x64xf32>
    %678 = vector.shape_cast %677 : vector<1x8x64xf32> to vector<8x64xf32>
    %679 = vector.shape_cast %676 : vector<8x64xf32> to vector<1x8x64xf32>
    tpu.vector_store %arg6[%c12_76, %c0_77, %c0_78], %679 {strides = array<i32>} : memref<16x8x64xf32, #tpu.memory_space<vmem>>, vector<1x8x64xf32>,
    %680 = vector.extract_strided_slice %12 {offsets = [104, 0], sizes = [8, 128], strides = [1, 1]} : vector<128x128xf32> to vector<8x128xf32>
    %681 = vector.broadcast %16 : vector<1x128xf32> to vector<8x128xf32>
    %682 = arith.mulf %680, %681 : vector<8x128xf32>
    %683 = vector.extract_strided_slice %12 {offsets = [0, 0], sizes = [8, 128], strides = [1, 1]} : vector<128x128xf32> to vector<8x128xf32>
    %684 = vector.extract_strided_slice %13 {offsets = [6, 0], sizes = [1, 128], strides = [1, 1]} : vector<20x128xf32> to vector<1x128xf32>
    %685 = vector.broadcast %684 : vector<1x128xf32> to vector<8x128xf32>
    %686 = arith.mulf %685, %683 : vector<8x128xf32>
    %687 = arith.addf %682, %686 : vector<8x128xf32>
    %688 = vector.extract_strided_slice %12 {offsets = [8, 0], sizes = [8, 128], strides = [1, 1]} : vector<128x128xf32> to vector<8x128xf32>
    %689 = vector.extract_strided_slice %13 {offsets = [7, 0], sizes = [1, 128], strides = [1, 1]} : vector<20x128xf32> to vector<1x128xf32>
    %690 = vector.broadcast %689 : vector<1x128xf32> to vector<8x128xf32>
    %691 = arith.mulf %690, %688 : vector<8x128xf32>
    %692 = arith.addf %687, %691 : vector<8x128xf32>
    %693 = vector.extract_strided_slice %12 {offsets = [16, 0], sizes = [8, 128], strides = [1, 1]} : vector<128x128xf32> to vector<8x128xf32>
    %694 = vector.extract_strided_slice %13 {offsets = [8, 0], sizes = [1, 128], strides = [1, 1]} : vector<20x128xf32> to vector<1x128xf32>
    %695 = vector.broadcast %694 : vector<1x128xf32> to vector<8x128xf32>
    %696 = arith.mulf %695, %693 : vector<8x128xf32>
    %697 = arith.addf %692, %696 : vector<8x128xf32>
    %698 = vector.extract_strided_slice %12 {offsets = [24, 0], sizes = [8, 128], strides = [1, 1]} : vector<128x128xf32> to vector<8x128xf32>
    %699 = vector.extract_strided_slice %13 {offsets = [9, 0], sizes = [1, 128], strides = [1, 1]} : vector<20x128xf32> to vector<1x128xf32>
    %700 = vector.broadcast %699 : vector<1x128xf32> to vector<8x128xf32>
    %701 = arith.mulf %700, %698 : vector<8x128xf32>
    %702 = arith.addf %697, %701 : vector<8x128xf32>
    %703 = vector.extract_strided_slice %12 {offsets = [32, 0], sizes = [8, 128], strides = [1, 1]} : vector<128x128xf32> to vector<8x128xf32>
    %704 = vector.extract_strided_slice %13 {offsets = [10, 0], sizes = [1, 128], strides = [1, 1]} : vector<20x128xf32> to vector<1x128xf32>
    %705 = vector.broadcast %704 : vector<1x128xf32> to vector<8x128xf32>
    %706 = arith.mulf %705, %703 : vector<8x128xf32>
    %707 = arith.addf %702, %706 : vector<8x128xf32>
    %708 = vector.extract_strided_slice %12 {offsets = [40, 0], sizes = [8, 128], strides = [1, 1]} : vector<128x128xf32> to vector<8x128xf32>
    %709 = vector.extract_strided_slice %13 {offsets = [11, 0], sizes = [1, 128], strides = [1, 1]} : vector<20x128xf32> to vector<1x128xf32>
    %710 = vector.broadcast %709 : vector<1x128xf32> to vector<8x128xf32>
    %711 = arith.mulf %710, %708 : vector<8x128xf32>
    %712 = arith.addf %707, %711 : vector<8x128xf32>
    %713 = vector.extract_strided_slice %12 {offsets = [48, 0], sizes = [8, 128], strides = [1, 1]} : vector<128x128xf32> to vector<8x128xf32>
    %714 = vector.extract_strided_slice %13 {offsets = [12, 0], sizes = [1, 128], strides = [1, 1]} : vector<20x128xf32> to vector<1x128xf32>
    %715 = vector.broadcast %714 : vector<1x128xf32> to vector<8x128xf32>
    %716 = arith.mulf %715, %713 : vector<8x128xf32>
    %717 = arith.addf %712, %716 : vector<8x128xf32>
    %718 = vector.extract_strided_slice %12 {offsets = [56, 0], sizes = [8, 128], strides = [1, 1]} : vector<128x128xf32> to vector<8x128xf32>
    %719 = vector.extract_strided_slice %13 {offsets = [13, 0], sizes = [1, 128], strides = [1, 1]} : vector<20x128xf32> to vector<1x128xf32>
    %720 = vector.broadcast %719 : vector<1x128xf32> to vector<8x128xf32>
    %721 = arith.mulf %720, %718 : vector<8x128xf32>
    %722 = arith.addf %717, %721 : vector<8x128xf32>
    %723 = vector.extract_strided_slice %12 {offsets = [64, 0], sizes = [8, 128], strides = [1, 1]} : vector<128x128xf32> to vector<8x128xf32>
    %724 = vector.extract_strided_slice %13 {offsets = [14, 0], sizes = [1, 128], strides = [1, 1]} : vector<20x128xf32> to vector<1x128xf32>
    %725 = vector.broadcast %724 : vector<1x128xf32> to vector<8x128xf32>
    %726 = arith.mulf %725, %723 : vector<8x128xf32>
    %727 = arith.addf %722, %726 : vector<8x128xf32>
    %728 = vector.extract_strided_slice %12 {offsets = [72, 0], sizes = [8, 128], strides = [1, 1]} : vector<128x128xf32> to vector<8x128xf32>
    %729 = vector.extract_strided_slice %13 {offsets = [15, 0], sizes = [1, 128], strides = [1, 1]} : vector<20x128xf32> to vector<1x128xf32>
    %730 = vector.broadcast %729 : vector<1x128xf32> to vector<8x128xf32>
    %731 = arith.mulf %730, %728 : vector<8x128xf32>
    %732 = arith.addf %727, %731 : vector<8x128xf32>
    %733 = vector.extract_strided_slice %12 {offsets = [80, 0], sizes = [8, 128], strides = [1, 1]} : vector<128x128xf32> to vector<8x128xf32>
    %734 = vector.extract_strided_slice %13 {offsets = [16, 0], sizes = [1, 128], strides = [1, 1]} : vector<20x128xf32> to vector<1x128xf32>
    %735 = vector.broadcast %734 : vector<1x128xf32> to vector<8x128xf32>
    %736 = arith.mulf %735, %733 : vector<8x128xf32>
    %737 = arith.addf %732, %736 : vector<8x128xf32>
    %738 = vector.extract_strided_slice %12 {offsets = [88, 0], sizes = [8, 128], strides = [1, 1]} : vector<128x128xf32> to vector<8x128xf32>
    %739 = vector.extract_strided_slice %13 {offsets = [17, 0], sizes = [1, 128], strides = [1, 1]} : vector<20x128xf32> to vector<1x128xf32>
    %740 = vector.broadcast %739 : vector<1x128xf32> to vector<8x128xf32>
    %741 = arith.mulf %740, %738 : vector<8x128xf32>
    %742 = arith.addf %737, %741 : vector<8x128xf32>
    %743 = vector.extract_strided_slice %12 {offsets = [96, 0], sizes = [8, 128], strides = [1, 1]} : vector<128x128xf32> to vector<8x128xf32>
    %744 = vector.extract_strided_slice %13 {offsets = [18, 0], sizes = [1, 128], strides = [1, 1]} : vector<20x128xf32> to vector<1x128xf32>
    %745 = vector.broadcast %744 : vector<1x128xf32> to vector<8x128xf32>
    %746 = arith.mulf %745, %743 : vector<8x128xf32>
    %747 = arith.addf %742, %746 : vector<8x128xf32>
    %c13 = arith.constant 13 : index
    %c0_79 = arith.constant 0 : index
    %c0_80 = arith.constant 0 : index
    %748 = vector.load %arg1[%c13, %c0_79, %c0_80] : memref<16x8x64xf32, #tpu.memory_space<vmem>>, vector<1x8x64xf32>
    %749 = vector.shape_cast %748 : vector<1x8x64xf32> to vector<8x64xf32>
    %750 = vector.extract_strided_slice %749 {offsets = [0, 0], sizes = [8, 32], strides = [1, 1]} : vector<8x64xf32> to vector<8x32xf32>
    %751 = vector.extract_strided_slice %749 {offsets = [0, 32], sizes = [8, 32], strides = [1, 1]} : vector<8x64xf32> to vector<8x32xf32>
    %752 = arith.subf %750, %751 : vector<8x32xf32>
    %753 = vector.extract_strided_slice %747 {offsets = [0, 0], sizes = [8, 32], strides = [1, 1]} : vector<8x128xf32> to vector<8x32xf32>
    %754 = arith.addf %752, %753 : vector<8x32xf32>
    %755 = vector.extract_strided_slice %747 {offsets = [0, 96], sizes = [8, 32], strides = [1, 1]} : vector<8x128xf32> to vector<8x32xf32>
    %756 = arith.subf %754, %755 : vector<8x32xf32>
    %757 = arith.addf %750, %751 : vector<8x32xf32>
    %758 = vector.extract_strided_slice %747 {offsets = [0, 32], sizes = [8, 32], strides = [1, 1]} : vector<8x128xf32> to vector<8x32xf32>
    %759 = arith.addf %757, %758 : vector<8x32xf32>
    %760 = vector.extract_strided_slice %747 {offsets = [0, 64], sizes = [8, 32], strides = [1, 1]} : vector<8x128xf32> to vector<8x32xf32>
    %761 = arith.addf %759, %760 : vector<8x32xf32>
    %762 = tpu.concatenate %756, %761 in 1 : vector<8x32xf32>, vector<8x32xf32> -> vector<8x64xf32>
    %c13_81 = arith.constant 13 : index
    %c0_82 = arith.constant 0 : index
    %c0_83 = arith.constant 0 : index
    %763 = vector.load %arg6[%c13_81, %c0_82, %c0_83] : memref<16x8x64xf32, #tpu.memory_space<vmem>>, vector<1x8x64xf32>
    %764 = vector.shape_cast %763 : vector<1x8x64xf32> to vector<8x64xf32>
    %765 = vector.shape_cast %762 : vector<8x64xf32> to vector<1x8x64xf32>
    tpu.vector_store %arg6[%c13_81, %c0_82, %c0_83], %765 {strides = array<i32>} : memref<16x8x64xf32, #tpu.memory_space<vmem>>, vector<1x8x64xf32>,
    %766 = vector.extract_strided_slice %12 {offsets = [112, 0], sizes = [8, 128], strides = [1, 1]} : vector<128x128xf32> to vector<8x128xf32>
    %767 = vector.broadcast %16 : vector<1x128xf32> to vector<8x128xf32>
    %768 = arith.mulf %766, %767 : vector<8x128xf32>
    %769 = vector.extract_strided_slice %12 {offsets = [0, 0], sizes = [8, 128], strides = [1, 1]} : vector<128x128xf32> to vector<8x128xf32>
    %770 = vector.extract_strided_slice %13 {offsets = [5, 0], sizes = [1, 128], strides = [1, 1]} : vector<20x128xf32> to vector<1x128xf32>
    %771 = vector.broadcast %770 : vector<1x128xf32> to vector<8x128xf32>
    %772 = arith.mulf %771, %769 : vector<8x128xf32>
    %773 = arith.addf %768, %772 : vector<8x128xf32>
    %774 = vector.extract_strided_slice %12 {offsets = [8, 0], sizes = [8, 128], strides = [1, 1]} : vector<128x128xf32> to vector<8x128xf32>
    %775 = vector.extract_strided_slice %13 {offsets = [6, 0], sizes = [1, 128], strides = [1, 1]} : vector<20x128xf32> to vector<1x128xf32>
    %776 = vector.broadcast %775 : vector<1x128xf32> to vector<8x128xf32>
    %777 = arith.mulf %776, %774 : vector<8x128xf32>
    %778 = arith.addf %773, %777 : vector<8x128xf32>
    %779 = vector.extract_strided_slice %12 {offsets = [16, 0], sizes = [8, 128], strides = [1, 1]} : vector<128x128xf32> to vector<8x128xf32>
    %780 = vector.extract_strided_slice %13 {offsets = [7, 0], sizes = [1, 128], strides = [1, 1]} : vector<20x128xf32> to vector<1x128xf32>
    %781 = vector.broadcast %780 : vector<1x128xf32> to vector<8x128xf32>
    %782 = arith.mulf %781, %779 : vector<8x128xf32>
    %783 = arith.addf %778, %782 : vector<8x128xf32>
    %784 = vector.extract_strided_slice %12 {offsets = [24, 0], sizes = [8, 128], strides = [1, 1]} : vector<128x128xf32> to vector<8x128xf32>
    %785 = vector.extract_strided_slice %13 {offsets = [8, 0], sizes = [1, 128], strides = [1, 1]} : vector<20x128xf32> to vector<1x128xf32>
    %786 = vector.broadcast %785 : vector<1x128xf32> to vector<8x128xf32>
    %787 = arith.mulf %786, %784 : vector<8x128xf32>
    %788 = arith.addf %783, %787 : vector<8x128xf32>
    %789 = vector.extract_strided_slice %12 {offsets = [32, 0], sizes = [8, 128], strides = [1, 1]} : vector<128x128xf32> to vector<8x128xf32>
    %790 = vector.extract_strided_slice %13 {offsets = [9, 0], sizes = [1, 128], strides = [1, 1]} : vector<20x128xf32> to vector<1x128xf32>
    %791 = vector.broadcast %790 : vector<1x128xf32> to vector<8x128xf32>
    %792 = arith.mulf %791, %789 : vector<8x128xf32>
    %793 = arith.addf %788, %792 : vector<8x128xf32>
    %794 = vector.extract_strided_slice %12 {offsets = [40, 0], sizes = [8, 128], strides = [1, 1]} : vector<128x128xf32> to vector<8x128xf32>
    %795 = vector.extract_strided_slice %13 {offsets = [10, 0], sizes = [1, 128], strides = [1, 1]} : vector<20x128xf32> to vector<1x128xf32>
    %796 = vector.broadcast %795 : vector<1x128xf32> to vector<8x128xf32>
    %797 = arith.mulf %796, %794 : vector<8x128xf32>
    %798 = arith.addf %793, %797 : vector<8x128xf32>
    %799 = vector.extract_strided_slice %12 {offsets = [48, 0], sizes = [8, 128], strides = [1, 1]} : vector<128x128xf32> to vector<8x128xf32>
    %800 = vector.extract_strided_slice %13 {offsets = [11, 0], sizes = [1, 128], strides = [1, 1]} : vector<20x128xf32> to vector<1x128xf32>
    %801 = vector.broadcast %800 : vector<1x128xf32> to vector<8x128xf32>
    %802 = arith.mulf %801, %799 : vector<8x128xf32>
    %803 = arith.addf %798, %802 : vector<8x128xf32>
    %804 = vector.extract_strided_slice %12 {offsets = [56, 0], sizes = [8, 128], strides = [1, 1]} : vector<128x128xf32> to vector<8x128xf32>
    %805 = vector.extract_strided_slice %13 {offsets = [12, 0], sizes = [1, 128], strides = [1, 1]} : vector<20x128xf32> to vector<1x128xf32>
    %806 = vector.broadcast %805 : vector<1x128xf32> to vector<8x128xf32>
    %807 = arith.mulf %806, %804 : vector<8x128xf32>
    %808 = arith.addf %803, %807 : vector<8x128xf32>
    %809 = vector.extract_strided_slice %12 {offsets = [64, 0], sizes = [8, 128], strides = [1, 1]} : vector<128x128xf32> to vector<8x128xf32>
    %810 = vector.extract_strided_slice %13 {offsets = [13, 0], sizes = [1, 128], strides = [1, 1]} : vector<20x128xf32> to vector<1x128xf32>
    %811 = vector.broadcast %810 : vector<1x128xf32> to vector<8x128xf32>
    %812 = arith.mulf %811, %809 : vector<8x128xf32>
    %813 = arith.addf %808, %812 : vector<8x128xf32>
    %814 = vector.extract_strided_slice %12 {offsets = [72, 0], sizes = [8, 128], strides = [1, 1]} : vector<128x128xf32> to vector<8x128xf32>
    %815 = vector.extract_strided_slice %13 {offsets = [14, 0], sizes = [1, 128], strides = [1, 1]} : vector<20x128xf32> to vector<1x128xf32>
    %816 = vector.broadcast %815 : vector<1x128xf32> to vector<8x128xf32>
    %817 = arith.mulf %816, %814 : vector<8x128xf32>
    %818 = arith.addf %813, %817 : vector<8x128xf32>
    %819 = vector.extract_strided_slice %12 {offsets = [80, 0], sizes = [8, 128], strides = [1, 1]} : vector<128x128xf32> to vector<8x128xf32>
    %820 = vector.extract_strided_slice %13 {offsets = [15, 0], sizes = [1, 128], strides = [1, 1]} : vector<20x128xf32> to vector<1x128xf32>
    %821 = vector.broadcast %820 : vector<1x128xf32> to vector<8x128xf32>
    %822 = arith.mulf %821, %819 : vector<8x128xf32>
    %823 = arith.addf %818, %822 : vector<8x128xf32>
    %824 = vector.extract_strided_slice %12 {offsets = [88, 0], sizes = [8, 128], strides = [1, 1]} : vector<128x128xf32> to vector<8x128xf32>
    %825 = vector.extract_strided_slice %13 {offsets = [16, 0], sizes = [1, 128], strides = [1, 1]} : vector<20x128xf32> to vector<1x128xf32>
    %826 = vector.broadcast %825 : vector<1x128xf32> to vector<8x128xf32>
    %827 = arith.mulf %826, %824 : vector<8x128xf32>
    %828 = arith.addf %823, %827 : vector<8x128xf32>
    %829 = vector.extract_strided_slice %12 {offsets = [96, 0], sizes = [8, 128], strides = [1, 1]} : vector<128x128xf32> to vector<8x128xf32>
    %830 = vector.extract_strided_slice %13 {offsets = [17, 0], sizes = [1, 128], strides = [1, 1]} : vector<20x128xf32> to vector<1x128xf32>
    %831 = vector.broadcast %830 : vector<1x128xf32> to vector<8x128xf32>
    %832 = arith.mulf %831, %829 : vector<8x128xf32>
    %833 = arith.addf %828, %832 : vector<8x128xf32>
    %834 = vector.extract_strided_slice %12 {offsets = [104, 0], sizes = [8, 128], strides = [1, 1]} : vector<128x128xf32> to vector<8x128xf32>
    %835 = vector.extract_strided_slice %13 {offsets = [18, 0], sizes = [1, 128], strides = [1, 1]} : vector<20x128xf32> to vector<1x128xf32>
    %836 = vector.broadcast %835 : vector<1x128xf32> to vector<8x128xf32>
    %837 = arith.mulf %836, %834 : vector<8x128xf32>
    %838 = arith.addf %833, %837 : vector<8x128xf32>
    %c14 = arith.constant 14 : index
    %c0_84 = arith.constant 0 : index
    %c0_85 = arith.constant 0 : index
    %839 = vector.load %arg1[%c14, %c0_84, %c0_85] : memref<16x8x64xf32, #tpu.memory_space<vmem>>, vector<1x8x64xf32>
    %840 = vector.shape_cast %839 : vector<1x8x64xf32> to vector<8x64xf32>
    %841 = vector.extract_strided_slice %840 {offsets = [0, 0], sizes = [8, 32], strides = [1, 1]} : vector<8x64xf32> to vector<8x32xf32>
    %842 = vector.extract_strided_slice %840 {offsets = [0, 32], sizes = [8, 32], strides = [1, 1]} : vector<8x64xf32> to vector<8x32xf32>
    %843 = arith.subf %841, %842 : vector<8x32xf32>
    %844 = vector.extract_strided_slice %838 {offsets = [0, 0], sizes = [8, 32], strides = [1, 1]} : vector<8x128xf32> to vector<8x32xf32>
    %845 = arith.addf %843, %844 : vector<8x32xf32>
    %846 = vector.extract_strided_slice %838 {offsets = [0, 96], sizes = [8, 32], strides = [1, 1]} : vector<8x128xf32> to vector<8x32xf32>
    %847 = arith.subf %845, %846 : vector<8x32xf32>
    %848 = arith.addf %841, %842 : vector<8x32xf32>
    %849 = vector.extract_strided_slice %838 {offsets = [0, 32], sizes = [8, 32], strides = [1, 1]} : vector<8x128xf32> to vector<8x32xf32>
    %850 = arith.addf %848, %849 : vector<8x32xf32>
    %851 = vector.extract_strided_slice %838 {offsets = [0, 64], sizes = [8, 32], strides = [1, 1]} : vector<8x128xf32> to vector<8x32xf32>
    %852 = arith.addf %850, %851 : vector<8x32xf32>
    %853 = tpu.concatenate %847, %852 in 1 : vector<8x32xf32>, vector<8x32xf32> -> vector<8x64xf32>
    %c14_86 = arith.constant 14 : index
    %c0_87 = arith.constant 0 : index
    %c0_88 = arith.constant 0 : index
    %854 = vector.load %arg6[%c14_86, %c0_87, %c0_88] : memref<16x8x64xf32, #tpu.memory_space<vmem>>, vector<1x8x64xf32>
    %855 = vector.shape_cast %854 : vector<1x8x64xf32> to vector<8x64xf32>
    %856 = vector.shape_cast %853 : vector<8x64xf32> to vector<1x8x64xf32>
    tpu.vector_store %arg6[%c14_86, %c0_87, %c0_88], %856 {strides = array<i32>} : memref<16x8x64xf32, #tpu.memory_space<vmem>>, vector<1x8x64xf32>,
    %857 = vector.extract_strided_slice %12 {offsets = [120, 0], sizes = [8, 128], strides = [1, 1]} : vector<128x128xf32> to vector<8x128xf32>
    %858 = vector.broadcast %16 : vector<1x128xf32> to vector<8x128xf32>
    %859 = arith.mulf %857, %858 : vector<8x128xf32>
    %860 = vector.extract_strided_slice %12 {offsets = [0, 0], sizes = [8, 128], strides = [1, 1]} : vector<128x128xf32> to vector<8x128xf32>
    %861 = vector.extract_strided_slice %13 {offsets = [4, 0], sizes = [1, 128], strides = [1, 1]} : vector<20x128xf32> to vector<1x128xf32>
    %862 = vector.broadcast %861 : vector<1x128xf32> to vector<8x128xf32>
    %863 = arith.mulf %862, %860 : vector<8x128xf32>
    %864 = arith.addf %859, %863 : vector<8x128xf32>
    %865 = vector.extract_strided_slice %12 {offsets = [8, 0], sizes = [8, 128], strides = [1, 1]} : vector<128x128xf32> to vector<8x128xf32>
    %866 = vector.extract_strided_slice %13 {offsets = [5, 0], sizes = [1, 128], strides = [1, 1]} : vector<20x128xf32> to vector<1x128xf32>
    %867 = vector.broadcast %866 : vector<1x128xf32> to vector<8x128xf32>
    %868 = arith.mulf %867, %865 : vector<8x128xf32>
    %869 = arith.addf %864, %868 : vector<8x128xf32>
    %870 = vector.extract_strided_slice %12 {offsets = [16, 0], sizes = [8, 128], strides = [1, 1]} : vector<128x128xf32> to vector<8x128xf32>
    %871 = vector.extract_strided_slice %13 {offsets = [6, 0], sizes = [1, 128], strides = [1, 1]} : vector<20x128xf32> to vector<1x128xf32>
    %872 = vector.broadcast %871 : vector<1x128xf32> to vector<8x128xf32>
    %873 = arith.mulf %872, %870 : vector<8x128xf32>
    %874 = arith.addf %869, %873 : vector<8x128xf32>
    %875 = vector.extract_strided_slice %12 {offsets = [24, 0], sizes = [8, 128], strides = [1, 1]} : vector<128x128xf32> to vector<8x128xf32>
    %876 = vector.extract_strided_slice %13 {offsets = [7, 0], sizes = [1, 128], strides = [1, 1]} : vector<20x128xf32> to vector<1x128xf32>
    %877 = vector.broadcast %876 : vector<1x128xf32> to vector<8x128xf32>
    %878 = arith.mulf %877, %875 : vector<8x128xf32>
    %879 = arith.addf %874, %878 : vector<8x128xf32>
    %880 = vector.extract_strided_slice %12 {offsets = [32, 0], sizes = [8, 128], strides = [1, 1]} : vector<128x128xf32> to vector<8x128xf32>
    %881 = vector.extract_strided_slice %13 {offsets = [8, 0], sizes = [1, 128], strides = [1, 1]} : vector<20x128xf32> to vector<1x128xf32>
    %882 = vector.broadcast %881 : vector<1x128xf32> to vector<8x128xf32>
    %883 = arith.mulf %882, %880 : vector<8x128xf32>
    %884 = arith.addf %879, %883 : vector<8x128xf32>
    %885 = vector.extract_strided_slice %12 {offsets = [40, 0], sizes = [8, 128], strides = [1, 1]} : vector<128x128xf32> to vector<8x128xf32>
    %886 = vector.extract_strided_slice %13 {offsets = [9, 0], sizes = [1, 128], strides = [1, 1]} : vector<20x128xf32> to vector<1x128xf32>
    %887 = vector.broadcast %886 : vector<1x128xf32> to vector<8x128xf32>
    %888 = arith.mulf %887, %885 : vector<8x128xf32>
    %889 = arith.addf %884, %888 : vector<8x128xf32>
    %890 = vector.extract_strided_slice %12 {offsets = [48, 0], sizes = [8, 128], strides = [1, 1]} : vector<128x128xf32> to vector<8x128xf32>
    %891 = vector.extract_strided_slice %13 {offsets = [10, 0], sizes = [1, 128], strides = [1, 1]} : vector<20x128xf32> to vector<1x128xf32>
    %892 = vector.broadcast %891 : vector<1x128xf32> to vector<8x128xf32>
    %893 = arith.mulf %892, %890 : vector<8x128xf32>
    %894 = arith.addf %889, %893 : vector<8x128xf32>
    %895 = vector.extract_strided_slice %12 {offsets = [56, 0], sizes = [8, 128], strides = [1, 1]} : vector<128x128xf32> to vector<8x128xf32>
    %896 = vector.extract_strided_slice %13 {offsets = [11, 0], sizes = [1, 128], strides = [1, 1]} : vector<20x128xf32> to vector<1x128xf32>
    %897 = vector.broadcast %896 : vector<1x128xf32> to vector<8x128xf32>
    %898 = arith.mulf %897, %895 : vector<8x128xf32>
    %899 = arith.addf %894, %898 : vector<8x128xf32>
    %900 = vector.extract_strided_slice %12 {offsets = [64, 0], sizes = [8, 128], strides = [1, 1]} : vector<128x128xf32> to vector<8x128xf32>
    %901 = vector.extract_strided_slice %13 {offsets = [12, 0], sizes = [1, 128], strides = [1, 1]} : vector<20x128xf32> to vector<1x128xf32>
    %902 = vector.broadcast %901 : vector<1x128xf32> to vector<8x128xf32>
    %903 = arith.mulf %902, %900 : vector<8x128xf32>
    %904 = arith.addf %899, %903 : vector<8x128xf32>
    %905 = vector.extract_strided_slice %12 {offsets = [72, 0], sizes = [8, 128], strides = [1, 1]} : vector<128x128xf32> to vector<8x128xf32>
    %906 = vector.extract_strided_slice %13 {offsets = [13, 0], sizes = [1, 128], strides = [1, 1]} : vector<20x128xf32> to vector<1x128xf32>
    %907 = vector.broadcast %906 : vector<1x128xf32> to vector<8x128xf32>
    %908 = arith.mulf %907, %905 : vector<8x128xf32>
    %909 = arith.addf %904, %908 : vector<8x128xf32>
    %910 = vector.extract_strided_slice %12 {offsets = [80, 0], sizes = [8, 128], strides = [1, 1]} : vector<128x128xf32> to vector<8x128xf32>
    %911 = vector.extract_strided_slice %13 {offsets = [14, 0], sizes = [1, 128], strides = [1, 1]} : vector<20x128xf32> to vector<1x128xf32>
    %912 = vector.broadcast %911 : vector<1x128xf32> to vector<8x128xf32>
    %913 = arith.mulf %912, %910 : vector<8x128xf32>
    %914 = arith.addf %909, %913 : vector<8x128xf32>
    %915 = vector.extract_strided_slice %12 {offsets = [88, 0], sizes = [8, 128], strides = [1, 1]} : vector<128x128xf32> to vector<8x128xf32>
    %916 = vector.extract_strided_slice %13 {offsets = [15, 0], sizes = [1, 128], strides = [1, 1]} : vector<20x128xf32> to vector<1x128xf32>
    %917 = vector.broadcast %916 : vector<1x128xf32> to vector<8x128xf32>
    %918 = arith.mulf %917, %915 : vector<8x128xf32>
    %919 = arith.addf %914, %918 : vector<8x128xf32>
    %920 = vector.extract_strided_slice %12 {offsets = [96, 0], sizes = [8, 128], strides = [1, 1]} : vector<128x128xf32> to vector<8x128xf32>
    %921 = vector.extract_strided_slice %13 {offsets = [16, 0], sizes = [1, 128], strides = [1, 1]} : vector<20x128xf32> to vector<1x128xf32>
    %922 = vector.broadcast %921 : vector<1x128xf32> to vector<8x128xf32>
    %923 = arith.mulf %922, %920 : vector<8x128xf32>
    %924 = arith.addf %919, %923 : vector<8x128xf32>
    %925 = vector.extract_strided_slice %12 {offsets = [104, 0], sizes = [8, 128], strides = [1, 1]} : vector<128x128xf32> to vector<8x128xf32>
    %926 = vector.extract_strided_slice %13 {offsets = [17, 0], sizes = [1, 128], strides = [1, 1]} : vector<20x128xf32> to vector<1x128xf32>
    %927 = vector.broadcast %926 : vector<1x128xf32> to vector<8x128xf32>
    %928 = arith.mulf %927, %925 : vector<8x128xf32>
    %929 = arith.addf %924, %928 : vector<8x128xf32>
    %930 = vector.extract_strided_slice %12 {offsets = [112, 0], sizes = [8, 128], strides = [1, 1]} : vector<128x128xf32> to vector<8x128xf32>
    %931 = vector.extract_strided_slice %13 {offsets = [18, 0], sizes = [1, 128], strides = [1, 1]} : vector<20x128xf32> to vector<1x128xf32>
    %932 = vector.broadcast %931 : vector<1x128xf32> to vector<8x128xf32>
    %933 = arith.mulf %932, %930 : vector<8x128xf32>
    %934 = arith.addf %929, %933 : vector<8x128xf32>
    %c15 = arith.constant 15 : index
    %c0_89 = arith.constant 0 : index
    %c0_90 = arith.constant 0 : index
    %935 = vector.load %arg1[%c15, %c0_89, %c0_90] : memref<16x8x64xf32, #tpu.memory_space<vmem>>, vector<1x8x64xf32>
    %936 = vector.shape_cast %935 : vector<1x8x64xf32> to vector<8x64xf32>
    %937 = vector.extract_strided_slice %936 {offsets = [0, 0], sizes = [8, 32], strides = [1, 1]} : vector<8x64xf32> to vector<8x32xf32>
    %938 = vector.extract_strided_slice %936 {offsets = [0, 32], sizes = [8, 32], strides = [1, 1]} : vector<8x64xf32> to vector<8x32xf32>
    %939 = arith.subf %937, %938 : vector<8x32xf32>
    %940 = vector.extract_strided_slice %934 {offsets = [0, 0], sizes = [8, 32], strides = [1, 1]} : vector<8x128xf32> to vector<8x32xf32>
    %941 = arith.addf %939, %940 : vector<8x32xf32>
    %942 = vector.extract_strided_slice %934 {offsets = [0, 96], sizes = [8, 32], strides = [1, 1]} : vector<8x128xf32> to vector<8x32xf32>
    %943 = arith.subf %941, %942 : vector<8x32xf32>
    %944 = arith.addf %937, %938 : vector<8x32xf32>
    %945 = vector.extract_strided_slice %934 {offsets = [0, 32], sizes = [8, 32], strides = [1, 1]} : vector<8x128xf32> to vector<8x32xf32>
    %946 = arith.addf %944, %945 : vector<8x32xf32>
    %947 = vector.extract_strided_slice %934 {offsets = [0, 64], sizes = [8, 32], strides = [1, 1]} : vector<8x128xf32> to vector<8x32xf32>
    %948 = arith.addf %946, %947 : vector<8x32xf32>
    %949 = tpu.concatenate %943, %948 in 1 : vector<8x32xf32>, vector<8x32xf32> -> vector<8x64xf32>
    %c15_91 = arith.constant 15 : index
    %c0_92 = arith.constant 0 : index
    %c0_93 = arith.constant 0 : index
    %950 = vector.load %arg6[%c15_91, %c0_92, %c0_93] : memref<16x8x64xf32, #tpu.memory_space<vmem>>, vector<1x8x64xf32>
    %951 = vector.shape_cast %950 : vector<1x8x64xf32> to vector<8x64xf32>
    %952 = vector.shape_cast %949 : vector<8x64xf32> to vector<1x8x64xf32>
    tpu.vector_store %arg6[%c15_91, %c0_92, %c0_93], %952 {strides = array<i32>} : memref<16x8x64xf32, #tpu.memory_space<vmem>>, vector<1x8x64xf32>,
    return
  }
  func.func @transform_0(%arg0: i32) -> (i32, i32, i32) {
    %c0_i32 = arith.constant 0 : i32
    %c0_i32_0 = arith.constant 0 : i32
    %c0_i32_1 = arith.constant 0 : i32
    return %c0_i32, %arg0, %c0_i32_0 : i32, i32, i32
  }
  func.func @transform_1(%arg0: i32) -> (i32, i32) {
    %c0_i32 = arith.constant 0 : i32
    %c0_i32_0 = arith.constant 0 : i32
    %c0_i32_1 = arith.constant 0 : i32
    return %c0_i32, %c0_i32_0 : i32, i32
  }
  func.func @transform_2(%arg0: i32) -> (i32, i32) {
    %c0_i32 = arith.constant 0 : i32
    %c0_i32_0 = arith.constant 0 : i32
    %c0_i32_1 = arith.constant 0 : i32
    return %c0_i32, %c0_i32_0 : i32, i32
  }
  func.func @transform_3(%arg0: i32) -> (i32, i32) {
    %c0_i32 = arith.constant 0 : i32
    %c0_i32_0 = arith.constant 0 : i32
    %c0_i32_1 = arith.constant 0 : i32
    return %c0_i32, %c0_i32_0 : i32, i32
  }
  func.func @transform_4(%arg0: i32) -> (i32, i32) {
    %c0_i32 = arith.constant 0 : i32
    %c0_i32_0 = arith.constant 0 : i32
    %c0_i32_1 = arith.constant 0 : i32
    return %c0_i32, %c0_i32_0 : i32, i32
  }
  func.func @transform_5(%arg0: i32) -> (i32, i32, i32) {
    %c0_i32 = arith.constant 0 : i32
    %c0_i32_0 = arith.constant 0 : i32
    %c0_i32_1 = arith.constant 0 : i32
    return %c0_i32, %arg0, %c0_i32_0 : i32, i32, i32
  }
}

</mosaic_0001>

<bundles_post_ra>
// kernel: complex_unideep_fsmn_l1.1
= control target key start
LH: loop header
LB: loop body
LE: loop exit
PB: predicated region body
PF: predicated region fallthrough
CT: control target
= control target key end

     0   :  { %vm84_vm0 = vcmask 523264   ;;  %s1364_s22 = smov 96   ;;  %s1366_s29 = smov 64   ;;  %vm425_vm1 = vcmask 261120   ;;  %s2509_s1 = inlined_call_operand.vmem [shape: bf16[64,128], index: 1, kind: input, shape index: {}]   ;;  %s2510_s0 = inlined_call_operand.vmem [shape: f32[16,8,64], index: 0, kind: input, shape index: {}]   ;;  %s2511_s3 = inlined_call_operand.vmem [shape: bf16[128,128], index: 3, kind: input, shape index: {}]   ;;  %s2512_s2 = inlined_call_operand.vmem [shape: f32[1,128], index: 2, kind: input, shape index: {}]   ;;  %s2513_s4 = inlined_call_operand.vmem [shape: f32[20,128], index: 4, kind: input, shape index: {}]   ;;  %s2514_s5 = inlined_call_operand.vmem [shape: f32[16,8,64], index: 5, kind: output, shape index: {}]  }
   0x1   :  { %v1336_v0 = vld [vmem:[%s2509_s1] sm:$0xff]   ;;  %v1337_v1 = vld [vmem:[%s2509_s1 + $0x8] sm:$0xff]   ;;  %v1338_v2 = vld [vmem:[%s2509_s1 + $0x10] sm:$0xff]  }
   0x2   :  { %1261 = vmatprep.subr.bf16.mxu0 %v1336_v0  ;;  %v1409_v3 = vld [vmem:[%s2510_s0] sm:$0xff]  ;;  %v1414_v4 = vld [vmem:[%s2510_s0 + $0x8] sm:$0xff]  ;;  %v1339_v6 = vld [vmem:[%s2509_s1 + $0x18] sm:$0xff]  }
   0x3   :  { %1262 = vmatpush3.bf16.msra.mxu0 %v1336_v0  ;;  %2562 = vst [vmem:[#allocation2_spill] sm:$0xff] %v1409_v3  ;;  %2563 = vst [vmem:[#allocation3_spill] sm:$0xff] %v1414_v4  ;;  %v37_v5 = vpack.c.bf16 %v1414_v4, %v1409_v3  ;;  %v1425_v7 = vld [vmem:[%s2510_s0 + $0x10] sm:$0xff]  ;;  %v1430_v8 = vld [vmem:[%s2510_s0 + $0x18] sm:$0xff]  ;;  %402 = vrot.lane.b32.xlu0 %v1409_v3, %s1364_s22 }
   0x4   :  { %1263 = vmatprep.subr.bf16.mxu0 %v1337_v1  ;;  %2564 = vst [vmem:[#allocation4_spill] sm:$0xff] %v1425_v7  ;;  %2565 = vst [vmem:[#allocation5_spill] sm:$0xff] %v1430_v8  ;;  %v1435_v9 = vld [vmem:[%s2510_s0 + $0x20] sm:$0xff]  ;;  %v1443_v11 = vld [vmem:[%s2510_s0 + $0x28] sm:$0xff]  ;;  %v38_v13 = vpack.c.bf16 %v1430_v8, %v1425_v7  ;;  %438 = vrot.lane.b32.xlu1 %v1414_v4, %s1364_s22 }
   0x5   :  { %1269 = vmatprep.mubr.msk.bf16.mxu0 %vm84_vm0, %v37_v5  ;;  %2566 = vst [vmem:[#allocation6_spill] sm:$0xff] %v1435_v9  ;;  %v1340_v10 = vld [vmem:[%s2511_s3] sm:$0xff]   ;;  %2567 = vst [vmem:[#allocation7_spill] sm:$0xff] %v1443_v11  ;;  %v1341_v12 = vld [vmem:[%s2511_s3 + $0x8] sm:$0xff]   ;;  %v39_v14 = vpack.c.bf16 %v1443_v11, %v1435_v9 }
   0x6   :  { %1317 = vmatprep.subr.bf16.mxu1 %v1340_v10  ;;  %v1342_v15 = vld [vmem:[%s2511_s3 + $0x10] sm:$0xff]   ;;  %v1465_v17 = vld [vmem:[%s2510_s0 + $0x38] sm:$0xff]  ;;  %v1470_v18 = vld [vmem:[%s2510_s0 + $0x40] sm:$0xff] }
   0x7   :  { %1264 = vmatpush3.bf16.msra.mxu0 %v1337_v1  ;;  %1325 = vmatpush3.bf16.msra.mxu1 %v1340_v10  ;;  %v1460_v16 = vld [vmem:[%s2510_s0 + $0x30] sm:$0xff]  ;;  %2569 = vst [vmem:[#allocation9_spill] sm:$0xff] %v1465_v17  ;;  %2570 = vst [vmem:[#allocation10_spill] sm:$0xff] %v1470_v18  ;;  %v1475_v19 = vld [vmem:[%s2510_s0 + $0x48] sm:$0xff] }
   0x8   :  { %1265 = vmatprep.subr.bf16.mxu0 %v1338_v2  ;;  %1318 = vmatprep.subr.bf16.mxu1 %v1341_v12  ;;  %2568 = vst [vmem:[#allocation8_spill] sm:$0xff] %v1460_v16  ;;  %2571 = vst [vmem:[#allocation11_spill] sm:$0xff] %v1475_v19  ;;  %v1343_v20 = vld [vmem:[%s2511_s3 + $0x18] sm:$0xff]   ;;  %v40_v21 = vpack.c.bf16 %v1465_v17, %v1460_v16  ;;  %v41_v22 = vpack.c.bf16 %v1475_v19, %v1470_v18  ;;  %v1344_v23 = vld [vmem:[%s2511_s3 + $0x20] sm:$0xff]  }
   0x9   :  { %v1492_v24 = vld [vmem:[%s2510_s0 + $0x50] sm:$0xff]  ;;  %v1497_v25 = vld [vmem:[%s2510_s0 + $0x58] sm:$0xff]  ;;  %v1502_v26 = vld [vmem:[%s2510_s0 + $0x60] sm:$0xff]  ;;  %476 = vrot.lane.b32.xlu0 %v1425_v7, %s1364_s22 }
   0xa   :  { %2572 = vst [vmem:[#allocation12_spill] sm:$0xff] %v1492_v24  ;;  %2573 = vst [vmem:[#allocation13_spill] sm:$0xff] %v1497_v25  ;;  %v1507_v27 = vld [vmem:[%s2510_s0 + $0x68] sm:$0xff]  ;;  %v42_v29 = vpack.c.bf16 %v1497_v25, %v1492_v24  ;;  %v35_v31 = vld [vmem:[%s2510_s0 + $0x70] sm:$0xff]  ;;  %516 = vrot.lane.b32.xlu1 %v1430_v8, %s1364_s22 }
   0xb   :  { %1266 = vmatpush3.bf16.msra.mxu0 %v1338_v2  ;;  %1326 = vmatpush3.bf16.msra.mxu1 %v1341_v12  ;;  %2574 = vst [vmem:[#allocation14_spill] sm:$0xff] %v1502_v26  ;;  %2575 = vst [vmem:[#allocation15_spill] sm:$0xff] %v1507_v27  ;;  %v1345_v28 = vld [vmem:[%s2511_s3 + $0x28] sm:$0xff]   ;;  %v43_v30 = vpack.c.bf16 %v1507_v27, %v1502_v26  ;;  %v36_v32 = vld [vmem:[%s2510_s0 + $0x78] sm:$0xff] }
   0xc   :  { %1267 = vmatprep.subr.bf16.mxu0 %v1339_v6  ;;  %1319 = vmatprep.subr.bf16.mxu1 %v1342_v15  ;;  %v44_v33 = vpack.c.bf16 %v36_v32, %v35_v31  ;;  %v1346_v34 = vld [vmem:[%s2511_s3 + $0x30] sm:$0xff]   ;;  %v1347_v35 = vld [vmem:[%s2511_s3 + $0x38] sm:$0xff]   ;;  %v1182_v36 = vld [vmem:[%s2512_s2] ss:$0 sm:$0xff] }
   0xd   :  { %602 = vrot.lane.b32.xlu0 %v1443_v11, %s1364_s22 }
   0xe   :  { %558 = vrot.lane.b32.xlu1 %v1435_v9, %s1364_s22 }
   0xf   :  { %1268 = vmatpush3.bf16.msra.mxu0 %v1339_v6  ;;  %1327 = vmatpush3.bf16.msra.mxu1 %v1342_v15 }
  0x10   :  { %1285 = vmatprep.subr.bf16.mxu0 %v1340_v10  ;;  %1320 = vmatprep.subr.bf16.mxu1 %v1343_v20 }
  0x11   :  { %696 = vrot.lane.b32.xlu0 %v1465_v17, %s1364_s22 }
  0x12   :  { %1270 = vmatmul.mubr.msk.bf16.vlgmr.msra.gmra.mrb[0].mxu0 %vm84_vm0, %v38_v13  ;;  %648 = vrot.lane.b32.xlu1 %v1460_v16, %s1364_s22 }
  0x13   :  { %1273 = vmatprep.mubr.msk.bf16.mxu0 %vm84_vm0, %v39_v14  ;;  %1286 = vmatpush3.bf16.msra.mxu0 %v1340_v10 }
  0x14   :  { %1287 = vmatprep.subr.bf16.mxu0 %v1341_v12  ;;  %1328 = vmatpush3.bf16.msra.mxu1 %v1343_v20 }
  0x15   :  { %1321 = vmatprep.subr.bf16.mxu1 %v1344_v23  ;;  %798 = vrot.lane.b32.xlu0 %v1475_v19, %s1364_s22 }
  0x16   :  { %746 = vrot.lane.b32.xlu1 %v1470_v18, %s1364_s22 }
  0x17   :  { %1288 = vmatpush3.bf16.msra.mxu0 %v1341_v12 }
  0x18   :  { %1289 = vmatprep.subr.bf16.mxu0 %v1342_v15  ;;  %1329 = vmatpush3.bf16.msra.mxu1 %v1344_v23 }
  0x19   :  { %1322 = vmatprep.subr.bf16.mxu1 %v1345_v28  ;;  %908 = vrot.lane.b32.xlu0 %v1497_v25, %s1364_s22 }
  0x1a   :  { %1274 = vmatmul.mubr.msk.bf16.gmra.mrb[4].mxu0 %vm84_vm0, %v40_v21  ;;  %852 = vrot.lane.b32.xlu1 %v1492_v24, %s1364_s22 }
  0x1b   :  { %1277 = vmatprep.mubr.msk.bf16.mxu0 %vm84_vm0, %v41_v22  ;;  %1290 = vmatpush3.bf16.msra.mxu0 %v1342_v15 }
  0x1c   :  { %1291 = vmatprep.subr.bf16.mxu0 %v1343_v20  ;;  %1330 = vmatpush3.bf16.msra.mxu1 %v1345_v28 }
  0x1d   :  { %1323 = vmatprep.subr.bf16.mxu1 %v1346_v34  ;;  %1026 = vrot.lane.b32.xlu0 %v1507_v27, %s1364_s22 }
  0x1e   :  { %966 = vrot.lane.b32.xlu1 %v1502_v26, %s1364_s22 }
  0x1f   :  { %1292 = vmatpush3.bf16.msra.mxu0 %v1343_v20 }
  0x20   :  { %1293 = vmatprep.subr.bf16.mxu0 %v1344_v23  ;;  %1331 = vmatpush3.bf16.msra.mxu1 %v1346_v34 }
  0x21   :  { %1324 = vmatprep.subr.bf16.mxu1 %v1347_v35  ;;  %1152 = vrot.lane.b32.xlu0 %v36_v32, %s1364_s22 }
  0x22   :  { %1278 = vmatmul.mubr.msk.bf16.gmra.mrb[8].mxu0 %vm84_vm0, %v42_v29  ;;  %1088 = vrot.lane.b32.xlu1 %v35_v31, %s1364_s22 }
  0x23   :  { %1281 = vmatprep.mubr.msk.bf16.mxu0 %vm84_vm0, %v43_v30  ;;  %1294 = vmatpush3.bf16.msra.mxu0 %v1344_v23 }
  0x24   :  { %1295 = vmatprep.subr.bf16.mxu0 %v1345_v28  ;;  %1332 = vmatpush3.bf16.msra.mxu1 %v1347_v35 }
  0x27   :  { %1296 = vmatpush3.bf16.msra.mxu0 %v1345_v28 }
  0x28   :  { %1297 = vmatprep.subr.bf16.mxu0 %v1346_v34 }
  0x2a   :  { %1282 = vmatmul.mubr.msk.bf16.gmra.mrb[12].mxu0 %vm84_vm0, %v44_v33 }
  0x2b   :  { %1298 = vmatpush3.bf16.msra.mxu0 %v1346_v34 }
  0x2c   :  { %1299 = vmatprep.subr.bf16.mxu0 %v1347_v35 }
  0x2f   :  { %1300 = vmatpush3.bf16.msra.mxu0 %v1347_v35 }
  0xe5   :  { %v1271_v37 = vpop.f32.mrb[0].mxu0 }
  0xe6   :  { %v152_v38 = vadd.f32 %v1271_v37, %v1182_v36  ;;  %v143_v39 = vpop.f32.mrb[1].mxu0 }
  0xe7   :  { %v144_v40 = vadd.f32 %v1182_v36, %v143_v39  ;;  %v1272_v41 = vpop.f32.mrb[2].mxu0 }
  0xe8   :  { %v155_v42 = vadd.f32 %v1272_v41, %v1182_v36  ;;  %v146_v43 = vpop.f32.mrb[3].mxu0  ;;  %v208_v45 = vmax.f32 %v152_v38, 0.0 }
  0xe9   :  { %v147_v44 = vadd.f32 %v1182_v36, %v146_v43  ;;  %v206_v47 = vmax.f32 %v144_v40, 0.0 }
  0xea   :  { %v209_v46 = vmax.f32 %v155_v42, 0.0 }
  0xeb   :  { %v207_v48 = vmax.f32 %v147_v44, 0.0  ;;  %v1564_v44 = vpop.permute.xlu0 %402 }
  0xec   :  { %v223_v49 = vpack.c.bf16 %v209_v46, %v208_v45  ;;  %2576 = vst [vmem:[#allocation16_spill] sm:$0xff] %v1564_v44  ;;  %v1566_v45 = vpop.permute.xlu1 %438 }
  0xed   :  { %v222_v50 = vpack.c.bf16 %v207_v48, %v206_v47  ;;  %v1275_v51 = vpop.f32.mrb[4].mxu0  ;;  %2577 = vst [vmem:[#allocation17_spill] sm:$0xff] %v1566_v45  ;;  %v395_v48 = vlaneseq }
  0xee   :  { %v168_v52 = vadd.f32 %v1275_v51, %v1182_v36  ;;  %v159_v53 = vpop.f32.mrb[5].mxu0  ;;  %v393_v51 = vld [vmem:[%s2513_s4 + $0x10] sm:$0xf] }
  0xef   :  { %v160_v54 = vadd.f32 %v1182_v36, %v159_v53  ;;  %v1276_v55 = vpop.f32.mrb[6].mxu0  ;;  %1301 = vmatprep.mubr.bf16.mxu0 %v222_v50  ;;  %v1568_v46 = vpop.permute.xlu0 %476 }
  0xf0   :  { %v212_v56 = vmax.f32 %v168_v52, 0.0  ;;  %v171_v57 = vadd.f32 %v1276_v55, %v1182_v36  ;;  %v162_v58 = vpop.f32.mrb[7].mxu0  ;;  %1302 = vmatmul.mubr.bf16.vlgmr.msra.gmra.mrb[16].mxu0 %v223_v49  ;;  %2578 = vst [vmem:[#allocation18_spill] sm:$0xff] %v1568_v46  ;;  %v1570_v47 = vpop.permute.xlu1 %516 }
  0xf1   :  { %v210_v59 = vmax.f32 %v160_v54, 0.0  ;;  %v163_v60 = vadd.f32 %v1182_v36, %v162_v58  ;;  %2579 = vst [vmem:[#allocation19_spill] sm:$0xff] %v1570_v47  ;;  %v394_v54 = vadd.f32 1.0, %v393_v51 }
  0xf2   :  { %v213_v61 = vmax.f32 %v171_v57, 0.0 }
  0xf3   :  { %v211_v62 = vmax.f32 %v163_v60, 0.0  ;;  %v1574_v50 = vpop.permute.xlu0 %602 }
  0xf4   :  { %v225_v63 = vpack.c.bf16 %v213_v61, %v212_v56  ;;  %v1572_v49 = vpop.permute.xlu1 %558  ;;  %2581 = vst [vmem:[#allocation21_spill] sm:$0xff] %v1574_v50 }
  0xf5   :  { %v1279_v0 = vpop.f32.mrb[8].mxu0  ;;  %v224_v1 = vpack.c.bf16 %v211_v62, %v210_v59  ;;  %2580 = vst [vmem:[#allocation20_spill] sm:$0xff] %v1572_v49  ;;  %v392_v59 = vld [vmem:[%s2513_s4 + $0x8] sm:$0xff] }
  0xf6   :  { %v184_v2 = vadd.f32 %v1279_v0, %v1182_v36  ;;  %v175_v5 = vpop.f32.mrb[9].mxu0 }
  0xf7   :  { %v176_v6 = vadd.f32 %v1182_v36, %v175_v5  ;;  %v1280_v10 = vpop.f32.mrb[10].mxu0  ;;  %1305 = vmatprep.mubr.bf16.mxu1 %v224_v1  ;;  %v1581_v53 = vpop.permute.xlu0 %696 }
  0xf8   :  { %v216_v12 = vmax.f32 %v184_v2, 0.0  ;;  %v187_v13 = vadd.f32 %v1280_v10, %v1182_v36  ;;  %v178_v14 = vpop.f32.mrb[11].mxu0  ;;  %1306 = vmatmul.mubr.bf16.vlgmr.msra.gmra.mrb[0].mxu1 %v225_v63  ;;  %v1579_v52 = vpop.permute.xlu1 %648  ;;  %2583 = vst [vmem:[#allocation23_spill] sm:$0xff] %v1581_v53  ;;  %v391_v2 = vld [vmem:[%s2513_s4] sm:$0xff]  ;;  %s1365_s4 = smov 32  }
  0xf9   :  { %v214_v15 = vmax.f32 %v176_v6, 0.0  ;;  %v179_v20 = vadd.f32 %v1182_v36, %v178_v14  ;;  %2582 = vst [vmem:[#allocation22_spill] sm:$0xff] %v1579_v52 }
  0xfa   :  { %v217_v21 = vmax.f32 %v187_v13, 0.0 }
  0xfb   :  { %v215_v22 = vmax.f32 %v179_v20, 0.0  ;;  %v1588_v62 = vpop.permute.xlu0 %798 }
  0xfc   :  { %v227_v23 = vpack.c.bf16 %v217_v21, %v216_v12  ;;  %v1586_v61 = vpop.permute.xlu1 %746  ;;  %2585 = vst [vmem:[#allocation25_spill] sm:$0xff] %v1588_v62 }
  0xfd   :  { %v226_v28 = vpack.c.bf16 %v215_v22, %v214_v15  ;;  %v1283_v29 = vpop.f32.mrb[12].mxu0  ;;  %2584 = vst [vmem:[#allocation24_spill] sm:$0xff] %v1586_v61 }
  0xfe   :  { %v200_v30 = vadd.f32 %v1283_v29, %v1182_v36  ;;  %v191_v31 = vpop.f32.mrb[13].mxu0 }
  0xff   :  { %v192_v32 = vadd.f32 %v1182_v36, %v191_v31  ;;  %v1284_v33 = vpop.f32.mrb[14].mxu0  ;;  %1309 = vmatprep.mubr.bf16.mxu1 %v226_v28 }
 0x100   :  { %v220_v34 = vmax.f32 %v200_v30, 0.0  ;;  %v203_v35 = vadd.f32 %v1284_v33, %v1182_v36  ;;  %v194_v37 = vpop.f32.mrb[15].mxu0  ;;  %1310 = vmatmul.mubr.bf16.gmra.mrb[4].mxu1 %v227_v23 }
 0x101   :  { %v218_v38 = vmax.f32 %v192_v32, 0.0  ;;  %v195_v39 = vadd.f32 %v1182_v36, %v194_v37  ;;  %v396_v36 = vshrl.u32 %v395_v48, 7  ;;  %v1631_v37 = vpop.permute.xlu0 %908 }
 0x102   :  { %v221_v40 = vmax.f32 %v203_v35, 0.0  ;;  %v1629_v35 = vpop.permute.xlu1 %852  ;;  %2588 = vst [vmem:[#allocation28_spill] sm:$0xff] %v1631_v37 }
 0x103   :  { %v219_v41 = vmax.f32 %v195_v39, 0.0  ;;  %v397_v55 = vsub.s32 3, %v396_v36  ;;  %v431_v56 = vsub.s32 2, %v396_v36  ;;  %v467_v57 = vsub.s32 1, %v396_v36  ;;  %2587 = vst [vmem:[#allocation27_spill] sm:$0xff] %v1629_v35 }
 0x104   :  { %v229_v42 = vpack.c.bf16 %v221_v40, %v220_v34  ;;  %v505_v58 = vsub.s32 0, %v396_v36  ;;  %v545_v60 = vsub.s32 7, %v396_v36  ;;  %v587_v63 = vsub.s32 6, %v396_v36 }
 0x105   :  { %v228_v43 = vpack.c.bf16 %v219_v41, %v218_v38  ;;  %v1590_v0 = vrot.slane %v394_v54, %v397_v55  ;;  %v1592_v1 = vrot.slane %v393_v51, %v431_v56  ;;  %v631_v5 = vsub.s32 5, %v396_v36 }
 0x106   :  { %v677_v6 = vsub.s32 4, %v396_v36  ;;  %v1597_v10 = vrot.slane %v393_v51, %v467_v57  ;;  %v1599_v12 = vrot.slane %v393_v51, %v505_v58  ;;  %v1601_v13 = vrot.slane %v392_v59, %v397_v55 }
 0x107   :  { %1313 = vmatprep.mubr.bf16.mxu1 %v228_v43  ;;  %v1603_v14 = vrot.slane %v392_v59, %v431_v56  ;;  %v1607_v20 = vrot.slane %v392_v59, %v467_v57  ;;  %v1609_v21 = vrot.slane %v392_v59, %v545_v60  ;;  %v1611_v22 = vrot.slane %v392_v59, %v505_v58 }
 0x108   :  { %1314 = vmatmul.mubr.bf16.gmra.mrb[8].mxu1 %v229_v42  ;;  %2586 = vst [vmem:[#allocation26_spill] sm:$0xff] %v1601_v13  ;;  %v1615_v28 = vrot.slane %v392_v59, %v587_v63  ;;  %v1617_v29 = vrot.slane %v391_v2, %v545_v60  ;;  %v1619_v30 = vrot.slane %v391_v2, %v587_v63 }
 0x109   :  { %v1623_v32 = vrot.slane %v392_v59, %v631_v5  ;;  %v1625_v33 = vrot.slane %v391_v2, %v631_v5  ;;  %v1627_v34 = vrot.slane %v392_v59, %v677_v6  ;;  %v1118_v41 = vrot.slane %v391_v2, %v677_v6 }
 0x1c3   :  { %v1639_v42 = vpop.f32.mrb[16].mxu0 }
 0x1c4   :  { %v1649_v54 = vpop.f32.mrb[17].mxu0  ;;  %v1653_v55 = vmul.f32 %v1639_v42, %v1601_v13  ;;  %v464_v56 = vmul.f32 %v1639_v42, %v1590_v0  ;;  %v1671_v2 = vmul.f32 %v1639_v42, %v1603_v14  ;;  %v511_v5 = vmul.f32 %v1639_v42, %v1592_v1 }
 0x1c5   :  { %v1661_v59 = vpop.f32.mrb[18].mxu0  ;;  %v1665_v60 = vmul.f32 %v1590_v0, %v1649_v54  ;;  %v469_v63 = vmul.f32 %v1597_v10, %v1649_v54  ;;  %v433_v58 = vmul.f32 %v1592_v1, %v1649_v54  ;;  %v1681_v57 = vmul.f32 %v1607_v20, %v1649_v54 }
 0x1c6   :  { %v1675_v6 = vpop.f32.mrb[19].mxu0  ;;  %v1685_v51 = vmul.f32 %v1611_v22, %v1649_v54  ;;  %v502_v36 = vmul.f32 %v1661_v59, %v1590_v0  ;;  %v1697_v43 = vmul.f32 %v1661_v59, %v1601_v13  ;;  %v1707_v31 = vmul.f32 %v1603_v14, %v1649_v54 }
 0x1c7   :  { %2589 = vst [vmem:[#allocation29_spill] sm:$0xff] %v1665_v60  ;;  %413 = vrot.lane.b32.xlu1 %v1665_v60, %s1364_s22  ;;  %408 = vrot.lane.b32.xlu0 %v1665_v60, %s1365_s4  ;;  %v428_v48 = vmul.f32 %v1590_v0, %v1675_v6  ;;  %v470_v40 = vadd.f32 %v469_v63, %v464_v56 }
 0x1c8   :  { %v1701_v39 = vmul.f32 %v1603_v14, %v1675_v6  ;;  %v471_v38 = vmul.f32 %v1592_v1, %v1675_v6  ;;  %v507_v23 = vmul.f32 %v1599_v12, %v1649_v54  ;;  %v1715_v56 = vmul.f32 %v1607_v20, %v1675_v6 }
 0x1c9   :  { %v1711_v15 = vadd.f32 %v433_v58, %v428_v48  ;;  %v1719_v63 = vmul.f32 %v1601_v13, %v1675_v6  ;;  %v509_v27 = vmul.f32 %v1597_v10, %v1675_v6  ;;  %v1727_v26 = vmul.f32 %v1625_v33, %v1649_v54 }
 0x1ca   :  { %v1723_v37 = vadd.f32 %v471_v38, %v470_v40  ;;  %v508_v25 = vadd.f32 %v507_v23, %v502_v36  ;;  %v1731_v48 = vmul.f32 %v1619_v30, %v1675_v6  ;;  %v1741_v23 = vmul.f32 %v1639_v42, %v1617_v29 }
 0x1cb   :  { %2590 = vst [vmem:[#allocation30_spill] sm:$0xff] %v1711_v15  ;;  %v1733_v58 = vpop.f32.mrb[0].mxu1  ;;  %417 = vrot.lane.b32.xlu1 %v1665_v60, %s1366_s29  ;;  %444 = vrot.lane.b32.xlu0 %v1711_v15, %s1365_s4  ;;  %v1745_v38 = vmul.f32 %v1661_v59, %v1611_v22  ;;  %v1749_v40 = vmul.f32 %v1617_v29, %v1649_v54 }
 0x1cc   :  { %2591 = vst [vmem:[#allocation31_spill] sm:$0xff] %v1723_v37  ;;  %v1751_v36 = vpop.f32.mrb[1].mxu1  ;;  %v510_v35 = vadd.f32 %v509_v27, %v508_v25  ;;  %v1755_v24 = vmul.f32 %v1733_v58, %v1601_v13  ;;  %v1759_v62 = vmul.f32 %v1611_v22, %v1675_v6  ;;  %v1763_v19 = vmul.f32 %v1639_v42, %v1607_v20 }
 0x1cd   :  { %v1765_v61 = vpop.f32.mrb[2].mxu1  ;;  %v1769_v18 = vmul.f32 %v1607_v20, %v1751_v36  ;;  %v1773_v25 = vmul.f32 %v1661_v59, %v1603_v14  ;;  %v1777_v27 = vmul.f32 %v1601_v13, %v1751_v36  ;;  %v1780_v53 = vmul.f32 %v1118_v41, %v1649_v54 }
 0x1ce   :  { %2592 = vst [vmem:[#allocation32_spill] sm:$0xff] %v1755_v24  ;;  %v1782_v17 = vpop.f32.mrb[3].mxu1  ;;  %v1784_v52 = vadd.f32 %v511_v5, %v510_v35  ;;  %v1788_v16 = vmul.f32 %v1625_v33, %v1675_v6  ;;  %v1792_v50 = vmul.f32 %v1639_v42, %v1619_v30  ;;  %v1796_v11 = vmul.f32 %v1661_v59, %v1617_v29 }
 0x1cf   :  { %449 = vrot.lane.b32.xlu1 %v1711_v15, %s1364_s22  ;;  %453 = vrot.lane.b32.xlu0 %v1711_v15, %s1366_s29  ;;  %v1804_v35 = vmul.f32 %v1603_v14, %v1782_v17  ;;  %v1808_v33 = vmul.f32 %v1611_v22, %v1751_v36  ;;  %v1812_v41 = vmul.f32 %v1733_v58, %v1603_v14 }
 0x1d0   :  { %v1816_v5 = vmul.f32 %v1607_v20, %v1782_v17  ;;  %v1820_v49 = vmul.f32 %v1619_v30, %v1649_v54  ;;  %v1824_v9 = vmul.f32 %v1617_v29, %v1675_v6  ;;  %v1828_v47 = vmul.f32 %v1639_v42, %v1611_v22 }
 0x1d1   :  { %2593 = vst [vmem:[#allocation33_spill] sm:$0xff] %v1804_v35  ;;  %2594 = vst [vmem:[#allocation34_spill] sm:$0xff] %v1808_v33  ;;  %v1832_v8 = vmul.f32 %v1661_v59, %v1607_v20  ;;  %v1836_v46 = vmul.f32 %v1603_v14, %v1751_v36  ;;  %v1840_v30 = vmul.f32 %v1601_v13, %v1782_v17 }
 0x1d2   :  { %2595 = vst [vmem:[#allocation35_spill] sm:$0xff] %v1812_v41  ;;  %2596 = vst [vmem:[#allocation36_spill] sm:$0xff] %v1816_v5  ;;  %v1844_v29 = vmul.f32 %v1733_v58, %v1627_v34  ;;  %v1848_v22 = vmul.f32 %v1765_v61, %v1627_v34  ;;  %v1852_v20 = vmul.f32 %v1765_v61, %v1601_v13 }
 0x1d3   :  { %2597 = vst [vmem:[#allocation37_spill] sm:$0xff] %v1836_v46  ;;  %2598 = vst [vmem:[#allocation38_spill] sm:$0xff] %v1840_v30  ;;  %v542_v14 = vmul.f32 %v1590_v0, %v1751_v36  ;;  %v547_v7 = vmul.f32 %v1609_v21, %v1649_v54  ;;  %v1858_v45 = vpop.f32.mrb[4].mxu1  ;;  %482 = vrot.lane.b32.xlu1 %v1723_v37, %s1365_s4  ;;  %487 = vrot.lane.b32.xlu0 %v1723_v37, %s1364_s22 }
 0x1d4   :  { %2599 = vst [vmem:[#allocation39_spill] sm:$0xff] %v1844_v29  ;;  %2600 = vst [vmem:[#allocation40_spill] sm:$0xff] %v1848_v22  ;;  %v549_v4 = vmul.f32 %v1599_v12, %v1675_v6  ;;  %v551_v15 = vmul.f32 %v1639_v42, %v1597_v10  ;;  %v553_v44 = vmul.f32 %v1661_v59, %v1592_v1 }
 0x1d5   :  { %2601 = vst [vmem:[#allocation41_spill] sm:$0xff] %v1852_v20  ;;  %2602 = vst [vmem:[#allocation42_spill] sm:$0xff] %v1858_v45  ;;  %v824_v3 = vmul.f32 %v1858_v45, %v1590_v0  ;;  %v1874_v60 = vmul.f32 %v1858_v45, %v1599_v12  ;;  %v1876_v20 = vpop.f32.mrb[5].mxu1  ;;  %v584_v29 = vmul.f32 %v1590_v0, %v1782_v17 }
 0x1d6   :  { %2604 = vst [vmem:[#allocation44_spill] sm:$0xff] %v1876_v20  ;;  %v589_v22 = vmul.f32 %v1615_v28, %v1649_v54  ;;  %v1884_v41 = vmul.f32 %v1590_v0, %v1876_v20  ;;  %v1886_v13 = vpop.f32.mrb[6].mxu1  ;;  %v1890_v30 = vmul.f32 %v1858_v45, %v1609_v21  ;;  %v548_v5 = vadd.f32 %v547_v7, %v542_v14 }
 0x1d7   :  { %2603 = vst [vmem:[#allocation43_spill] sm:$0xff] %v1874_v60  ;;  %2606 = vst [vmem:[#allocation46_spill] sm:$0xff] %v1886_v13  ;;  %v1894_v60 = vmul.f32 %v1858_v45, %v1615_v28  ;;  %v830_v24 = vadd.f32 %v1681_v57, %v824_v3  ;;  %v878_v46 = vmul.f32 %v1886_v13, %v1590_v0  ;;  %491 = vrot.lane.b32.xlu1 %v1723_v37, %s1366_s29 }
 0x1d8   :  { %2605 = vst [vmem:[#allocation45_spill] sm:$0xff] %v1884_v41  ;;  %2607 = vst [vmem:[#allocation47_spill] sm:$0xff] %v1890_v30  ;;  %v1901_v33 = vmul.f32 %v1886_v13, %v1592_v1  ;;  %v1903_v41 = vpop.f32.mrb[7].mxu1  ;;  %v1907_v35 = vmul.f32 %v1623_v32, %v1876_v20  ;;  %v1911_v45 = vmul.f32 %v1886_v13, %v1599_v12  ;;  %522 = vrot.lane.b32.xlu0 %v1784_v52, %s1365_s4 }
 0x1d9   :  { %2608 = vst [vmem:[#allocation48_spill] sm:$0xff] %v1894_v60  ;;  %v772_v3 = vmul.f32 %v1590_v0, %v1903_v41  ;;  %v1921_v7 = vmul.f32 %v1627_v34, %v1876_v20  ;;  %v832_v57 = vadd.f32 %v1701_v39, %v830_v24  ;;  %v884_v14 = vadd.f32 %v1685_v51, %v878_v46 }
 0x1da   :  { %2609 = vst [vmem:[#allocation49_spill] sm:$0xff] %v1901_v33  ;;  %2610 = vst [vmem:[#allocation50_spill] sm:$0xff] %v1911_v45  ;;  %v1927_v33 = vmul.f32 %v1886_v13, %v1609_v21  ;;  %v1931_v60 = vmul.f32 %v1615_v28, %v1903_v41  ;;  %v550_v45 = vadd.f32 %v549_v4, %v548_v5 }
 0x1db   :  { %2611 = vst [vmem:[#allocation51_spill] sm:$0xff] %v1921_v7  ;;  %v778_v37 = vadd.f32 %v1707_v31, %v772_v3  ;;  %v590_v30 = vadd.f32 %v589_v22, %v584_v29  ;;  %v591_v20 = vmul.f32 %v1609_v21, %v1675_v6  ;;  %v1937_v7 = vadd.f32 %v1653_v55, %v832_v57  ;;  %v1315_v4 = vpop.f32.mrb[8].mxu1 }
 0x1dc   :  { %v886_v24 = vadd.f32 %v1715_v56, %v884_v14  ;;  %v1942_v46 = vmul.f32 %v1623_v32, %v1903_v41  ;;  %v593_v39 = vmul.f32 %v1639_v42, %v1599_v12  ;;  %527 = vrot.lane.b32.xlu1 %v1784_v52, %s1364_s22  ;;  %531 = vrot.lane.b32.xlu0 %v1784_v52, %s1366_s29  ;;  %v376_v22 = vpop.f32.mrb[9].mxu1 }
 0x1dd   :  { %v1947_v51 = vadd.f32 %v1719_v63, %v778_v37  ;;  %v552_v31 = vadd.f32 %v551_v15, %v550_v45  ;;  %v592_v55 = vadd.f32 %v591_v20, %v590_v30  ;;  %v1052_v5 = vmul.f32 %v1315_v4, %v1590_v0  ;;  %v1316_v15 = vpop.f32.mrb[10].mxu1 }
 0x1de   :  { %v888_v56 = vadd.f32 %v1671_v2, %v886_v24  ;;  %v1956_v29 = vmul.f32 %v1315_v4, %v1592_v1  ;;  %v595_v37 = vmul.f32 %v1661_v59, %v1597_v10  ;;  %v934_v63 = vmul.f32 %v1590_v0, %v376_v22  ;;  %v379_v14 = vpop.f32.mrb[11].mxu1 }
 0x1df   :  { %v1962_v3 = vmul.f32 %v1592_v1, %v376_v22  ;;  %v1965_v57 = vmul.f32 %v1597_v10, %v376_v22  ;;  %v1968_v45 = vmul.f32 %v1599_v12, %v376_v22  ;;  %v1058_v30 = vadd.f32 %v1727_v26, %v1052_v5 }
 0x1e0   :  { %v1971_v2 = vadd.f32 %v1697_v43, %v888_v56  ;;  %v1114_v20 = vmul.f32 %v1316_v15, %v1590_v0  ;;  %v1975_v24 = vadd.f32 %v553_v44, %v552_v31  ;;  %v940_v4 = vadd.f32 %v1749_v40, %v934_v63 }
 0x1e1   :  { %2612 = vst [vmem:[#allocation52_spill] sm:$0xff] %v1962_v3  ;;  %v992_v3 = vmul.f32 %v1590_v0, %v379_v14  ;;  %v1980_v13 = vmul.f32 %v1592_v1, %v379_v14  ;;  %v1983_v22 = vmul.f32 %v1597_v10, %v379_v14  ;;  %v1060_v43 = vadd.f32 %v1731_v48, %v1058_v30 }
 0x1e2   :  { %v1120_v56 = vadd.f32 %v1780_v53, %v1114_v20  ;;  %569 = vrot.lane.b32.xlu1 %v1975_v24, %s1364_s22  ;;  %v594_v26 = vadd.f32 %v593_v39, %v592_v55  ;;  %v628_v44 = vmul.f32 %v1733_v58, %v1590_v0  ;;  %v942_v40 = vadd.f32 %v1759_v62, %v940_v4 }
 0x1e3   :  { %v998_v31 = vadd.f32 %v1820_v49, %v992_v3  ;;  %v597_v5 = vmul.f32 %v1592_v1, %v1751_v36  ;;  %v633_v63 = vmul.f32 %v1623_v32, %v1649_v54  ;;  %v1062_v48 = vadd.f32 %v1741_v23, %v1060_v43 }
 0x1e4   :  { %v1122_v53 = vadd.f32 %v1788_v16, %v1120_v56  ;;  %v596_v15 = vadd.f32 %v595_v37, %v594_v26  ;;  %v635_v39 = vmul.f32 %v1615_v28, %v1675_v6  ;;  %v944_v55 = vadd.f32 %v1763_v19, %v942_v40  ;;  %v2613_v26 = vld [vmem:[#allocation33_spill] sm:$0xff] }
 0x1e5   :  { %v1000_v62 = vadd.f32 %v1824_v9, %v998_v31  ;;  %v634_v30 = vadd.f32 %v633_v63, %v628_v44  ;;  %v637_v49 = vmul.f32 %v1639_v42, %v1609_v21  ;;  %v1064_v3 = vadd.f32 %v1745_v38, %v1062_v48  ;;  %v2614_v44 = vld [vmem:[#allocation34_spill] sm:$0xff] }
 0x1e6   :  { %v1124_v20 = vadd.f32 %v1792_v50, %v1122_v53  ;;  %v2007_v14 = vadd.f32 %v597_v5, %v596_v15  ;;  %573 = vrot.lane.b32.xlu1 %v1975_v24, %s1366_s29  ;;  %v639_v16 = vmul.f32 %v1661_v59, %v1599_v12  ;;  %v946_v19 = vadd.f32 %v1773_v25, %v944_v55  ;;  %v2615_v5 = vld [vmem:[#allocation37_spill] sm:$0xff]  ;;  %v2616_v53 = vld [vmem:[#allocation32_spill] sm:$0xff] }
 0x1e7   :  { %v1002_v9 = vadd.f32 %v1828_v47, %v1000_v62  ;;  %v636_v23 = vadd.f32 %v635_v39, %v634_v30  ;;  %v641_v37 = vmul.f32 %v1597_v10, %v1751_v36  ;;  %v1066_v38 = vadd.f32 %v1769_v18, %v1064_v3  ;;  %v2617_v39 = vld [vmem:[#allocation36_spill] sm:$0xff] }
 0x1e8   :  { %v1126_v50 = vadd.f32 %v1796_v11, %v1124_v20  ;;  %613 = vrot.lane.b32.xlu0 %v2007_v14, %s1364_s22  ;;  %v674_v4 = vmul.f32 %v1765_v61, %v1590_v0  ;;  %v679_v43 = vmul.f32 %v1627_v34, %v1649_v54  ;;  %v2026_v25 = vadd.f32 %v1777_v27, %v946_v19  ;;  %v2619_v19 = vld [vmem:[#allocation26_spill] sm:$0xff] }
 0x1e9   :  { %v1004_v47 = vadd.f32 %v1832_v8, %v1002_v9  ;;  %v638_v56 = vadd.f32 %v637_v49, %v636_v23  ;;  %v643_v18 = vmul.f32 %v1592_v1, %v1782_v17  ;;  %v1068_v11 = vadd.f32 %v2613_v26, %v1066_v38  ;;  %v2618_v49 = vld [vmem:[#allocation38_spill] sm:$0xff]  ;;  %v2620_v23 = vld [vmem:[#allocation35_spill] sm:$0xff] }
 0x1ea   :  { %v1128_v40 = vadd.f32 %v2614_v44, %v1126_v50  ;;  %v680_v31 = vadd.f32 %v679_v43, %v674_v4  ;;  %v681_v0 = vmul.f32 %v1623_v32, %v1675_v6  ;;  %v683_v27 = vmul.f32 %v1639_v42, %v1615_v28  ;;  %v2621_v50 = vld [vmem:[#allocation40_spill] sm:$0xff] }
 0x1eb   :  { %v1006_v63 = vadd.f32 %v2615_v5, %v1004_v47  ;;  %v640_v48 = vadd.f32 %v639_v16, %v638_v56  ;;  %v685_v8 = vmul.f32 %v1661_v59, %v1609_v21  ;;  %v1070_v15 = vadd.f32 %v2616_v53, %v1068_v11  ;;  %v2622_v56 = vld [vmem:[#allocation39_spill] sm:$0xff] }
 0x1ec   :  { %v1130_v55 = vadd.f32 %v2617_v39, %v1128_v40  ;;  %617 = vrot.lane.b32.xlu0 %v2007_v14, %s1366_s29  ;;  %v682_v62 = vadd.f32 %v681_v0, %v680_v31  ;;  %v687_v30 = vmul.f32 %v1599_v12, %v1751_v36  ;;  %v689_v16 = vmul.f32 %v1597_v10, %v1782_v17  ;;  %v2624_v31 = vld [vmem:[#allocation41_spill] sm:$0xff]  ;;  %v2625_v53 = vld [vmem:[#allocation51_spill] sm:$0xff] }
 0x1ed   :  { %v1008_v3 = vadd.f32 %v2618_v49, %v1006_v63  ;;  %v642_v20 = vadd.f32 %v641_v37, %v640_v48  ;;  %v727_v9 = vmul.f32 %v2619_v19, %v1649_v54  ;;  %v1072_v4 = vadd.f32 %v2621_v50, %v1070_v15  ;;  %v2623_v37 = vld [vmem:[#allocation45_spill] sm:$0xff] }
 0x1ee   :  { %v1132_v38 = vadd.f32 %v2620_v23, %v1130_v55  ;;  %v684_v43 = vadd.f32 %v683_v27, %v682_v62  ;;  %v691_v47 = vmul.f32 %v1733_v58, %v1592_v1  ;;  %v729_v40 = vmul.f32 %v1627_v34, %v1675_v6 }
 0x1ef   :  { %v2056_v26 = vadd.f32 %v2622_v56, %v1008_v3  ;;  %v2058_v11 = vadd.f32 %v643_v18, %v642_v20  ;;  %v728_v44 = vadd.f32 %v727_v9, %v2623_v37  ;;  %v1074_v54 = vadd.f32 %v1907_v35, %v1072_v4  ;;  %v2626_v20 = vld [vmem:[#allocation47_spill] sm:$0xff]  ;;  %v2627_v4 = vld [vmem:[#allocation50_spill] sm:$0xff]  ;;  %v2628_v56 = vld [vmem:[#allocation48_spill] sm:$0xff] }
 0x1f0   :  { %v1134_v0 = vadd.f32 %v2624_v31, %v1132_v38  ;;  %v686_v5 = vadd.f32 %v685_v8, %v684_v43  ;;  %v731_v63 = vmul.f32 %v1639_v42, %v1623_v32  ;;  %v733_v18 = vmul.f32 %v1661_v59, %v1615_v28 }
 0x1f1   :  { %659 = vrot.lane.b32.xlu1 %v2058_v11, %s1364_s22  ;;  %v730_v48 = vadd.f32 %v729_v40, %v728_v44  ;;  %v735_v27 = vmul.f32 %v1609_v21, %v1751_v36  ;;  %v737_v6 = vmul.f32 %v1599_v12, %v1782_v17  ;;  %v1076_v35 = vadd.f32 %v1931_v60, %v1074_v54  ;;  %v2629_v54 = vld [vmem:[#allocation44_spill] sm:$0xff] }
 0x1f2   :  { %v1136_v8 = vadd.f32 %v2625_v53, %v1134_v0  ;;  %v688_v15 = vadd.f32 %v687_v30, %v686_v5  ;;  %v739_v39 = vmul.f32 %v1733_v58, %v1597_v10  ;;  %v741_v62 = vmul.f32 %v1765_v61, %v1592_v1 }
 0x1f3   :  { %v732_v55 = vadd.f32 %v731_v63, %v730_v48  ;;  %v781_v49 = vmul.f32 %v1639_v42, %v1627_v34  ;;  %v783_v3 = vmul.f32 %v1661_v59, %v1623_v32  ;;  %v1078_v19 = vadd.f32 %v2626_v20, %v1076_v35 }
 0x1f4   :  { %v1138_v60 = vadd.f32 %v1942_v46, %v1136_v8  ;;  %v690_v9 = vadd.f32 %v689_v16, %v688_v15  ;;  %v785_v30 = vmul.f32 %v1615_v28, %v1751_v36  ;;  %v787_v42 = vmul.f32 %v1609_v21, %v1782_v17 }
 0x1f5   :  { %663 = vrot.lane.b32.xlu1 %v2058_v11, %s1366_s29  ;;  %v734_v23 = vadd.f32 %v733_v18, %v732_v55  ;;  %v782_v38 = vadd.f32 %v781_v49, %v1947_v51  ;;  %v789_v50 = vmul.f32 %v1733_v58, %v1599_v12  ;;  %v1080_v43 = vadd.f32 %v2627_v4, %v1078_v19 }
 0x1f6   :  { %v1140_v46 = vadd.f32 %v2628_v56, %v1138_v60  ;;  %v2098_v16 = vadd.f32 %v691_v47, %v690_v9  ;;  %v791_v37 = vmul.f32 %v1765_v61, %v1597_v10  ;;  %v793_v51 = vmul.f32 %v1592_v1, %v2629_v54 }
 0x1f7   :  { %v736_v44 = vadd.f32 %v735_v27, %v734_v23  ;;  %v784_v40 = vadd.f32 %v783_v3, %v782_v38  ;;  %v835_v31 = vmul.f32 %v1661_v59, %v1627_v34  ;;  %v1082_v0 = vadd.f32 %v1965_v57, %v1080_v43 }
 0x1f8   :  { %v1142_v5 = vadd.f32 %v1927_v33, %v1140_v46  ;;  %707 = vrot.lane.b32.xlu0 %v2098_v16, %s1364_s22  ;;  %v837_v47 = vmul.f32 %v1623_v32, %v1751_v36  ;;  %v839_v63 = vmul.f32 %v1615_v28, %v1782_v17  ;;  %v841_v59 = vmul.f32 %v1733_v58, %v1609_v21 }
 0x1f9   :  { %v738_v48 = vadd.f32 %v737_v6, %v736_v44  ;;  %v786_v18 = vadd.f32 %v785_v30, %v784_v40  ;;  %v836_v27 = vadd.f32 %v835_v31, %v1937_v7  ;;  %v2118_v57 = vadd.f32 %v1980_v13, %v1082_v0  ;;  %v2632_v31 = vld [vmem:[#allocation2_spill] sm:$0xff] }
 0x1fa   :  { %v1144_v33 = vadd.f32 %v1968_v45, %v1142_v5  ;;  %v843_v35 = vmul.f32 %v1765_v61, %v1599_v12  ;;  %v845_v53 = vmul.f32 %v1597_v10, %v2629_v54  ;;  %v891_v7 = vmul.f32 %v1627_v34, %v1751_v36 }
 0x1fb   :  { %v740_v8 = vadd.f32 %v739_v39, %v738_v48  ;;  %v788_v15 = vadd.f32 %v787_v42, %v786_v18  ;;  %v838_v6 = vadd.f32 %v837_v47, %v836_v27  ;;  %v847_v13 = vmul.f32 %v1592_v1, %v1903_v41  ;;  %v2639_v47 = vld [vmem:[#allocation31_spill] sm:$0xff]  ;;  %v2641_v48 = vld [vmem:[#allocation18_spill] sm:$0xff] }
 0x1fc   :  { %v1146_v55 = vadd.f32 %v1983_v22, %v1144_v33  ;;  %711 = vrot.lane.b32.xlu0 %v2098_v16, %s1366_s29  ;;  %v893_v45 = vmul.f32 %v1623_v32, %v1782_v17  ;;  %v895_v49 = vmul.f32 %v1733_v58, %v1615_v28  ;;  %v892_v36 = vadd.f32 %v891_v7, %v1971_v2  ;;  %v2646_v7 = vld [vmem:[#allocation6_spill] sm:$0xff] }
 0x1fd   :  { %v2136_v39 = vadd.f32 %v741_v62, %v740_v8  ;;  %v790_v3 = vadd.f32 %v789_v50, %v788_v15  ;;  %v840_v20 = vadd.f32 %v839_v63, %v838_v6  ;;  %v897_v19 = vmul.f32 %v1765_v61, %v1609_v21  ;;  %v2640_v63 = vld [vmem:[#allocation4_spill] sm:$0xff] }
 0x1fe   :  { %v2140_v22 = vadd.f32 %v1956_v29, %v1146_v55  ;;  %v899_v60 = vmul.f32 %v1599_v12, %v2629_v54  ;;  %v901_v9 = vmul.f32 %v1597_v10, %v1903_v41  ;;  %v894_v23 = vadd.f32 %v893_v45, %v892_v36  ;;  %v2630_v29 = vld [vmem:[#allocation42_spill] sm:$0xff]  ;;  %v2647_v55 = vld [vmem:[#allocation20_spill] sm:$0xff] }
 0x1ff   :  { %757 = vrot.lane.b32.xlu1 %v2136_v39, %s1364_s22  ;;  %v792_v62 = vadd.f32 %v791_v37, %v790_v3  ;;  %v842_v30 = vadd.f32 %v841_v59, %v840_v20  ;;  %v949_v2 = vmul.f32 %v1627_v34, %v1782_v17  ;;  %v903_v38 = vmul.f32 %v2630_v29, %v1592_v1  ;;  %v2649_v3 = vld [vmem:[#allocation7_spill] sm:$0xff]  ;;  %v2650_v20 = vld [vmem:[#allocation21_spill] sm:$0xff] }
 0x200   :  { %v951_v42 = vmul.f32 %v1733_v58, %v1623_v32  ;;  %v953_v50 = vmul.f32 %v1765_v61, %v1615_v28  ;;  %v955_v4 = vmul.f32 %v1609_v21, %v2629_v54  ;;  %v896_v46 = vadd.f32 %v895_v49, %v894_v23 }
 0x201   :  { %v2160_v43 = vadd.f32 %v793_v51, %v792_v62  ;;  %v844_v56 = vadd.f32 %v843_v35, %v842_v30  ;;  %v950_v37 = vadd.f32 %v949_v2, %v2026_v25  ;;  %v957_v17 = vmul.f32 %v1599_v12, %v1903_v41  ;;  %v2631_v51 = vld [vmem:[#allocation29_spill] sm:$0xff] }
 0x202   :  { %v1011_v1 = vmul.f32 %v1765_v61, %v1623_v32  ;;  %v1013_v34 = vmul.f32 %v1615_v28, %v2629_v54  ;;  %v1015_v58 = vmul.f32 %v1609_v21, %v1903_v41  ;;  %v898_v25 = vadd.f32 %v897_v19, %v896_v46  ;;  %v2633_v61 = vld [vmem:[#allocation16_spill] sm:$0xff]  ;;  %v2635_v28 = vld [vmem:[#allocation30_spill] sm:$0xff]  ;;  %v2636_v54 = vld [vmem:[#allocation3_spill] sm:$0xff]  ;;  %v2227_v46 = vpop.permute.xlu1 %966 }
 0x203   :  { %809 = vrot.lane.b32.xlu0 %v2160_v43, %s1364_s22  ;;  %761 = vrot.lane.b32.xlu1 %v2136_v39, %s1366_s29  ;;  %v846_v44 = vadd.f32 %v845_v53, %v844_v56  ;;  %v952_v40 = vadd.f32 %v951_v42, %v950_v37  ;;  %v2634_v32 = vsub.f32 %v2632_v31, %v2633_v61  ;;  %v2637_v21 = vld [vmem:[#allocation17_spill] sm:$0xff]  ;;  %v2644_v53 = vld [vmem:[#allocation19_spill] sm:$0xff]  ;;  %v2652_v19 = vld [vmem:[#allocation8_spill] sm:$0xff] }
 0x204   :  { %v1012_v12 = vadd.f32 %v1011_v1, %v2056_v26  ;;  %v2638_v41 = vsub.f32 %v2636_v54, %v2637_v21  ;;  %v2642_v18 = vsub.f32 %v2640_v63, %v2641_v48  ;;  %v900_v26 = vadd.f32 %v899_v60, %v898_v25  ;;  %v2643_v35 = vld [vmem:[#allocation5_spill] sm:$0xff]  ;;  %v2653_v60 = vld [vmem:[#allocation22_spill] sm:$0xff]  ;;  %v2656_v42 = vld [vmem:[#allocation23_spill] sm:$0xff]  ;;  %v2246_v54 = vpop.permute.xlu0 %1026 }
 0x205   :  { %v2180_v0 = vadd.f32 %v2634_v32, %v2631_v51  ;;  %v848_v59 = vadd.f32 %v847_v13, %v846_v44  ;;  %v954_v33 = vadd.f32 %v953_v50, %v952_v40  ;;  %v2645_v8 = vsub.f32 %v2643_v35, %v2644_v53  ;;  %v2655_v2 = vld [vmem:[#allocation9_spill] sm:$0xff]  ;;  %v2658_v1 = vld [vmem:[#allocation10_spill] sm:$0xff]  ;;  %v2661_v40 = vld [vmem:[#allocation11_spill] sm:$0xff] }
 0x206   :  { %v2186_v5 = vadd.f32 %v2638_v41, %v2635_v28  ;;  %v2192_v27 = vadd.f32 %v2642_v18, %v2639_v47  ;;  %v1014_v6 = vadd.f32 %v1013_v34, %v1012_v12  ;;  %v2648_v45 = vsub.f32 %v2646_v7, %v2647_v55  ;;  %v2659_v34 = vld [vmem:[#allocation24_spill] sm:$0xff]  ;;  %v2662_v12 = vld [vmem:[#allocation25_spill] sm:$0xff]  ;;  %v2665_v31 = vld [vmem:[#allocation27_spill] sm:$0xff] }
 0x207   :  { %v2198_v15 = vadd.f32 %v2645_v8, %v1784_v52  ;;  %v2651_v36 = vsub.f32 %v2649_v3, %v2650_v20  ;;  %v2654_v62 = vsub.f32 %v2652_v19, %v2653_v60  ;;  %813 = vrot.lane.b32.xlu0 %v2160_v43, %s1366_s29  ;;  %863 = vrot.lane.b32.xlu1 %v848_v59, %s1364_s22  ;;  %v2664_v51 = vld [vmem:[#allocation12_spill] sm:$0xff]  ;;  %v2667_v63 = vld [vmem:[#allocation46_spill] sm:$0xff]  ;;  %v2670_v7 = vld [vmem:[#allocation13_spill] sm:$0xff] }
 0x208   :  { %v2204_v49 = vadd.f32 %v2648_v45, %v1975_v24  ;;  %v902_v52 = vadd.f32 %v901_v9, %v900_v26  ;;  %v956_v23 = vadd.f32 %v955_v4, %v954_v33  ;;  %v2657_v50 = vsub.f32 %v2655_v2, %v2656_v42  ;;  %v2668_v26 = vld [vmem:[#allocation43_spill] sm:$0xff]  ;;  %v2669_v35 = vld [vmem:[#allocation14_spill] sm:$0xff]  ;;  %v2671_v45 = vld [vmem:[#allocation28_spill] sm:$0xff] }
 0x209   :  { %v2210_v13 = vadd.f32 %v2651_v36, %v2007_v14  ;;  %v2216_v30 = vadd.f32 %v2654_v62, %v2058_v11  ;;  %v1016_v37 = vadd.f32 %v1015_v58, %v1014_v6  ;;  %v2660_v44 = vsub.f32 %v2658_v1, %v2659_v34  ;;  %v2675_v62 = vld [vmem:[#allocation52_spill] sm:$0xff] }
 0x20a   :  { %v2225_v56 = vadd.f32 %v2657_v50, %v2098_v16  ;;  %v2663_v9 = vsub.f32 %v2661_v40, %v2662_v12  ;;  %v2666_v32 = vsub.f32 %v2664_v51, %v2665_v31  ;;  %v904_v58 = vadd.f32 %v903_v38, %v902_v52 }
 0x20b   :  { %v2233_v25 = vadd.f32 %v2660_v44, %v2136_v39  ;;  %v958_v41 = vadd.f32 %v957_v17, %v956_v23  ;;  %v959_v47 = vmul.f32 %v2630_v29, %v1597_v10  ;;  %v1019_v18 = vmul.f32 %v2667_v63, %v1597_v10  ;;  %867 = vrot.lane.b32.xlu1 %v848_v59, %s1366_s29  ;;  %v2673_v29 = vld [vmem:[#allocation15_spill] sm:$0xff]  ;;  %v2674_v10 = vld [vmem:[#allocation49_spill] sm:$0xff] }
 0x20c   :  { %v2239_v4 = vadd.f32 %v2663_v9, %v2160_v43  ;;  %v2244_v28 = vadd.f32 %v2666_v32, %v848_v59  ;;  %v1018_v33 = vadd.f32 %v2668_v26, %v1016_v37  ;;  %v969_v8 = vsub.f32 %v2669_v35, %v2227_v46  ;;  %919 = vrot.lane.b32.xlu0 %v904_v58, %s1364_s22  ;;  %v1349_v9 = vld [vmem:[%s2510_s0 + $0x8] sm:$0xff] }
 0x20d   :  { %v960_v6 = vadd.f32 %v959_v47, %v958_v41  ;;  %v2672_v38 = vsub.f32 %v2670_v7, %v2671_v45  ;;  %v1029_v3 = vsub.f32 %v2673_v29, %v2246_v54  ;;  %v448_v51 = vadd.f32 %v1349_v9, %v2637_v21 }
 0x20e   :  { %v1020_v36 = vadd.f32 %v1019_v18, %v1018_v33  ;;  %v1350_v18 = vld [vmem:[%s2510_s0 + $0x10] sm:$0xff] }
 0x20f   :  { %v2260_v17 = vadd.f32 %v2672_v38, %v904_v58  ;;  %v962_v19 = vadd.f32 %v2674_v10, %v960_v6  ;;  %v486_v26 = vadd.f32 %v1350_v18, %v2641_v48  ;;  %v1351_v38 = vld [vmem:[%s2510_s0 + $0x18] sm:$0xff] }
 0x210   :  { %v1022_v52 = vadd.f32 %v2675_v62, %v1020_v36  ;;  %923 = vrot.lane.b32.xlu0 %v904_v58, %s1366_s29  ;;  %v526_v29 = vadd.f32 %v1351_v38, %v2644_v53  ;;  %v1352_v62 = vld [vmem:[%s2510_s0 + $0x20] sm:$0xff]  ;;  %v1353_v53 = vld [vmem:[%s2510_s0 + $0x28] sm:$0xff] }
 0x211   :  { %977 = vrot.lane.b32.xlu1 %v962_v19, %s1364_s22  ;;  %v2268_v23 = vadd.f32 %v969_v8, %v962_v19 }
 0x212   :  { %v2270_v2 = vadd.f32 %v1029_v3, %v1022_v52 }
 0x214   :  { %1037 = vrot.lane.b32.xlu0 %v1022_v52, %s1364_s22 }
 0x215   :  { %981 = vrot.lane.b32.xlu1 %v962_v19, %s1366_s29 }
 0x218   :  { %1041 = vrot.lane.b32.xlu0 %v1022_v52, %s1366_s29 }
 0x219   :  { %1099 = vrot.lane.b32.xlu1 %v2118_v57, %s1364_s22 }
 0x21c   :  { %1163 = vrot.lane.b32.xlu0 %v2140_v22, %s1364_s22 }
 0x21d   :  { %1103 = vrot.lane.b32.xlu1 %v2118_v57, %s1366_s29 }
 0x220   :  { %1167 = vrot.lane.b32.xlu0 %v2140_v22, %s1366_s29 }
 0x221   :  { %564 = vrot.lane.b32.xlu1 %v1975_v24, %s1365_s4  ;;  %v2301_v24 = vpop.permute.xlu1 %1088 }
 0x224   :  { %608 = vrot.lane.b32.xlu0 %v2007_v14, %s1365_s4  ;;  %v2303_v14 = vpop.permute.xlu0 %1152 }
 0x225   :  { %654 = vrot.lane.b32.xlu1 %v2058_v11, %s1365_s4 }
 0x228   :  { %702 = vrot.lane.b32.xlu0 %v2098_v16, %s1365_s4 }
 0x229   :  { %752 = vrot.lane.b32.xlu1 %v2136_v39, %s1365_s4  ;;  %v1348_v39 = vld [vmem:[%s2510_s0] sm:$0xff] }
 0x22c   :  { %804 = vrot.lane.b32.xlu0 %v2160_v43, %s1365_s4  ;;  %v412_v43 = vadd.f32 %v1348_v39, %v2633_v61 }
 0x22d   :  { %858 = vrot.lane.b32.xlu1 %v848_v59, %s1365_s4 }
 0x230   :  { %914 = vrot.lane.b32.xlu0 %v904_v58, %s1365_s4 }
 0x231   :  { %972 = vrot.lane.b32.xlu1 %v962_v19, %s1365_s4 }
 0x234   :  { %1032 = vrot.lane.b32.xlu0 %v1022_v52, %s1365_s4  ;;  %v568_v52 = vadd.f32 %v1352_v62, %v2647_v55  ;;  %v1354_v55 = vld [vmem:[%s2510_s0 + $0x30] sm:$0xff] }
 0x235   :  { %1094 = vrot.lane.b32.xlu1 %v2118_v57, %s1365_s4 }
 0x238   :  { %1158 = vrot.lane.b32.xlu0 %v2140_v22, %s1365_s4 }
 0x239   :  { %v414_v11 = vpop.permute.xlu1 %413  ;;  %v2307_v16 = vpop.permute.xlu0 %408 }
 0x23a   :  { %v411_v59 = vsub.f32 %v2180_v0, %v2307_v16  ;;  %v416_v50 = vadd.f32 %v414_v11, %v412_v43 }
 0x23d   :  { %v418_v37 = vpop.permute.xlu1 %417  ;;  %v2315_v1 = vpop.permute.xlu0 %444 }
 0x23e   :  { %v420_v44 = vadd.f32 %v418_v37, %v416_v50  ;;  %v447_v40 = vsub.f32 %v2186_v5, %v2315_v1  ;;  %v612_v37 = vadd.f32 %v1353_v53, %v2650_v20  ;;  %v1355_v20 = vld [vmem:[%s2510_s0 + $0x38] sm:$0xff] }
 0x240   :  { %422 = vrot.lane.b32.xlu0 %v420_v44, %s1365_s4 }
 0x241   :  { %v450_v61 = vpop.permute.xlu1 %449  ;;  %v454_v32 = vpop.permute.xlu0 %453 }
 0x242   :  { %v452_v58 = vadd.f32 %v450_v61, %v448_v51 }
 0x244   :  { %v456_v41 = vadd.f32 %v454_v32, %v452_v58  ;;  %v658_v32 = vadd.f32 %v1354_v55, %v2653_v60  ;;  %v1356_v60 = vld [vmem:[%s2510_s0 + $0x40] sm:$0xff] }
 0x245   :  { %v2324_v47 = vpop.permute.xlu1 %482  ;;  %v488_v63 = vpop.permute.xlu0 %487 }
 0x246   :  { %v485_v33 = vsub.f32 %v2192_v27, %v2324_v47  ;;  %458 = vrot.lane.b32.xlu1 %v456_v41, %s1365_s4  ;;  %v490_v21 = vadd.f32 %v488_v63, %v486_v26  ;;  %v706_v26 = vadd.f32 %v1355_v20, %v2656_v42 }
 0x249   :  { %v492_v35 = vpop.permute.xlu1 %491 }
 0x24a   :  { %v2333_v8 = vpop.permute.xlu0 %522  ;;  %v494_v6 = vadd.f32 %v492_v35, %v490_v21 }
 0x24b   :  { %v525_v7 = vsub.f32 %v2198_v15, %v2333_v8 }
 0x24c   :  { %496 = vrot.lane.b32.xlu0 %v494_v6, %s1365_s4 }
 0x24e   :  { %v528_v48 = vpop.permute.xlu1 %527  ;;  %v532_v36 = vpop.permute.xlu0 %531 }
 0x24f   :  { %v530_v3 = vadd.f32 %v528_v48, %v526_v29  ;;  %v756_v29 = vadd.f32 %v1356_v60, %v2659_v34 }
 0x251   :  { %v534_v10 = vadd.f32 %v532_v36, %v530_v3 }
 0x253   :  { %536 = vrot.lane.b32.xlu1 %v534_v10, %s1365_s4  ;;  %v1357_v10 = vld [vmem:[%s2510_s0 + $0x48] sm:$0xff] }
 0x254   :  { %v570_v19 = vpop.permute.xlu1 %569  ;;  %v808_v42 = vadd.f32 %v1357_v10, %v2662_v12  ;;  %v1359_v12 = vld [vmem:[%s2510_s0 + $0x58] sm:$0xff] }
 0x255   :  { %v572_v11 = vadd.f32 %v570_v19, %v568_v52 }
 0x258   :  { %v574_v39 = vpop.permute.xlu1 %573 }
 0x259   :  { %v576_v43 = vadd.f32 %v574_v39, %v572_v11  ;;  %v1358_v39 = vld [vmem:[%s2510_s0 + $0x50] sm:$0xff] }
 0x25a   :  { %v614_v50 = vpop.permute.xlu0 %613  ;;  %v862_v34 = vadd.f32 %v1358_v39, %v2665_v31  ;;  %v1360_v31 = vld [vmem:[%s2510_s0 + $0x60] sm:$0xff] }
 0x25b   :  { %578 = vrot.lane.b32.xlu0 %v576_v43, %s1365_s4  ;;  %v616_v44 = vadd.f32 %v614_v50, %v612_v37 }
 0x25e   :  { %v618_v9 = vpop.permute.xlu0 %617 }
 0x25f   :  { %v620_v51 = vadd.f32 %v618_v9, %v616_v44  ;;  %v918_v44 = vadd.f32 %v1359_v12, %v2671_v45  ;;  %v1361_v45 = vld [vmem:[%s2510_s0 + $0x68] sm:$0xff] }
 0x260   :  { %v1036_v20 = vadd.f32 %v1361_v45, %v2246_v54  ;;  %v1363_v54 = vld [vmem:[%s2510_s0 + $0x78] sm:$0xff] }
 0x261   :  { %622 = vrot.lane.b32.xlu1 %v620_v51, %s1365_s4 }
 0x263   :  { %v660_v61 = vpop.permute.xlu1 %659 }
 0x264   :  { %v662_v58 = vadd.f32 %v660_v61, %v658_v32  ;;  %v976_v32 = vadd.f32 %v1360_v31, %v2227_v46  ;;  %v1362_v46 = vld [vmem:[%s2510_s0 + $0x70] sm:$0xff] }
 0x267   :  { %v664_v41 = vpop.permute.xlu1 %663 }
 0x268   :  { %v666_v63 = vadd.f32 %v664_v41, %v662_v58 }
 0x26a   :  { %v708_v18 = vpop.permute.xlu0 %707  ;;  %668 = vrot.lane.b32.xlu0 %v666_v63, %s1365_s4 }
 0x26b   :  { %v710_v21 = vadd.f32 %v708_v18, %v706_v26 }
 0x26e   :  { %v712_v35 = vpop.permute.xlu0 %711 }
 0x26f   :  { %v714_v6 = vadd.f32 %v712_v35, %v710_v21 }
 0x271   :  { %716 = vrot.lane.b32.xlu1 %v714_v6, %s1365_s4  ;;  %v758_v38 = vpop.permute.xlu1 %757 }
 0x272   :  { %v760_v48 = vadd.f32 %v758_v38, %v756_v29  ;;  %v1098_v38 = vadd.f32 %v1362_v46, %v2301_v24 }
 0x275   :  { %v810_v3 = vpop.permute.xlu0 %809  ;;  %v762_v36 = vpop.permute.xlu1 %761 }
 0x276   :  { %v764_v19 = vadd.f32 %v762_v36, %v760_v48  ;;  %v812_v62 = vadd.f32 %v810_v3, %v808_v42  ;;  %v1162_v36 = vadd.f32 %v1363_v54, %v2303_v14 }
 0x278   :  { %766 = vrot.lane.b32.xlu0 %v764_v19, %s1365_s4 }
 0x279   :  { %v814_v52 = vpop.permute.xlu0 %813  ;;  %v864_v11 = vpop.permute.xlu1 %863 }
 0x27a   :  { %v816_v43 = vadd.f32 %v814_v52, %v812_v62  ;;  %v866_v50 = vadd.f32 %v864_v11, %v862_v34 }
 0x27c   :  { %818 = vrot.lane.b32.xlu1 %v816_v43, %s1365_s4 }
 0x27d   :  { %v868_v37 = vpop.permute.xlu1 %867 }
 0x27e   :  { %v920_v53 = vpop.permute.xlu0 %919  ;;  %v870_v9 = vadd.f32 %v868_v37, %v866_v50 }
 0x27f   :  { %v922_v51 = vadd.f32 %v920_v53, %v918_v44 }
 0x280   :  { %872 = vrot.lane.b32.xlu0 %v870_v9, %s1365_s4  ;;  %v1091_v9 = vsub.f32 %v1362_v46, %v2301_v24 }
 0x282   :  { %v924_v61 = vpop.permute.xlu0 %923 }
 0x283   :  { %v978_v55 = vpop.permute.xlu1 %977  ;;  %v926_v58 = vadd.f32 %v924_v61, %v922_v51 }
 0x284   :  { %v980_v41 = vadd.f32 %v978_v55, %v976_v32  ;;  %v1155_v32 = vsub.f32 %v1363_v54, %v2303_v14 }
 0x285   :  { %928 = vrot.lane.b32.xlu1 %v926_v58, %s1365_s4  ;;  %v1092_v58 = vadd.f32 %v1091_v9, %v2118_v57 }
 0x286   :  { %v1038_v63 = vpop.permute.xlu0 %1037 }
 0x287   :  { %v982_v18 = vpop.permute.xlu1 %981  ;;  %v1040_v21 = vadd.f32 %v1038_v63, %v1036_v20 }
 0x288   :  { %v984_v26 = vadd.f32 %v982_v18, %v980_v41 }
 0x28a   :  { %986 = vrot.lane.b32.xlu0 %v984_v26, %s1365_s4  ;;  %v1042_v35 = vpop.permute.xlu0 %1041 }
 0x28b   :  { %v1100_v6 = vpop.permute.xlu1 %1099  ;;  %v1044_v60 = vadd.f32 %v1042_v35, %v1040_v21 }
 0x28c   :  { %v1102_v29 = vadd.f32 %v1100_v6, %v1098_v38 }
 0x28d   :  { %1046 = vrot.lane.b32.xlu1 %v1044_v60, %s1365_s4 }
 0x28e   :  { %v1164_v48 = vpop.permute.xlu0 %1163 }
 0x28f   :  { %v1104_v3 = vpop.permute.xlu1 %1103  ;;  %v1166_v42 = vadd.f32 %v1164_v48, %v1162_v36 }
 0x290   :  { %v1106_v10 = vadd.f32 %v1104_v3, %v1102_v29 }
 0x292   :  { %1108 = vrot.lane.b32.xlu0 %v1106_v10, %s1365_s4  ;;  %v1168_v19 = vpop.permute.xlu0 %1167 }
 0x293   :  { %v565_v62 = vpop.permute.xlu1 %564  ;;  %v1170_v52 = vadd.f32 %v1168_v19, %v1166_v42 }
 0x294   :  { %v567_v27 = vsub.f32 %v2204_v49, %v565_v62 }
 0x295   :  { %1172 = vrot.lane.b32.xlu1 %v1170_v52, %s1365_s4 }
 0x296   :  { %v609_v11 = vpop.permute.xlu0 %608 }
 0x297   :  { %v655_v39 = vpop.permute.xlu1 %654 }
 0x298   :  { %v657_v49 = vsub.f32 %v2216_v30, %v655_v39 }
 0x29a   :  { %v703_v34 = vpop.permute.xlu0 %702 }
 0x29b   :  { %v753_v43 = vpop.permute.xlu1 %752  ;;  %v705_v50 = vsub.f32 %v2225_v56, %v703_v34 }
 0x29c   :  { %v755_v8 = vsub.f32 %v2233_v25, %v753_v43 }
 0x29e   :  { %v805_v53 = vpop.permute.xlu0 %804 }
 0x29f   :  { %v859_v37 = vpop.permute.xlu1 %858  ;;  %v807_v12 = vsub.f32 %v2239_v4, %v805_v53  ;;  %v1156_v4 = vadd.f32 %v1155_v32, %v2140_v22 }
 0x2a0   :  { %v861_v44 = vsub.f32 %v2244_v28, %v859_v37 }
 0x2a2   :  { %v915_v51 = vpop.permute.xlu0 %914 }
 0x2a3   :  { %v973_v61 = vpop.permute.xlu1 %972  ;;  %v917_v55 = vsub.f32 %v2260_v17, %v915_v51 }
 0x2a4   :  { %v975_v31 = vsub.f32 %v2268_v23, %v973_v61 }
 0x2a6   :  { %v1033_v41 = vpop.permute.xlu0 %1032 }
 0x2a7   :  { %v1095_v56 = vpop.permute.xlu1 %1094  ;;  %v1035_v63 = vsub.f32 %v2270_v2, %v1033_v41 }
 0x2a8   :  { %v1097_v18 = vsub.f32 %v1092_v58, %v1095_v56 }
 0x2aa   :  { %v1159_v28 = vpop.permute.xlu0 %1158 }
 0x2ab   :  { %v1161_v45 = vsub.f32 %v1156_v4, %v1159_v28 }
 0x2b2   :  { %v423_v24 = vpop.permute.xlu0 %422 }
 0x2b3   :  { %v426_v17 = vsel %vm425_vm1, %v411_v59, %v423_v24  ;;  %v611_v59 = vsub.f32 %v2210_v13, %v609_v11 }
 0x2b4   :  { %427 = vst.msk [vmem:[%s2514_s5] sm:$0xff] %vm84_vm0, %v426_v17 }
 0x2b8   :  { %v459_v57 = vpop.permute.xlu1 %458 }
 0x2b9   :  { %v461_v22 = vsel %vm425_vm1, %v447_v40, %v459_v57 }
 0x2ba   :  { %1204 = vst.msk [vmem:[%s2514_s5 + $0x8] sm:$0xff] %vm84_vm0, %v461_v22 }
 0x2be   :  { %v497_v23 = vpop.permute.xlu0 %496 }
 0x2bf   :  { %v499_v0 = vsel %vm425_vm1, %v485_v33, %v497_v23 }
 0x2c0   :  { %1206 = vst.msk [vmem:[%s2514_s5 + $0x10] sm:$0xff] %vm84_vm0, %v499_v0 }
 0x2c5   :  { %v537_v2 = vpop.permute.xlu1 %536 }
 0x2c6   :  { %v539_v5 = vsel %vm425_vm1, %v525_v7, %v537_v2 }
 0x2c7   :  { %1208 = vst.msk [vmem:[%s2514_s5 + $0x18] sm:$0xff] %vm84_vm0, %v539_v5 }
 0x2cd   :  { %v579_v14 = vpop.permute.xlu0 %578 }
 0x2ce   :  { %v581_v16 = vsel %vm425_vm1, %v567_v27, %v579_v14 }
 0x2cf   :  { %1210 = vst.msk [vmem:[%s2514_s5 + $0x20] sm:$0xff] %vm84_vm0, %v581_v16 }
 0x2d3   :  { %v623_v15 = vpop.permute.xlu1 %622 }
 0x2d4   :  { %v625_v1 = vsel %vm425_vm1, %v611_v59, %v623_v15 }
 0x2d5   :  { %1212 = vst.msk [vmem:[%s2514_s5 + $0x28] sm:$0xff] %vm84_vm0, %v625_v1 }
 0x2dc   :  { %v669_v40 = vpop.permute.xlu0 %668 }
 0x2dd   :  { %v671_v47 = vsel %vm425_vm1, %v657_v49, %v669_v40 }
 0x2de   :  { %1214 = vst.msk [vmem:[%s2514_s5 + $0x30] sm:$0xff] %vm84_vm0, %v671_v47 }
 0x2e3   :  { %v717_v33 = vpop.permute.xlu1 %716 }
 0x2e4   :  { %v719_v13 = vsel %vm425_vm1, %v705_v50, %v717_v33 }
 0x2e5   :  { %1216 = vst.msk [vmem:[%s2514_s5 + $0x38] sm:$0xff] %vm84_vm0, %v719_v13 }
 0x2ea   :  { %v767_v7 = vpop.permute.xlu0 %766 }
 0x2eb   :  { %v769_v30 = vsel %vm425_vm1, %v755_v8, %v767_v7 }
 0x2ec   :  { %1218 = vst.msk [vmem:[%s2514_s5 + $0x40] sm:$0xff] %vm84_vm0, %v769_v30 }
 0x2ee   :  { %v819_v20 = vpop.permute.xlu1 %818 }
 0x2ef   :  { %v821_v26 = vsel %vm425_vm1, %v807_v12, %v819_v20 }
 0x2f0   :  { %1220 = vst.msk [vmem:[%s2514_s5 + $0x48] sm:$0xff] %vm84_vm0, %v821_v26 }
 0x2f2   :  { %v873_v21 = vpop.permute.xlu0 %872 }
 0x2f3   :  { %v875_v35 = vsel %vm425_vm1, %v861_v44, %v873_v21 }
 0x2f4   :  { %1222 = vst.msk [vmem:[%s2514_s5 + $0x50] sm:$0xff] %vm84_vm0, %v875_v35 }
 0x2f7   :  { %v929_v25 = vpop.permute.xlu1 %928 }
 0x2f8   :  { %v931_v6 = vsel %vm425_vm1, %v917_v55, %v929_v25 }
 0x2f9   :  { %1224 = vst.msk [vmem:[%s2514_s5 + $0x58] sm:$0xff] %vm84_vm0, %v931_v6 }
 0x2fc   :  { %v987_v46 = vpop.permute.xlu0 %986 }
 0x2fd   :  { %v989_v38 = vsel %vm425_vm1, %v975_v31, %v987_v46 }
 0x2fe   :  { %1226 = vst.msk [vmem:[%s2514_s5 + $0x60] sm:$0xff] %vm84_vm0, %v989_v38 }
 0x2ff   :  { %v1047_v60 = vpop.permute.xlu1 %1046 }
 0x300   :  { %v1049_v29 = vsel %vm425_vm1, %v1035_v63, %v1047_v60 }
 0x301   :  { %1228 = vst.msk [vmem:[%s2514_s5 + $0x68] sm:$0xff] %vm84_vm0, %v1049_v29 }
 0x304   :  { %v1109_v48 = vpop.permute.xlu0 %1108 }
 0x305   :  { %v1111_v3 = vsel %vm425_vm1, %v1097_v18, %v1109_v48 }
 0x306   :  { %1230 = vst.msk [vmem:[%s2514_s5 + $0x70] sm:$0xff] %vm84_vm0, %v1111_v3 }
 0x307   :  { %v1173_v54 = vpop.permute.xlu1 %1172 }
 0x308   :  { %v1175_v36 = vsel %vm425_vm1, %v1161_v45, %v1173_v54 }
 0x309   :  { %1232 = vst.msk [vmem:[%s2514_s5 + $0x78] sm:$0xff] %vm84_vm0, %v1175_v36 }

</bundles_post_ra>
